<compile_context>
chip_gen: v6e
topology: v6e:2x2x1
jax: 0.10.0
libtpu: 0.0.40
codegen_flags: <defaults>
</compile_context>

<pallas_src>
import functools

import jax
import jax.numpy as jnp
import numpy as np
from jax import lax
from jax.experimental import pallas as pl
from jax.experimental.pallas import tpu as pltpu

LANE = 128


def _round_up(x, m):
    return (x + m - 1) // m * m


def _pick_toh(OH, OW, max_rows=2048):
    """Largest divisor of OH with toh*OW <= max_rows (>=1): output rows/tile."""
    # TODO(synk): allow a masked tail tile so prime/awkward OH does not collapse
    # to toh=1 (tiny tiles); LCNet spatial sizes factor nicely so this is fine.
    best = 1
    for d in range(1, OH + 1):
        if OH % d == 0 and d * OW <= max_rows:
            best = d
    return best


def _pick_group(NT, blk_bytes, target_bytes=4 << 20):
    """Largest divisor of NT with g*blk_bytes <= target_bytes (>=1)."""
    best = 1
    for d in range(1, NT + 1):
        if NT % d == 0 and d * blk_bytes <= target_bytes:
            best = d
    return best


def _vmem_bytes(rows, cols, itemsize, sublane):
    """VMEM footprint of a (rows, cols) block incl. sublane/lane padding."""
    return _round_up(max(rows, 1), sublane) * _round_up(cols, LANE) * itemsize


# ---------------------------------------------------------------------------
# Kernel 1: implicit-im2col conv (single deep bf16 MXU dot, f32 accumulate)
#           with fused per-tile BN batch statistics.
# ---------------------------------------------------------------------------

def _conv_stats_kernel(x_ref, w_ref, y_ref, psum_ref, psq_ref, *, K, S, toh, OW):
    # x_ref : (H_pad, W_pad, Cin)    bf16  whole padded image of one batch elem
    # w_ref : (K*K*Cin, C_pad)       bf16  im2col weight matrix (lane-dense)
    # y_ref : (R, Cout)              bf16  conv output rows of this tile
    # psum_ref / psq_ref : (1, Cout) f32   per-tile partial BN statistics
    t = pl.program_id(1)
    R = toh * OW
    Cin = x_ref.shape[-1]
    Cout = y_ref.shape[-1]
    row0 = pl.multiple_of(t * (toh * S), toh * S)

    # Implicit im2col: concatenate the K*K shifted windows along the
    # contraction axis and issue ONE deep MXU dot (contraction K*K*Cin)
    # instead of K*K shallow Cin-deep dots + K*K-1 f32 accumulate passes.
    taps = []
    for kh in range(K):                      # static unroll over taps
        for kw in range(K):
            if S == 1:
                win = x_ref[pl.ds(row0 + kh, toh), pl.ds(kw, OW), :]
            else:
                # TODO(synk): for stride-2, pre-splitting the image into
                # column-parity planes would avoid the doubly-strided load.
                win = x_ref[pl.ds(row0 + kh, toh, stride=S),
                            pl.ds(kw, OW, stride=S), :]
            taps.append(win)                                  # (toh, OW, Cin)
    lhs = jnp.concatenate(taps, axis=-1).reshape(R, K * K * Cin)   # bf16
    acc = jnp.dot(lhs, w_ref[...],
                  preferred_element_type=jnp.float32)         # (R, C_pad) f32

    acc = acc[:, :Cout]                       # drop MXU lane padding in-kernel
    y_ref[...] = acc.astype(y_ref.dtype)
    # Per-tile partial BN statistics from the f32 accumulator (exact: toh
    # divides OH, so the tile contains no padded output positions).
    psum_ref[...] = jnp.sum(acc, axis=0, keepdims=True)
    psq_ref[...] = jnp.sum(acc * acc, axis=0, keepdims=True)


# ---------------------------------------------------------------------------
# Kernel 2: BN normalize + affine + hardswish epilogue (bf16 in, f32 out).
# ---------------------------------------------------------------------------

def _bn_hardswish_kernel(y_ref, scale_ref, shift_ref, o_ref):
    # z = scale * y + shift  (BN folded);  out = z * relu6(z + 3) / 6
    z = y_ref[...].astype(jnp.float32) * scale_ref[...] + shift_ref[...]
    o_ref[...] = z * jnp.clip(z + 3.0, 0.0, 6.0) * (1.0 / 6.0)


# ---------------------------------------------------------------------------
# Wrapper
# ---------------------------------------------------------------------------

@functools.partial(jax.jit, static_argnames=("filter_size", "stride"))
def conv_bn_hardswish(x_nchw, conv_w, gamma, beta, *, filter_size, stride,
                      eps=1e-5):
    """Forward of ConvBNLayer (num_groups=1), BN in training mode (batch stats)."""
    # TODO(synk): grouped / depthwise conv (num_groups > 1) is not implemented.
    N, Cin, H, W = x_nchw.shape
    Cout = conv_w.shape[0]
    K, S = filter_size, stride
    P = (K - 1) // 2
    OH = (H + 2 * P - K) // S + 1
    OW = (W + 2 * P - K) // S + 1
    KKC = K * K * Cin
    C_pad = _round_up(Cout, LANE)            # MXU-facing lane padding only

    # NHWC, bf16, spatial zero padding (glue).  Pre-casting to bf16 halves the
    # input HBM traffic and the per-image VMEM block.
    x_nhwc = jnp.transpose(x_nchw, (0, 2, 3, 1)).astype(jnp.bfloat16)
    x_pad = jnp.pad(x_nhwc, ((0, 0), (P, P), (P, P), (0, 0)))
    H_pad, W_pad = H + 2 * P, W + 2 * P

    # Weights: (Cout, Cin, K, K) -> im2col matrix (K*K*Cin, C_pad), bf16.
    # Row order is (kh, kw, cin), matching the in-kernel window concatenation.
    w = jnp.transpose(conv_w, (2, 3, 1, 0)).reshape(KKC, Cout)
    w = jnp.pad(w, ((0, 0), (0, C_pad - Cout))).astype(jnp.bfloat16)

    toh = _pick_toh(OH, OW)                  # output rows per tile
    n_t = OH // toh
    R = toh * OW                             # matmul rows per grid step
    NT = N * n_t

    # VMEM budgets: account for sublane (8 f32 / 16 bf16) and 128-lane padding
    # of every block, double buffering, and the big live values (lhs, acc).
    x_blk = H_pad * _vmem_bytes(W_pad, Cin, 2, 16)
    w_blk = _vmem_bytes(KKC, C_pad, 2, 16)
    y_blk = _vmem_bytes(R, Cout, 2, 16)
    ps_blk = _vmem_bytes(1, Cout, 4, 8)
    live = _vmem_bytes(R, KKC, 2, 16) + _vmem_bytes(R, C_pad, 4, 8)
    vmem1 = int(min(60 << 20,
                    max(16 << 20,
                        2 * (x_blk + w_blk + y_blk + 2 * ps_blk)
                        + 2 * live + (4 << 20))))

    kernel1 = functools.partial(_conv_stats_kernel, K=K, S=S, toh=toh, OW=OW)

    y, psum, psq = pl.pallas_call(
        kernel1,
        out_shape=(
            jax.ShapeDtypeStruct((NT, R, Cout), jnp.bfloat16),
            jax.ShapeDtypeStruct((NT, 1, Cout), jnp.float32),
            jax.ShapeDtypeStruct((NT, 1, Cout), jnp.float32),
        ),
        grid_spec=pltpu.PrefetchScalarGridSpec(
            num_scalar_prefetch=0,
            grid=(N, n_t),
            in_specs=[
                # Whole padded image of batch element n; the block index is
                # constant over the inner tile axis so it is DMA'd once/image.
                # TODO(synk): for stem-sized images on v7x (64 MiB VMEM) this
                # block should be H-tiled with a (toh*S + K - 1)-row halo.
                pl.BlockSpec((None, H_pad, W_pad, Cin),
                             lambda n, t: (n, 0, 0, 0)),
                # Full (small) im2col weight matrix, resident across the grid.
                pl.BlockSpec((KKC, C_pad), lambda n, t: (0, 0)),
            ],
            out_specs=(
                pl.BlockSpec((None, R, Cout), lambda n, t: (n * n_t + t, 0, 0)),
                pl.BlockSpec((None, 1, Cout), lambda n, t: (n * n_t + t, 0, 0)),
                pl.BlockSpec((None, 1, Cout), lambda n, t: (n * n_t + t, 0, 0)),
            ),
        ),
        compiler_params=pltpu.CompilerParams(
            # Only the batch axis may be split across TensorCores: the image
            # block is constant over t, so splitting t would duplicate its DMA.
            dimension_semantics=("parallel", "arbitrary"),
            vmem_limit_bytes=vmem1),
    )(x_pad, w)

    # Finish the BN batch statistics: per-tile centered partials combined with
    # the Chan parallel-variance formula (tiny (NT, Cout) reduction in XLA).
    R_f = jnp.float32(R)
    M_f = jnp.float32(NT * R)                 # = N * OH * OW
    psum2 = psum[:, 0, :]                     # (NT, Cout)
    psq2 = psq[:, 0, :]
    mean_t = psum2 / R_f
    m2_t = jnp.maximum(psq2 - psum2 * mean_t, 0.0)
    mean = jnp.sum(psum2, axis=0) / M_f
    m2 = jnp.sum(m2_t, axis=0) + R_f * jnp.sum((mean_t - mean) ** 2, axis=0)
    var = jnp.maximum(m2 / M_f, 0.0)
    inv_std = lax.rsqrt(var + eps)
    gamma_f = gamma.astype(jnp.float32)
    beta_f = beta.astype(jnp.float32)
    scale = (gamma_f * inv_std).reshape(1, Cout)
    shift = (beta_f - mean * gamma_f * inv_std).reshape(1, Cout)

    # BN normalize + hardswish epilogue (streaming; no 128-lane padded HBM
    # intermediate; the old input_output_alias is dropped since y is bf16).
    blk2 = _vmem_bytes(R, Cout, 2, 16) + _vmem_bytes(R, Cout, 4, 8)
    g = _pick_group(NT, blk2)
    vmem2 = int(min(60 << 20, max(16 << 20, 2 * g * blk2 + (4 << 20))))

    out_flat = pl.pallas_call(
        _bn_hardswish_kernel,
        out_shape=jax.ShapeDtypeStruct((NT, R, Cout), jnp.float32),
        grid_spec=pltpu.PrefetchScalarGridSpec(
            num_scalar_prefetch=0,
            grid=(NT // g,),
            in_specs=[
                pl.BlockSpec((g, R, Cout), lambda i: (i, 0, 0)),
                pl.BlockSpec((1, Cout), lambda i: (0, 0)),
                pl.BlockSpec((1, Cout), lambda i: (0, 0)),
            ],
            out_specs=pl.BlockSpec((g, R, Cout), lambda i: (i, 0, 0)),
        ),
        compiler_params=pltpu.CompilerParams(
            dimension_semantics=("parallel",),
            vmem_limit_bytes=vmem2),
    )(y, scale, shift)

    # Free metadata reshape to NHWC; the transpose below only exists to match
    # the PyTorch NCHW interface (a fused NHWC pipeline would keep NHWC).
    out = out_flat.reshape(N, OH, OW, Cout)
    return jnp.transpose(out, (0, 3, 1, 2))


# ---------------------------------------------------------------------------
# Pure-JAX reference (for correctness check)
# ---------------------------------------------------------------------------

def reference(x_nchw, conv_w, gamma, beta, *, filter_size, stride, eps=1e-5):
    P = (filter_size - 1) // 2
    y = lax.conv_general_dilated(
        x_nchw.astype(jnp.float32), conv_w.astype(jnp.float32),
        window_strides=(stride, stride), padding=((P, P), (P, P)),
        dimension_numbers=("NCHW", "OIHW", "NCHW"))
    mean = jnp.mean(y, axis=(0, 2, 3), keepdims=True)
    var = jnp.mean((y - mean) ** 2, axis=(0, 2, 3), keepdims=True)
    z = (y - mean) / jnp.sqrt(var + eps)
    z = z * gamma.reshape(1, -1, 1, 1) + beta.reshape(1, -1, 1, 1)
    return z * jnp.clip(z + 3.0, 0.0, 6.0) / 6.0


# ---------------------------------------------------------------------------

if __name__ == "__main__":
    # Module hyper-params (small, consistent with ConvBNLayer usage in LCNet).
    num_channels, filter_size, num_filters, stride = 4, 3, 8, 1
    N, H, W = 2, 16, 16

    key = jax.random.PRNGKey(0)
    k_x, k_w, k_g, k_b = jax.random.split(key, 4)

    x = jax.random.normal(k_x, (N, num_channels, H, W), dtype=jnp.float32)
    conv_w = 0.1 * jax.random.normal(
        k_w, (num_filters, num_channels, filter_size, filter_size),
        dtype=jnp.float32)
    gamma = 1.0 + 0.1 * jax.random.normal(k_g, (num_filters,), jnp.float32)
    beta = 0.1 * jax.random.normal(k_b, (num_filters,), jnp.float32)

    out = conv_bn_hardswish(x, conv_w, gamma, beta,
                            filter_size=filter_size, stride=stride)
    out = jax.block_until_ready(out)
    assert out.shape == (N, num_filters, H, W)

    # Check 1: reference evaluated on bf16-rounded conv inputs (matches the
    # MXU input precision); remaining delta is the bf16 y intermediate.
    x_q = x.astype(jnp.bfloat16).astype(jnp.float32)
    w_q = conv_w.astype(jnp.bfloat16).astype(jnp.float32)
    ref_q = reference(x_q, w_q, gamma, beta,
                      filter_size=filter_size, stride=stride)
    np.testing.assert_allclose(np.asarray(out), np.asarray(ref_q),
                               rtol=2e-2, atol=2e-2)

    # Check 2: loose check against the full-f32 module math (bf16 noise).
    ref = reference(x, conv_w, gamma, beta,
                    filter_size=filter_size, stride=stride)
    np.testing.assert_allclose(np.asarray(out), np.asarray(ref),
                               rtol=5e-2, atol=5e-2)

    print("KERNEL_OK")
</pallas_src>

<mosaic_0001>
module attributes {stable_mosaic.version = 11 : i64} {
  func.func @_conv_stats_kernel(%arg0: i32, %arg1: i32, %arg2: memref<1x18x18x4xbf16, #tpu.memory_space<vmem>>, %arg3: memref<36x128xbf16, #tpu.memory_space<vmem>>, %arg4: memref<1x256x8xbf16, #tpu.memory_space<vmem>>, %arg5: memref<1x1x8xf32, #tpu.memory_space<vmem>>, %arg6: memref<1x1x8xf32, #tpu.memory_space<vmem>>) attributes {dimension_semantics = [#tpu.dimension_semantics<parallel>, #tpu.dimension_semantics<arbitrary>], iteration_bounds = array<i64: 2, 1>, scalar_prefetch = 0 : i64, scratch_operands = 0 : i64, tpu.core_type = #tpu.core_type<tc>, window_params = [{transform_indices = @transform_0, window_bounds = array<i64: 1, 18, 18, 4>}, {pipeline_mode = #tpu.pipeline_mode<synchronous>, transform_indices = @transform_1, window_bounds = array<i64: 36, 128>}, {transform_indices = @transform_2, window_bounds = array<i64: 1, 256, 8>}, {transform_indices = @transform_3, window_bounds = array<i64: 1, 1, 8>}, {transform_indices = @transform_4, window_bounds = array<i64: 1, 1, 8>}]} {
    %c16_i32 = arith.constant 16 : i32
    %0 = arith.muli %arg1, %c16_i32 : i32
    %1 = tpu.assume_multiple %0, 16 : i32
    %c0_i32 = arith.constant 0 : i32
    %2 = arith.addi %1, %c0_i32 : i32
    %c0 = arith.constant 0 : index
    %3 = arith.index_cast %2 : i32 to index
    %c0_0 = arith.constant 0 : index
    %c0_1 = arith.constant 0 : index
    %4 = vector.load %arg2[%c0, %3, %c0_0, %c0_1] : memref<1x18x18x4xbf16, #tpu.memory_space<vmem>>, vector<1x16x16x4xbf16>
    %5 = vector.shape_cast %4 : vector<1x16x16x4xbf16> to vector<16x16x4xbf16>
    %c0_i32_2 = arith.constant 0 : i32
    %6 = arith.addi %1, %c0_i32_2 : i32
    %c0_3 = arith.constant 0 : index
    %7 = arith.index_cast %6 : i32 to index
    %c1 = arith.constant 1 : index
    %c0_4 = arith.constant 0 : index
    %8 = vector.load %arg2[%c0_3, %7, %c1, %c0_4] : memref<1x18x18x4xbf16, #tpu.memory_space<vmem>>, vector<1x16x16x4xbf16>
    %9 = vector.shape_cast %8 : vector<1x16x16x4xbf16> to vector<16x16x4xbf16>
    %c0_i32_5 = arith.constant 0 : i32
    %10 = arith.addi %1, %c0_i32_5 : i32
    %c0_6 = arith.constant 0 : index
    %11 = arith.index_cast %10 : i32 to index
    %c2 = arith.constant 2 : index
    %c0_7 = arith.constant 0 : index
    %12 = vector.load %arg2[%c0_6, %11, %c2, %c0_7] : memref<1x18x18x4xbf16, #tpu.memory_space<vmem>>, vector<1x16x16x4xbf16>
    %13 = vector.shape_cast %12 : vector<1x16x16x4xbf16> to vector<16x16x4xbf16>
    %c1_i32 = arith.constant 1 : i32
    %14 = arith.addi %1, %c1_i32 : i32
    %c0_8 = arith.constant 0 : index
    %15 = arith.index_cast %14 : i32 to index
    %c0_9 = arith.constant 0 : index
    %c0_10 = arith.constant 0 : index
    %16 = vector.load %arg2[%c0_8, %15, %c0_9, %c0_10] : memref<1x18x18x4xbf16, #tpu.memory_space<vmem>>, vector<1x16x16x4xbf16>
    %17 = vector.shape_cast %16 : vector<1x16x16x4xbf16> to vector<16x16x4xbf16>
    %c1_i32_11 = arith.constant 1 : i32
    %18 = arith.addi %1, %c1_i32_11 : i32
    %c0_12 = arith.constant 0 : index
    %19 = arith.index_cast %18 : i32 to index
    %c1_13 = arith.constant 1 : index
    %c0_14 = arith.constant 0 : index
    %20 = vector.load %arg2[%c0_12, %19, %c1_13, %c0_14] : memref<1x18x18x4xbf16, #tpu.memory_space<vmem>>, vector<1x16x16x4xbf16>
    %21 = vector.shape_cast %20 : vector<1x16x16x4xbf16> to vector<16x16x4xbf16>
    %c1_i32_15 = arith.constant 1 : i32
    %22 = arith.addi %1, %c1_i32_15 : i32
    %c0_16 = arith.constant 0 : index
    %23 = arith.index_cast %22 : i32 to index
    %c2_17 = arith.constant 2 : index
    %c0_18 = arith.constant 0 : index
    %24 = vector.load %arg2[%c0_16, %23, %c2_17, %c0_18] : memref<1x18x18x4xbf16, #tpu.memory_space<vmem>>, vector<1x16x16x4xbf16>
    %25 = vector.shape_cast %24 : vector<1x16x16x4xbf16> to vector<16x16x4xbf16>
    %c2_i32 = arith.constant 2 : i32
    %26 = arith.addi %1, %c2_i32 : i32
    %c0_19 = arith.constant 0 : index
    %27 = arith.index_cast %26 : i32 to index
    %c0_20 = arith.constant 0 : index
    %c0_21 = arith.constant 0 : index
    %28 = vector.load %arg2[%c0_19, %27, %c0_20, %c0_21] : memref<1x18x18x4xbf16, #tpu.memory_space<vmem>>, vector<1x16x16x4xbf16>
    %29 = vector.shape_cast %28 : vector<1x16x16x4xbf16> to vector<16x16x4xbf16>
    %c2_i32_22 = arith.constant 2 : i32
    %30 = arith.addi %1, %c2_i32_22 : i32
    %c0_23 = arith.constant 0 : index
    %31 = arith.index_cast %30 : i32 to index
    %c1_24 = arith.constant 1 : index
    %c0_25 = arith.constant 0 : index
    %32 = vector.load %arg2[%c0_23, %31, %c1_24, %c0_25] : memref<1x18x18x4xbf16, #tpu.memory_space<vmem>>, vector<1x16x16x4xbf16>
    %33 = vector.shape_cast %32 : vector<1x16x16x4xbf16> to vector<16x16x4xbf16>
    %c2_i32_26 = arith.constant 2 : i32
    %34 = arith.addi %1, %c2_i32_26 : i32
    %c0_27 = arith.constant 0 : index
    %35 = arith.index_cast %34 : i32 to index
    %c2_28 = arith.constant 2 : index
    %c0_29 = arith.constant 0 : index
    %36 = vector.load %arg2[%c0_27, %35, %c2_28, %c0_29] : memref<1x18x18x4xbf16, #tpu.memory_space<vmem>>, vector<1x16x16x4xbf16>
    %37 = vector.shape_cast %36 : vector<1x16x16x4xbf16> to vector<16x16x4xbf16>
    %38 = tpu.concatenate %5, %9, %13, %17, %21, %25, %29, %33, %37 in 2 : vector<16x16x4xbf16>, vector<16x16x4xbf16>, vector<16x16x4xbf16>, vector<16x16x4xbf16>, vector<16x16x4xbf16>, vector<16x16x4xbf16>, vector<16x16x4xbf16>, vector<16x16x4xbf16>, vector<16x16x4xbf16> -> vector<16x16x36xbf16>
    %39 = vector.shape_cast %38 : vector<16x16x36xbf16> to vector<256x36xbf16>
    %c0_30 = arith.constant 0 : index
    %c0_31 = arith.constant 0 : index
    %40 = vector.load %arg3[%c0_30, %c0_31] : memref<36x128xbf16, #tpu.memory_space<vmem>>, vector<36x128xbf16>
    %cst = arith.constant dense<0.000000e+00> : vector<256x128xf32>
    %41 = tpu.matmul %39, %40, %cst {dimension_numbers = #tpu.dot_dimension_numbers<[1], [0], [0], [1], [0, 0, 1, 1], [], []>} : vector<256x36xbf16>, vector<36x128xbf16>, vector<256x128xf32> -> vector<256x128xf32>
    %42 = vector.extract_strided_slice %41 {offsets = [0, 0], sizes = [256, 8], strides = [1, 1]} : vector<256x128xf32> to vector<256x8xf32>
    %43 = arith.truncf %42 : vector<256x8xf32> to vector<256x8xbf16>
    %c0_32 = arith.constant 0 : index
    %c0_33 = arith.constant 0 : index
    %c0_34 = arith.constant 0 : index
    %44 = vector.load %arg4[%c0_32, %c0_33, %c0_34] : memref<1x256x8xbf16, #tpu.memory_space<vmem>>, vector<1x256x8xbf16>
    %45 = vector.shape_cast %44 : vector<1x256x8xbf16> to vector<256x8xbf16>
    %46 = vector.shape_cast %43 : vector<256x8xbf16> to vector<1x256x8xbf16>
    tpu.vector_store %arg4[%c0_32, %c0_33, %c0_34], %46 {strides = array<i32>} : memref<1x256x8xbf16, #tpu.memory_space<vmem>>, vector<1x256x8xbf16>,
    %cst_35 = arith.constant dense<0.000000e+00> : vector<8xf32>
    %47 = vector.multi_reduction <add>, %42, %cst_35 [0] : vector<256x8xf32> to vector<8xf32>
    %48 = vector.shape_cast %47 : vector<8xf32> to vector<1x8xf32>
    %c0_36 = arith.constant 0 : index
    %c0_37 = arith.constant 0 : index
    %c0_38 = arith.constant 0 : index
    %49 = vector.load %arg5[%c0_36, %c0_37, %c0_38] : memref<1x1x8xf32, #tpu.memory_space<vmem>>, vector<1x1x8xf32>
    %50 = vector.shape_cast %49 : vector<1x1x8xf32> to vector<1x8xf32>
    %51 = vector.shape_cast %48 : vector<1x8xf32> to vector<1x1x8xf32>
    tpu.vector_store %arg5[%c0_36, %c0_37, %c0_38], %51 {strides = array<i32>} : memref<1x1x8xf32, #tpu.memory_space<vmem>>, vector<1x1x8xf32>,
    %52 = arith.mulf %42, %42 : vector<256x8xf32>
    %cst_39 = arith.constant dense<0.000000e+00> : vector<8xf32>
    %53 = vector.multi_reduction <add>, %52, %cst_39 [0] : vector<256x8xf32> to vector<8xf32>
    %54 = vector.shape_cast %53 : vector<8xf32> to vector<1x8xf32>
    %c0_40 = arith.constant 0 : index
    %c0_41 = arith.constant 0 : index
    %c0_42 = arith.constant 0 : index
    %55 = vector.load %arg6[%c0_40, %c0_41, %c0_42] : memref<1x1x8xf32, #tpu.memory_space<vmem>>, vector<1x1x8xf32>
    %56 = vector.shape_cast %55 : vector<1x1x8xf32> to vector<1x8xf32>
    %57 = vector.shape_cast %54 : vector<1x8xf32> to vector<1x1x8xf32>
    tpu.vector_store %arg6[%c0_40, %c0_41, %c0_42], %57 {strides = array<i32>} : memref<1x1x8xf32, #tpu.memory_space<vmem>>, vector<1x1x8xf32>,
    return
  }
  func.func @transform_0(%arg0: i32, %arg1: i32) -> (i32, i32, i32, i32) {
    %c0_i32 = arith.constant 0 : i32
    %c0_i32_0 = arith.constant 0 : i32
    %c0_i32_1 = arith.constant 0 : i32
    %c0_i32_2 = arith.constant 0 : i32
    return %arg0, %c0_i32, %c0_i32_0, %c0_i32_1 : i32, i32, i32, i32
  }
  func.func @transform_1(%arg0: i32, %arg1: i32) -> (i32, i32) {
    %c0_i32 = arith.constant 0 : i32
    %c0_i32_0 = arith.constant 0 : i32
    %c0_i32_1 = arith.constant 0 : i32
    return %c0_i32, %c0_i32_0 : i32, i32
  }
  func.func @transform_2(%arg0: i32, %arg1: i32) -> (i32, i32, i32) {
    %c1_i32 = arith.constant 1 : i32
    %0 = arith.muli %arg0, %c1_i32 : i32
    %1 = arith.addi %0, %arg1 : i32
    %c0_i32 = arith.constant 0 : i32
    %c0_i32_0 = arith.constant 0 : i32
    %c0_i32_1 = arith.constant 0 : i32
    return %1, %c0_i32, %c0_i32_0 : i32, i32, i32
  }
  func.func @transform_3(%arg0: i32, %arg1: i32) -> (i32, i32, i32) {
    %c1_i32 = arith.constant 1 : i32
    %0 = arith.muli %arg0, %c1_i32 : i32
    %1 = arith.addi %0, %arg1 : i32
    %c0_i32 = arith.constant 0 : i32
    %c0_i32_0 = arith.constant 0 : i32
    %c0_i32_1 = arith.constant 0 : i32
    return %1, %c0_i32, %c0_i32_0 : i32, i32, i32
  }
  func.func @transform_4(%arg0: i32, %arg1: i32) -> (i32, i32, i32) {
    %c1_i32 = arith.constant 1 : i32
    %0 = arith.muli %arg0, %c1_i32 : i32
    %1 = arith.addi %0, %arg1 : i32
    %c0_i32 = arith.constant 0 : i32
    %c0_i32_0 = arith.constant 0 : i32
    %c0_i32_1 = arith.constant 0 : i32
    return %1, %c0_i32, %c0_i32_0 : i32, i32, i32
  }
}

module attributes {stable_mosaic.version = 11 : i64} {
  func.func @_bn_hardswish_kernel(%arg0: i32, %arg1: memref<2x256x8xbf16, #tpu.memory_space<vmem>>, %arg2: memref<1x8xf32, #tpu.memory_space<vmem>>, %arg3: memref<1x8xf32, #tpu.memory_space<vmem>>, %arg4: memref<2x256x8xf32, #tpu.memory_space<vmem>>) attributes {dimension_semantics = [#tpu.dimension_semantics<parallel>], iteration_bounds = array<i64: 1>, scalar_prefetch = 0 : i64, scratch_operands = 0 : i64, tpu.core_type = #tpu.core_type<tc>, window_params = [{transform_indices = @transform_0, window_bounds = array<i64: 2, 256, 8>}, {pipeline_mode = #tpu.pipeline_mode<synchronous>, transform_indices = @transform_1, window_bounds = array<i64: 1, 8>}, {pipeline_mode = #tpu.pipeline_mode<synchronous>, transform_indices = @transform_2, window_bounds = array<i64: 1, 8>}, {transform_indices = @transform_3, window_bounds = array<i64: 2, 256, 8>}]} {
    %c0 = arith.constant 0 : index
    %c0_0 = arith.constant 0 : index
    %c0_1 = arith.constant 0 : index
    %0 = vector.load %arg1[%c0, %c0_0, %c0_1] : memref<2x256x8xbf16, #tpu.memory_space<vmem>>, vector<2x256x8xbf16>
    %1 = arith.extf %0 : vector<2x256x8xbf16> to vector<2x256x8xf32>
    %c0_2 = arith.constant 0 : index
    %c0_3 = arith.constant 0 : index
    %2 = vector.load %arg2[%c0_2, %c0_3] : memref<1x8xf32, #tpu.memory_space<vmem>>, vector<1x8xf32>
    %3 = vector.shape_cast %2 : vector<1x8xf32> to vector<1x1x8xf32>
    %4 = vector.broadcast %3 : vector<1x1x8xf32> to vector<2x256x8xf32>
    %5 = arith.mulf %1, %4 : vector<2x256x8xf32>
    %c0_4 = arith.constant 0 : index
    %c0_5 = arith.constant 0 : index
    %6 = vector.load %arg3[%c0_4, %c0_5] : memref<1x8xf32, #tpu.memory_space<vmem>>, vector<1x8xf32>
    %7 = vector.shape_cast %6 : vector<1x8xf32> to vector<1x1x8xf32>
    %8 = vector.broadcast %7 : vector<1x1x8xf32> to vector<2x256x8xf32>
    %9 = arith.addf %5, %8 : vector<2x256x8xf32>
    %cst = arith.constant 3.000000e+00 : f32
    %10 = vector.broadcast %cst : f32 to vector<2x256x8xf32>
    %11 = arith.addf %9, %10 : vector<2x256x8xf32>
    %cst_6 = arith.constant 0.000000e+00 : f32
    %cst_7 = arith.constant 6.000000e+00 : f32
    %12 = vector.broadcast %cst_6 : f32 to vector<2x256x8xf32>
    %13 = arith.maximumf %12, %11 : vector<2x256x8xf32>
    %14 = vector.broadcast %cst_7 : f32 to vector<2x256x8xf32>
    %15 = arith.minimumf %14, %13 : vector<2x256x8xf32>
    %16 = arith.mulf %9, %15 : vector<2x256x8xf32>
    %cst_8 = arith.constant 0.166666672 : f32
    %17 = vector.broadcast %cst_8 : f32 to vector<2x256x8xf32>
    %18 = arith.mulf %16, %17 : vector<2x256x8xf32>
    %c0_9 = arith.constant 0 : index
    %c0_10 = arith.constant 0 : index
    %c0_11 = arith.constant 0 : index
    %19 = vector.load %arg4[%c0_9, %c0_10, %c0_11] : memref<2x256x8xf32, #tpu.memory_space<vmem>>, vector<2x256x8xf32>
    tpu.vector_store %arg4[%c0_9, %c0_10, %c0_11], %18 {strides = array<i32>} : memref<2x256x8xf32, #tpu.memory_space<vmem>>, vector<2x256x8xf32>,
    return
  }
  func.func @transform_0(%arg0: i32) -> (i32, i32, i32) {
    %c0_i32 = arith.constant 0 : i32
    %c0_i32_0 = arith.constant 0 : i32
    %c0_i32_1 = arith.constant 0 : i32
    return %arg0, %c0_i32, %c0_i32_0 : i32, i32, i32
  }
  func.func @transform_1(%arg0: i32) -> (i32, i32) {
    %c0_i32 = arith.constant 0 : i32
    %c0_i32_0 = arith.constant 0 : i32
    %c0_i32_1 = arith.constant 0 : i32
    return %c0_i32, %c0_i32_0 : i32, i32
  }
  func.func @transform_2(%arg0: i32) -> (i32, i32) {
    %c0_i32 = arith.constant 0 : i32
    %c0_i32_0 = arith.constant 0 : i32
    %c0_i32_1 = arith.constant 0 : i32
    return %c0_i32, %c0_i32_0 : i32, i32
  }
  func.func @transform_3(%arg0: i32) -> (i32, i32, i32) {
    %c0_i32 = arith.constant 0 : i32
    %c0_i32_0 = arith.constant 0 : i32
    %c0_i32_1 = arith.constant 0 : i32
    return %arg0, %c0_i32, %c0_i32_0 : i32, i32, i32
  }
}

</mosaic_0001>

<bundles_post_ra>
// kernel: conv_bn_hardswish.3
= control target key start
LH: loop header
LB: loop body
LE: loop exit
PB: predicated region body
PF: predicated region fallthrough
CT: control target
= control target key end

     0   :  { %vm604_vm0 = vcmask 64512   ;;  %s1336_s0 = inlined_call_operand.vmem [shape: bf16[2,256,8], index: 0, kind: input, shape index: {}]   ;;  %s1337_s1 = inlined_call_operand.vmem [shape: f32[1,8], index: 1, kind: input, shape index: {}]   ;;  %s1338_s2 = inlined_call_operand.vmem [shape: f32[1,8], index: 2, kind: input, shape index: {}]   ;;  %s1339_s3 = inlined_call_operand.vmem [shape: f32[2,256,8], index: 3, kind: output, shape index: {}]  }
   0x1   :  { %v676_v0 = vld [vmem:[%s1336_s0] sm:$0xff]   ;;  %v803_v4 = vld [vmem:[%s1336_s0 + $0x8] sm:$0xff]   ;;  %v804_v5 = vld [vmem:[%s1336_s0 + $0x10] sm:$0xff]  }
   0x2   :  { %v862_v1 = vld [vmem:[%s1337_s1] ss:$0 sm:$0xff]  ;;  %v677_v2 = vunpack.c.l.bf16 %v676_v0  ;;  %v678_v3 = vunpack.c.h.bf16 %v676_v0  ;;  %v805_v6 = vld [vmem:[%s1336_s0 + $0x18] sm:$0xff]   ;;  %v681_v8 = vunpack.c.l.bf16 %v803_v4  ;;  %v682_v9 = vunpack.c.h.bf16 %v803_v4  ;;  %v807_v61 = vld [vmem:[%s1336_s0 + $0x28] sm:$0xff]  }
   0x3   :  { %v876_v7 = vld [vmem:[%s1338_s2] ss:$0 sm:$0xff]  ;;  %v685_v10 = vunpack.c.l.bf16 %v804_v5  ;;  %v686_v11 = vunpack.c.h.bf16 %v804_v5  ;;  %v689_v14 = vunpack.c.l.bf16 %v805_v6  ;;  %v690_v15 = vunpack.c.h.bf16 %v805_v6  ;;  %v809_v4 = vld [vmem:[%s1336_s0 + $0x38] sm:$0xff]  }
   0x4   :  { %v149_v12 = vmul.f32 %v677_v2, %v862_v1  ;;  %v150_v13 = vmul.f32 %v678_v3, %v862_v1  ;;  %v151_v16 = vmul.f32 %v681_v8, %v862_v1  ;;  %v152_v17 = vmul.f32 %v682_v9, %v862_v1  ;;  %v806_v56 = vld [vmem:[%s1336_s0 + $0x20] sm:$0xff]   ;;  %v808_v3 = vld [vmem:[%s1336_s0 + $0x30] sm:$0xff]  }
   0x5   :  { %v153_v18 = vmul.f32 %v685_v10, %v862_v1  ;;  %v154_v19 = vmul.f32 %v686_v11, %v862_v1  ;;  %v155_v22 = vmul.f32 %v689_v14, %v862_v1  ;;  %v156_v23 = vmul.f32 %v690_v15, %v862_v1 }
   0x6   :  { %v220_v20 = vadd.f32 %v876_v7, %v149_v12  ;;  %v221_v21 = vadd.f32 %v876_v7, %v150_v13  ;;  %v222_v24 = vadd.f32 %v876_v7, %v151_v16  ;;  %v223_v25 = vadd.f32 %v876_v7, %v152_v17 }
   0x7   :  { %v224_v26 = vadd.f32 %v876_v7, %v153_v18  ;;  %v225_v27 = vadd.f32 %v876_v7, %v154_v19  ;;  %v226_v30 = vadd.f32 %v876_v7, %v155_v22  ;;  %v227_v31 = vadd.f32 %v876_v7, %v156_v23 }
   0x8   :  { %v284_v28 = vadd.f32 3.0, %v220_v20  ;;  %v285_v29 = vadd.f32 3.0, %v221_v21  ;;  %v286_v32 = vadd.f32 3.0, %v222_v24  ;;  %v287_v33 = vadd.f32 3.0, %v223_v25 }
   0x9   :  { %v288_v34 = vadd.f32 3.0, %v224_v26  ;;  %v289_v35 = vadd.f32 3.0, %v225_v27  ;;  %v290_v38 = vadd.f32 3.0, %v226_v30  ;;  %v291_v39 = vadd.f32 3.0, %v227_v31 }
   0xa   :  { %v348_v36 = vmax.f32 %v284_v28, 0.0  ;;  %v349_v37 = vmax.f32 %v285_v29, 0.0  ;;  %v350_v40 = vmax.f32 %v286_v32, 0.0  ;;  %v351_v41 = vmax.f32 %v287_v33, 0.0 }
   0xb   :  { %v352_v42 = vmax.f32 %v288_v34, 0.0  ;;  %v353_v43 = vmax.f32 %v289_v35, 0.0  ;;  %v354_v46 = vmax.f32 %v290_v38, 0.0  ;;  %v355_v47 = vmax.f32 %v291_v39, 0.0 }
   0xc   :  { %v412_v44 = vmin.f32 %v348_v36, 6.0  ;;  %v413_v45 = vmin.f32 %v349_v37, 6.0  ;;  %v414_v48 = vmin.f32 %v350_v40, 6.0  ;;  %v415_v49 = vmin.f32 %v351_v41, 6.0 }
   0xd   :  { %v416_v50 = vmin.f32 %v352_v42, 6.0  ;;  %v417_v51 = vmin.f32 %v353_v43, 6.0  ;;  %v418_v54 = vmin.f32 %v354_v46, 6.0  ;;  %v419_v55 = vmin.f32 %v355_v47, 6.0 }
   0xe   :  { %v476_v52 = vmul.f32 %v412_v44, %v220_v20  ;;  %v477_v53 = vmul.f32 %v413_v45, %v221_v21  ;;  %v478_v57 = vmul.f32 %v414_v48, %v222_v24  ;;  %v479_v58 = vmul.f32 %v415_v49, %v223_v25 }
   0xf   :  { %v480_v59 = vmul.f32 %v416_v50, %v224_v26  ;;  %v481_v60 = vmul.f32 %v417_v51, %v225_v27  ;;  %v482_v0 = vmul.f32 %v418_v54, %v226_v30  ;;  %v483_v2 = vmul.f32 %v419_v55, %v227_v31 }
  0x10   :  { %v540_v62 = vmul.f32 0.16666667, %v476_v52  ;;  %v541_v63 = vmul.f32 0.16666667, %v477_v53  ;;  %v542_v5 = vmul.f32 0.16666667, %v478_v57  ;;  %v693_v9 = vunpack.c.l.bf16 %v806_v56 }
  0x11   :  { %v543_v6 = vmul.f32 0.16666667, %v479_v58  ;;  %v544_v8 = vmul.f32 0.16666667, %v480_v59  ;;  %v545_v10 = vmul.f32 0.16666667, %v481_v60  ;;  %v694_v13 = vunpack.c.h.bf16 %v806_v56 }
  0x12   :  { %605 = vst.msk [vmem:[%s1339_s3] sm:$0xff] %vm604_vm0, %v540_v62  ;;  %606 = vst.msk [vmem:[%s1339_s3 + $0x8] sm:$0xff] %vm604_vm0, %v541_v63  ;;  %v546_v11 = vmul.f32 0.16666667, %v482_v0  ;;  %v547_v12 = vmul.f32 0.16666667, %v483_v2  ;;  %v157_v14 = vmul.f32 %v693_v9, %v862_v1  ;;  %v697_v15 = vunpack.c.l.bf16 %v807_v61 }
  0x13   :  { %607 = vst.msk [vmem:[%s1339_s3 + $0x10] sm:$0xff] %vm604_vm0, %v542_v5  ;;  %608 = vst.msk [vmem:[%s1339_s3 + $0x18] sm:$0xff] %vm604_vm0, %v543_v6  ;;  %v698_v16 = vunpack.c.h.bf16 %v807_v61  ;;  %v701_v17 = vunpack.c.l.bf16 %v808_v3  ;;  %v158_v18 = vmul.f32 %v694_v13, %v862_v1  ;;  %v702_v19 = vunpack.c.h.bf16 %v808_v3  ;;  %v810_v62 = vld [vmem:[%s1336_s0 + $0x40] sm:$0xff]   ;;  %v811_v9 = vld [vmem:[%s1336_s0 + $0x48] sm:$0xff]  }
  0x14   :  { %609 = vst.msk [vmem:[%s1339_s3 + $0x20] sm:$0xff] %vm604_vm0, %v544_v8  ;;  %610 = vst.msk [vmem:[%s1339_s3 + $0x28] sm:$0xff] %vm604_vm0, %v545_v10  ;;  %v705_v20 = vunpack.c.l.bf16 %v809_v4  ;;  %v706_v21 = vunpack.c.h.bf16 %v809_v4  ;;  %v228_v22 = vadd.f32 %v876_v7, %v157_v14  ;;  %v159_v23 = vmul.f32 %v697_v15, %v862_v1  ;;  %v812_v10 = vld [vmem:[%s1336_s0 + $0x50] sm:$0xff]  }
  0x15   :  { %611 = vst.msk [vmem:[%s1339_s3 + $0x30] sm:$0xff] %vm604_vm0, %v546_v11  ;;  %612 = vst.msk [vmem:[%s1339_s3 + $0x38] sm:$0xff] %vm604_vm0, %v547_v12  ;;  %v160_v24 = vmul.f32 %v698_v16, %v862_v1  ;;  %v161_v25 = vmul.f32 %v701_v17, %v862_v1  ;;  %v229_v26 = vadd.f32 %v876_v7, %v158_v18  ;;  %v813_v11 = vld [vmem:[%s1336_s0 + $0x58] sm:$0xff]   ;;  %v709_v15 = vunpack.c.l.bf16 %v810_v62 }
  0x16   :  { %v162_v27 = vmul.f32 %v702_v19, %v862_v1  ;;  %v163_v28 = vmul.f32 %v705_v20, %v862_v1  ;;  %v164_v29 = vmul.f32 %v706_v21, %v862_v1  ;;  %v292_v30 = vadd.f32 3.0, %v228_v22 }
  0x17   :  { %v230_v31 = vadd.f32 %v876_v7, %v159_v23  ;;  %v231_v32 = vadd.f32 %v876_v7, %v160_v24  ;;  %v232_v33 = vadd.f32 %v876_v7, %v161_v25  ;;  %v293_v34 = vadd.f32 3.0, %v229_v26 }
  0x18   :  { %v233_v35 = vadd.f32 %v876_v7, %v162_v27  ;;  %v234_v36 = vadd.f32 %v876_v7, %v163_v28  ;;  %v235_v37 = vadd.f32 %v876_v7, %v164_v29  ;;  %v356_v38 = vmax.f32 %v292_v30, 0.0 }
  0x19   :  { %v294_v39 = vadd.f32 3.0, %v230_v31  ;;  %v295_v40 = vadd.f32 3.0, %v231_v32  ;;  %v296_v41 = vadd.f32 3.0, %v232_v33  ;;  %v357_v42 = vmax.f32 %v293_v34, 0.0 }
  0x1a   :  { %v297_v43 = vadd.f32 3.0, %v233_v35  ;;  %v298_v44 = vadd.f32 3.0, %v234_v36  ;;  %v299_v45 = vadd.f32 3.0, %v235_v37  ;;  %v420_v46 = vmin.f32 %v356_v38, 6.0 }
  0x1b   :  { %v358_v47 = vmax.f32 %v294_v39, 0.0  ;;  %v359_v48 = vmax.f32 %v295_v40, 0.0  ;;  %v360_v49 = vmax.f32 %v296_v41, 0.0  ;;  %v421_v50 = vmin.f32 %v357_v42, 6.0 }
  0x1c   :  { %v361_v51 = vmax.f32 %v297_v43, 0.0  ;;  %v362_v52 = vmax.f32 %v298_v44, 0.0  ;;  %v363_v53 = vmax.f32 %v299_v45, 0.0  ;;  %v484_v54 = vmul.f32 %v420_v46, %v228_v22 }
  0x1d   :  { %v422_v55 = vmin.f32 %v358_v47, 6.0  ;;  %v423_v56 = vmin.f32 %v359_v48, 6.0  ;;  %v424_v57 = vmin.f32 %v360_v49, 6.0  ;;  %v485_v58 = vmul.f32 %v421_v50, %v229_v26 }
  0x1e   :  { %v425_v59 = vmin.f32 %v361_v51, 6.0  ;;  %v426_v60 = vmin.f32 %v362_v52, 6.0  ;;  %v427_v61 = vmin.f32 %v363_v53, 6.0  ;;  %v548_v63 = vmul.f32 0.16666667, %v484_v54 }
  0x1f   :  { %v486_v0 = vmul.f32 %v422_v55, %v230_v31  ;;  %v487_v2 = vmul.f32 %v423_v56, %v231_v32  ;;  %v488_v3 = vmul.f32 %v424_v57, %v232_v33  ;;  %v549_v4 = vmul.f32 0.16666667, %v485_v58 }
  0x20   :  { %v489_v5 = vmul.f32 %v425_v59, %v233_v35  ;;  %v490_v6 = vmul.f32 %v426_v60, %v234_v36  ;;  %v491_v8 = vmul.f32 %v427_v61, %v235_v37  ;;  %613 = vst.msk [vmem:[%s1339_s3 + $0x40] sm:$0xff] %vm604_vm0, %v548_v63  ;;  %v710_v19 = vunpack.c.h.bf16 %v810_v62 }
  0x21   :  { %v550_v12 = vmul.f32 0.16666667, %v486_v0  ;;  %v551_v13 = vmul.f32 0.16666667, %v487_v2  ;;  %v552_v14 = vmul.f32 0.16666667, %v488_v3  ;;  %v165_v20 = vmul.f32 %v709_v15, %v862_v1 }
  0x22   :  { %614 = vst.msk [vmem:[%s1339_s3 + $0x48] sm:$0xff] %vm604_vm0, %v549_v4  ;;  %v553_v16 = vmul.f32 0.16666667, %v489_v5  ;;  %v554_v17 = vmul.f32 0.16666667, %v490_v6  ;;  %v713_v21 = vunpack.c.l.bf16 %v811_v9  ;;  %v714_v22 = vunpack.c.h.bf16 %v811_v9  ;;  %v814_v5 = vld [vmem:[%s1336_s0 + $0x60] sm:$0xff]  }
  0x23   :  { %v555_v18 = vmul.f32 0.16666667, %v491_v8  ;;  %615 = vst.msk [vmem:[%s1339_s3 + $0x50] sm:$0xff] %vm604_vm0, %v550_v12  ;;  %616 = vst.msk [vmem:[%s1339_s3 + $0x58] sm:$0xff] %vm604_vm0, %v551_v13  ;;  %v717_v23 = vunpack.c.l.bf16 %v812_v10  ;;  %v166_v24 = vmul.f32 %v710_v19, %v862_v1  ;;  %v718_v25 = vunpack.c.h.bf16 %v812_v10  ;;  %v815_v15 = vld [vmem:[%s1336_s0 + $0x68] sm:$0xff]  }
  0x24   :  { %617 = vst.msk [vmem:[%s1339_s3 + $0x60] sm:$0xff] %vm604_vm0, %v552_v14  ;;  %618 = vst.msk [vmem:[%s1339_s3 + $0x68] sm:$0xff] %vm604_vm0, %v553_v16  ;;  %v721_v26 = vunpack.c.l.bf16 %v813_v11  ;;  %v722_v27 = vunpack.c.h.bf16 %v813_v11  ;;  %v236_v28 = vadd.f32 %v876_v7, %v165_v20  ;;  %v167_v29 = vmul.f32 %v713_v21, %v862_v1  ;;  %v816_v16 = vld [vmem:[%s1336_s0 + $0x70] sm:$0xff]  }
  0x25   :  { %619 = vst.msk [vmem:[%s1339_s3 + $0x70] sm:$0xff] %vm604_vm0, %v554_v17  ;;  %620 = vst.msk [vmem:[%s1339_s3 + $0x78] sm:$0xff] %vm604_vm0, %v555_v18  ;;  %v168_v30 = vmul.f32 %v714_v22, %v862_v1  ;;  %v169_v31 = vmul.f32 %v717_v23, %v862_v1  ;;  %v237_v32 = vadd.f32 %v876_v7, %v166_v24  ;;  %v817_v17 = vld [vmem:[%s1336_s0 + $0x78] sm:$0xff]   ;;  %v725_v21 = vunpack.c.l.bf16 %v814_v5 }
  0x26   :  { %v170_v33 = vmul.f32 %v718_v25, %v862_v1  ;;  %v171_v34 = vmul.f32 %v721_v26, %v862_v1  ;;  %v172_v35 = vmul.f32 %v722_v27, %v862_v1  ;;  %v300_v36 = vadd.f32 3.0, %v236_v28 }
  0x27   :  { %v238_v37 = vadd.f32 %v876_v7, %v167_v29  ;;  %v239_v38 = vadd.f32 %v876_v7, %v168_v30  ;;  %v240_v39 = vadd.f32 %v876_v7, %v169_v31  ;;  %v301_v40 = vadd.f32 3.0, %v237_v32 }
  0x28   :  { %v241_v41 = vadd.f32 %v876_v7, %v170_v33  ;;  %v242_v42 = vadd.f32 %v876_v7, %v171_v34  ;;  %v243_v43 = vadd.f32 %v876_v7, %v172_v35  ;;  %v364_v44 = vmax.f32 %v300_v36, 0.0 }
  0x29   :  { %v302_v45 = vadd.f32 3.0, %v238_v37  ;;  %v303_v46 = vadd.f32 3.0, %v239_v38  ;;  %v304_v47 = vadd.f32 3.0, %v240_v39  ;;  %v365_v48 = vmax.f32 %v301_v40, 0.0 }
  0x2a   :  { %v305_v49 = vadd.f32 3.0, %v241_v41  ;;  %v306_v50 = vadd.f32 3.0, %v242_v42  ;;  %v307_v51 = vadd.f32 3.0, %v243_v43  ;;  %v428_v52 = vmin.f32 %v364_v44, 6.0 }
  0x2b   :  { %v366_v53 = vmax.f32 %v302_v45, 0.0  ;;  %v367_v54 = vmax.f32 %v303_v46, 0.0  ;;  %v368_v55 = vmax.f32 %v304_v47, 0.0  ;;  %v429_v56 = vmin.f32 %v365_v48, 6.0 }
  0x2c   :  { %v369_v57 = vmax.f32 %v305_v49, 0.0  ;;  %v370_v58 = vmax.f32 %v306_v50, 0.0  ;;  %v371_v59 = vmax.f32 %v307_v51, 0.0  ;;  %v492_v60 = vmul.f32 %v428_v52, %v236_v28 }
  0x2d   :  { %v430_v61 = vmin.f32 %v366_v53, 6.0  ;;  %v431_v62 = vmin.f32 %v367_v54, 6.0  ;;  %v432_v63 = vmin.f32 %v368_v55, 6.0  ;;  %v493_v0 = vmul.f32 %v429_v56, %v237_v32 }
  0x2e   :  { %v433_v2 = vmin.f32 %v369_v57, 6.0  ;;  %v434_v3 = vmin.f32 %v370_v58, 6.0  ;;  %v435_v4 = vmin.f32 %v371_v59, 6.0  ;;  %v556_v6 = vmul.f32 0.16666667, %v492_v60 }
  0x2f   :  { %v494_v8 = vmul.f32 %v430_v61, %v238_v37  ;;  %v495_v9 = vmul.f32 %v431_v62, %v239_v38  ;;  %v496_v10 = vmul.f32 %v432_v63, %v240_v39  ;;  %v557_v11 = vmul.f32 0.16666667, %v493_v0 }
  0x30   :  { %v497_v12 = vmul.f32 %v433_v2, %v241_v41  ;;  %v498_v13 = vmul.f32 %v434_v3, %v242_v42  ;;  %v499_v14 = vmul.f32 %v435_v4, %v243_v43  ;;  %621 = vst.msk [vmem:[%s1339_s3 + $0x80] sm:$0xff] %vm604_vm0, %v556_v6  ;;  %v726_v25 = vunpack.c.h.bf16 %v814_v5 }
  0x31   :  { %v558_v18 = vmul.f32 0.16666667, %v494_v8  ;;  %v559_v19 = vmul.f32 0.16666667, %v495_v9  ;;  %v560_v20 = vmul.f32 0.16666667, %v496_v10  ;;  %v173_v26 = vmul.f32 %v725_v21, %v862_v1 }
  0x32   :  { %622 = vst.msk [vmem:[%s1339_s3 + $0x88] sm:$0xff] %vm604_vm0, %v557_v11  ;;  %v561_v22 = vmul.f32 0.16666667, %v497_v12  ;;  %v562_v23 = vmul.f32 0.16666667, %v498_v13  ;;  %v729_v27 = vunpack.c.l.bf16 %v815_v15  ;;  %v730_v28 = vunpack.c.h.bf16 %v815_v15  ;;  %v818_v12 = vld [vmem:[%s1336_s0 + $0x80] sm:$0xff]  }
  0x33   :  { %v563_v24 = vmul.f32 0.16666667, %v499_v14  ;;  %623 = vst.msk [vmem:[%s1339_s3 + $0x90] sm:$0xff] %vm604_vm0, %v558_v18  ;;  %624 = vst.msk [vmem:[%s1339_s3 + $0x98] sm:$0xff] %vm604_vm0, %v559_v19  ;;  %v733_v29 = vunpack.c.l.bf16 %v816_v16  ;;  %v174_v30 = vmul.f32 %v726_v25, %v862_v1  ;;  %v734_v31 = vunpack.c.h.bf16 %v816_v16  ;;  %v819_v21 = vld [vmem:[%s1336_s0 + $0x88] sm:$0xff]  }
  0x34   :  { %625 = vst.msk [vmem:[%s1339_s3 + $0xa0] sm:$0xff] %vm604_vm0, %v560_v20  ;;  %626 = vst.msk [vmem:[%s1339_s3 + $0xa8] sm:$0xff] %vm604_vm0, %v561_v22  ;;  %v737_v32 = vunpack.c.l.bf16 %v817_v17  ;;  %v738_v33 = vunpack.c.h.bf16 %v817_v17  ;;  %v244_v34 = vadd.f32 %v876_v7, %v173_v26  ;;  %v175_v35 = vmul.f32 %v729_v27, %v862_v1  ;;  %v820_v22 = vld [vmem:[%s1336_s0 + $0x90] sm:$0xff]  }
  0x35   :  { %627 = vst.msk [vmem:[%s1339_s3 + $0xb0] sm:$0xff] %vm604_vm0, %v562_v23  ;;  %628 = vst.msk [vmem:[%s1339_s3 + $0xb8] sm:$0xff] %vm604_vm0, %v563_v24  ;;  %v176_v36 = vmul.f32 %v730_v28, %v862_v1  ;;  %v177_v37 = vmul.f32 %v733_v29, %v862_v1  ;;  %v245_v38 = vadd.f32 %v876_v7, %v174_v30  ;;  %v821_v23 = vld [vmem:[%s1336_s0 + $0x98] sm:$0xff]   ;;  %v741_v27 = vunpack.c.l.bf16 %v818_v12 }
  0x36   :  { %v178_v39 = vmul.f32 %v734_v31, %v862_v1  ;;  %v179_v40 = vmul.f32 %v737_v32, %v862_v1  ;;  %v180_v41 = vmul.f32 %v738_v33, %v862_v1  ;;  %v308_v42 = vadd.f32 3.0, %v244_v34 }
  0x37   :  { %v246_v43 = vadd.f32 %v876_v7, %v175_v35  ;;  %v247_v44 = vadd.f32 %v876_v7, %v176_v36  ;;  %v248_v45 = vadd.f32 %v876_v7, %v177_v37  ;;  %v309_v46 = vadd.f32 3.0, %v245_v38 }
  0x38   :  { %v249_v47 = vadd.f32 %v876_v7, %v178_v39  ;;  %v250_v48 = vadd.f32 %v876_v7, %v179_v40  ;;  %v251_v49 = vadd.f32 %v876_v7, %v180_v41  ;;  %v372_v50 = vmax.f32 %v308_v42, 0.0 }
  0x39   :  { %v310_v51 = vadd.f32 3.0, %v246_v43  ;;  %v311_v52 = vadd.f32 3.0, %v247_v44  ;;  %v312_v53 = vadd.f32 3.0, %v248_v45  ;;  %v373_v54 = vmax.f32 %v309_v46, 0.0 }
  0x3a   :  { %v313_v55 = vadd.f32 3.0, %v249_v47  ;;  %v314_v56 = vadd.f32 3.0, %v250_v48  ;;  %v315_v57 = vadd.f32 3.0, %v251_v49  ;;  %v436_v58 = vmin.f32 %v372_v50, 6.0 }
  0x3b   :  { %v374_v59 = vmax.f32 %v310_v51, 0.0  ;;  %v375_v60 = vmax.f32 %v311_v52, 0.0  ;;  %v376_v61 = vmax.f32 %v312_v53, 0.0  ;;  %v437_v62 = vmin.f32 %v373_v54, 6.0 }
  0x3c   :  { %v377_v63 = vmax.f32 %v313_v55, 0.0  ;;  %v378_v0 = vmax.f32 %v314_v56, 0.0  ;;  %v379_v2 = vmax.f32 %v315_v57, 0.0  ;;  %v500_v3 = vmul.f32 %v436_v58, %v244_v34 }
  0x3d   :  { %v438_v4 = vmin.f32 %v374_v59, 6.0  ;;  %v439_v5 = vmin.f32 %v375_v60, 6.0  ;;  %v440_v6 = vmin.f32 %v376_v61, 6.0  ;;  %v501_v8 = vmul.f32 %v437_v62, %v245_v38 }
  0x3e   :  { %v441_v9 = vmin.f32 %v377_v63, 6.0  ;;  %v442_v10 = vmin.f32 %v378_v0, 6.0  ;;  %v443_v11 = vmin.f32 %v379_v2, 6.0  ;;  %v564_v13 = vmul.f32 0.16666667, %v500_v3 }
  0x3f   :  { %v502_v14 = vmul.f32 %v438_v4, %v246_v43  ;;  %v503_v15 = vmul.f32 %v439_v5, %v247_v44  ;;  %v504_v16 = vmul.f32 %v440_v6, %v248_v45  ;;  %v565_v17 = vmul.f32 0.16666667, %v501_v8 }
  0x40   :  { %v505_v18 = vmul.f32 %v441_v9, %v249_v47  ;;  %v506_v19 = vmul.f32 %v442_v10, %v250_v48  ;;  %v507_v20 = vmul.f32 %v443_v11, %v251_v49  ;;  %629 = vst.msk [vmem:[%s1339_s3 + $0xc0] sm:$0xff] %vm604_vm0, %v564_v13  ;;  %v742_v31 = vunpack.c.h.bf16 %v818_v12 }
  0x41   :  { %v566_v24 = vmul.f32 0.16666667, %v502_v14  ;;  %v567_v25 = vmul.f32 0.16666667, %v503_v15  ;;  %v568_v26 = vmul.f32 0.16666667, %v504_v16  ;;  %v181_v32 = vmul.f32 %v741_v27, %v862_v1 }
  0x42   :  { %630 = vst.msk [vmem:[%s1339_s3 + $0xc8] sm:$0xff] %vm604_vm0, %v565_v17  ;;  %v569_v28 = vmul.f32 0.16666667, %v505_v18  ;;  %v570_v29 = vmul.f32 0.16666667, %v506_v19  ;;  %v745_v33 = vunpack.c.l.bf16 %v819_v21  ;;  %v746_v34 = vunpack.c.h.bf16 %v819_v21  ;;  %v822_v18 = vld [vmem:[%s1336_s0 + $0xa0] sm:$0xff]  }
  0x43   :  { %v571_v30 = vmul.f32 0.16666667, %v507_v20  ;;  %631 = vst.msk [vmem:[%s1339_s3 + $0xd0] sm:$0xff] %vm604_vm0, %v566_v24  ;;  %632 = vst.msk [vmem:[%s1339_s3 + $0xd8] sm:$0xff] %vm604_vm0, %v567_v25  ;;  %v749_v35 = vunpack.c.l.bf16 %v820_v22  ;;  %v182_v36 = vmul.f32 %v742_v31, %v862_v1  ;;  %v750_v37 = vunpack.c.h.bf16 %v820_v22  ;;  %v823_v27 = vld [vmem:[%s1336_s0 + $0xa8] sm:$0xff]  }
  0x44   :  { %633 = vst.msk [vmem:[%s1339_s3 + $0xe0] sm:$0xff] %vm604_vm0, %v568_v26  ;;  %634 = vst.msk [vmem:[%s1339_s3 + $0xe8] sm:$0xff] %vm604_vm0, %v569_v28  ;;  %v753_v38 = vunpack.c.l.bf16 %v821_v23  ;;  %v754_v39 = vunpack.c.h.bf16 %v821_v23  ;;  %v252_v40 = vadd.f32 %v876_v7, %v181_v32  ;;  %v183_v41 = vmul.f32 %v745_v33, %v862_v1  ;;  %v824_v28 = vld [vmem:[%s1336_s0 + $0xb0] sm:$0xff]  }
  0x45   :  { %635 = vst.msk [vmem:[%s1339_s3 + $0xf0] sm:$0xff] %vm604_vm0, %v570_v29  ;;  %636 = vst.msk [vmem:[%s1339_s3 + $0xf8] sm:$0xff] %vm604_vm0, %v571_v30  ;;  %v184_v42 = vmul.f32 %v746_v34, %v862_v1  ;;  %v185_v43 = vmul.f32 %v749_v35, %v862_v1  ;;  %v253_v44 = vadd.f32 %v876_v7, %v182_v36  ;;  %v825_v29 = vld [vmem:[%s1336_s0 + $0xb8] sm:$0xff]   ;;  %v757_v33 = vunpack.c.l.bf16 %v822_v18 }
  0x46   :  { %v186_v45 = vmul.f32 %v750_v37, %v862_v1  ;;  %v187_v46 = vmul.f32 %v753_v38, %v862_v1  ;;  %v188_v47 = vmul.f32 %v754_v39, %v862_v1  ;;  %v316_v48 = vadd.f32 3.0, %v252_v40 }
  0x47   :  { %v254_v49 = vadd.f32 %v876_v7, %v183_v41  ;;  %v255_v50 = vadd.f32 %v876_v7, %v184_v42  ;;  %v256_v51 = vadd.f32 %v876_v7, %v185_v43  ;;  %v317_v52 = vadd.f32 3.0, %v253_v44 }
  0x48   :  { %v257_v53 = vadd.f32 %v876_v7, %v186_v45  ;;  %v258_v54 = vadd.f32 %v876_v7, %v187_v46  ;;  %v259_v55 = vadd.f32 %v876_v7, %v188_v47  ;;  %v380_v56 = vmax.f32 %v316_v48, 0.0 }
  0x49   :  { %v318_v57 = vadd.f32 3.0, %v254_v49  ;;  %v319_v58 = vadd.f32 3.0, %v255_v50  ;;  %v320_v59 = vadd.f32 3.0, %v256_v51  ;;  %v381_v60 = vmax.f32 %v317_v52, 0.0 }
  0x4a   :  { %v321_v61 = vadd.f32 3.0, %v257_v53  ;;  %v322_v62 = vadd.f32 3.0, %v258_v54  ;;  %v323_v63 = vadd.f32 3.0, %v259_v55  ;;  %v444_v0 = vmin.f32 %v380_v56, 6.0 }
  0x4b   :  { %v382_v2 = vmax.f32 %v318_v57, 0.0  ;;  %v383_v3 = vmax.f32 %v319_v58, 0.0  ;;  %v384_v4 = vmax.f32 %v320_v59, 0.0  ;;  %v445_v5 = vmin.f32 %v381_v60, 6.0 }
  0x4c   :  { %v385_v6 = vmax.f32 %v321_v61, 0.0  ;;  %v386_v8 = vmax.f32 %v322_v62, 0.0  ;;  %v387_v9 = vmax.f32 %v323_v63, 0.0  ;;  %v508_v10 = vmul.f32 %v444_v0, %v252_v40 }
  0x4d   :  { %v446_v11 = vmin.f32 %v382_v2, 6.0  ;;  %v447_v12 = vmin.f32 %v383_v3, 6.0  ;;  %v448_v13 = vmin.f32 %v384_v4, 6.0  ;;  %v509_v14 = vmul.f32 %v445_v5, %v253_v44 }
  0x4e   :  { %v449_v15 = vmin.f32 %v385_v6, 6.0  ;;  %v450_v16 = vmin.f32 %v386_v8, 6.0  ;;  %v451_v17 = vmin.f32 %v387_v9, 6.0  ;;  %v572_v19 = vmul.f32 0.16666667, %v508_v10 }
  0x4f   :  { %v510_v20 = vmul.f32 %v446_v11, %v254_v49  ;;  %v511_v21 = vmul.f32 %v447_v12, %v255_v50  ;;  %v512_v22 = vmul.f32 %v448_v13, %v256_v51  ;;  %v573_v23 = vmul.f32 0.16666667, %v509_v14 }
  0x50   :  { %v513_v24 = vmul.f32 %v449_v15, %v257_v53  ;;  %v514_v25 = vmul.f32 %v450_v16, %v258_v54  ;;  %v515_v26 = vmul.f32 %v451_v17, %v259_v55  ;;  %637 = vst.msk [vmem:[%s1339_s3 + $0x100] sm:$0xff] %vm604_vm0, %v572_v19  ;;  %v758_v37 = vunpack.c.h.bf16 %v822_v18 }
  0x51   :  { %v574_v30 = vmul.f32 0.16666667, %v510_v20  ;;  %v575_v31 = vmul.f32 0.16666667, %v511_v21  ;;  %v576_v32 = vmul.f32 0.16666667, %v512_v22  ;;  %v189_v38 = vmul.f32 %v757_v33, %v862_v1 }
  0x52   :  { %638 = vst.msk [vmem:[%s1339_s3 + $0x108] sm:$0xff] %vm604_vm0, %v573_v23  ;;  %v577_v34 = vmul.f32 0.16666667, %v513_v24  ;;  %v578_v35 = vmul.f32 0.16666667, %v514_v25  ;;  %v761_v39 = vunpack.c.l.bf16 %v823_v27  ;;  %v762_v40 = vunpack.c.h.bf16 %v823_v27  ;;  %v826_v24 = vld [vmem:[%s1336_s0 + $0xc0] sm:$0xff]  }
  0x53   :  { %v579_v36 = vmul.f32 0.16666667, %v515_v26  ;;  %639 = vst.msk [vmem:[%s1339_s3 + $0x110] sm:$0xff] %vm604_vm0, %v574_v30  ;;  %640 = vst.msk [vmem:[%s1339_s3 + $0x118] sm:$0xff] %vm604_vm0, %v575_v31  ;;  %v765_v41 = vunpack.c.l.bf16 %v824_v28  ;;  %v190_v42 = vmul.f32 %v758_v37, %v862_v1  ;;  %v766_v43 = vunpack.c.h.bf16 %v824_v28  ;;  %v827_v33 = vld [vmem:[%s1336_s0 + $0xc8] sm:$0xff]  }
  0x54   :  { %641 = vst.msk [vmem:[%s1339_s3 + $0x120] sm:$0xff] %vm604_vm0, %v576_v32  ;;  %642 = vst.msk [vmem:[%s1339_s3 + $0x128] sm:$0xff] %vm604_vm0, %v577_v34  ;;  %v769_v44 = vunpack.c.l.bf16 %v825_v29  ;;  %v770_v45 = vunpack.c.h.bf16 %v825_v29  ;;  %v260_v46 = vadd.f32 %v876_v7, %v189_v38  ;;  %v191_v47 = vmul.f32 %v761_v39, %v862_v1  ;;  %v828_v34 = vld [vmem:[%s1336_s0 + $0xd0] sm:$0xff]  }
  0x55   :  { %643 = vst.msk [vmem:[%s1339_s3 + $0x130] sm:$0xff] %vm604_vm0, %v578_v35  ;;  %644 = vst.msk [vmem:[%s1339_s3 + $0x138] sm:$0xff] %vm604_vm0, %v579_v36  ;;  %v192_v48 = vmul.f32 %v762_v40, %v862_v1  ;;  %v193_v49 = vmul.f32 %v765_v41, %v862_v1  ;;  %v261_v50 = vadd.f32 %v876_v7, %v190_v42  ;;  %v829_v35 = vld [vmem:[%s1336_s0 + $0xd8] sm:$0xff]   ;;  %v773_v39 = vunpack.c.l.bf16 %v826_v24 }
  0x56   :  { %v194_v51 = vmul.f32 %v766_v43, %v862_v1  ;;  %v195_v52 = vmul.f32 %v769_v44, %v862_v1  ;;  %v196_v53 = vmul.f32 %v770_v45, %v862_v1  ;;  %v324_v54 = vadd.f32 3.0, %v260_v46 }
  0x57   :  { %v262_v55 = vadd.f32 %v876_v7, %v191_v47  ;;  %v263_v56 = vadd.f32 %v876_v7, %v192_v48  ;;  %v264_v57 = vadd.f32 %v876_v7, %v193_v49  ;;  %v325_v58 = vadd.f32 3.0, %v261_v50 }
  0x58   :  { %v265_v59 = vadd.f32 %v876_v7, %v194_v51  ;;  %v266_v60 = vadd.f32 %v876_v7, %v195_v52  ;;  %v267_v61 = vadd.f32 %v876_v7, %v196_v53  ;;  %v388_v62 = vmax.f32 %v324_v54, 0.0 }
  0x59   :  { %v326_v63 = vadd.f32 3.0, %v262_v55  ;;  %v327_v0 = vadd.f32 3.0, %v263_v56  ;;  %v328_v2 = vadd.f32 3.0, %v264_v57  ;;  %v389_v3 = vmax.f32 %v325_v58, 0.0 }
  0x5a   :  { %v329_v4 = vadd.f32 3.0, %v265_v59  ;;  %v330_v5 = vadd.f32 3.0, %v266_v60  ;;  %v331_v6 = vadd.f32 3.0, %v267_v61  ;;  %v452_v8 = vmin.f32 %v388_v62, 6.0 }
  0x5b   :  { %v390_v9 = vmax.f32 %v326_v63, 0.0  ;;  %v391_v10 = vmax.f32 %v327_v0, 0.0  ;;  %v392_v11 = vmax.f32 %v328_v2, 0.0  ;;  %v453_v12 = vmin.f32 %v389_v3, 6.0 }
  0x5c   :  { %v393_v13 = vmax.f32 %v329_v4, 0.0  ;;  %v394_v14 = vmax.f32 %v330_v5, 0.0  ;;  %v395_v15 = vmax.f32 %v331_v6, 0.0  ;;  %v516_v16 = vmul.f32 %v452_v8, %v260_v46 }
  0x5d   :  { %v454_v17 = vmin.f32 %v390_v9, 6.0  ;;  %v455_v18 = vmin.f32 %v391_v10, 6.0  ;;  %v456_v19 = vmin.f32 %v392_v11, 6.0  ;;  %v517_v20 = vmul.f32 %v453_v12, %v261_v50 }
  0x5e   :  { %v457_v21 = vmin.f32 %v393_v13, 6.0  ;;  %v458_v22 = vmin.f32 %v394_v14, 6.0  ;;  %v459_v23 = vmin.f32 %v395_v15, 6.0  ;;  %v580_v25 = vmul.f32 0.16666667, %v516_v16 }
  0x5f   :  { %v518_v26 = vmul.f32 %v454_v17, %v262_v55  ;;  %v519_v27 = vmul.f32 %v455_v18, %v263_v56  ;;  %v520_v28 = vmul.f32 %v456_v19, %v264_v57  ;;  %v581_v29 = vmul.f32 0.16666667, %v517_v20 }
  0x60   :  { %v521_v30 = vmul.f32 %v457_v21, %v265_v59  ;;  %v522_v31 = vmul.f32 %v458_v22, %v266_v60  ;;  %v523_v32 = vmul.f32 %v459_v23, %v267_v61  ;;  %645 = vst.msk [vmem:[%s1339_s3 + $0x140] sm:$0xff] %vm604_vm0, %v580_v25  ;;  %v774_v43 = vunpack.c.h.bf16 %v826_v24 }
  0x61   :  { %v582_v36 = vmul.f32 0.16666667, %v518_v26  ;;  %v583_v37 = vmul.f32 0.16666667, %v519_v27  ;;  %v584_v38 = vmul.f32 0.16666667, %v520_v28  ;;  %v197_v44 = vmul.f32 %v773_v39, %v862_v1 }
  0x62   :  { %646 = vst.msk [vmem:[%s1339_s3 + $0x148] sm:$0xff] %vm604_vm0, %v581_v29  ;;  %v585_v40 = vmul.f32 0.16666667, %v521_v30  ;;  %v586_v41 = vmul.f32 0.16666667, %v522_v31  ;;  %v777_v45 = vunpack.c.l.bf16 %v827_v33  ;;  %v778_v46 = vunpack.c.h.bf16 %v827_v33  ;;  %v830_v28 = vld [vmem:[%s1336_s0 + $0xe0] sm:$0xff]  }
  0x63   :  { %v587_v42 = vmul.f32 0.16666667, %v523_v32  ;;  %647 = vst.msk [vmem:[%s1339_s3 + $0x150] sm:$0xff] %vm604_vm0, %v582_v36  ;;  %648 = vst.msk [vmem:[%s1339_s3 + $0x158] sm:$0xff] %vm604_vm0, %v583_v37  ;;  %v781_v47 = vunpack.c.l.bf16 %v828_v34  ;;  %v198_v48 = vmul.f32 %v774_v43, %v862_v1  ;;  %v782_v49 = vunpack.c.h.bf16 %v828_v34  ;;  %v831_v37 = vld [vmem:[%s1336_s0 + $0xe8] sm:$0xff]   ;;  %v833_v39 = vld [vmem:[%s1336_s0 + $0xf8] sm:$0xff]  }
  0x64   :  { %649 = vst.msk [vmem:[%s1339_s3 + $0x160] sm:$0xff] %vm604_vm0, %v584_v38  ;;  %650 = vst.msk [vmem:[%s1339_s3 + $0x168] sm:$0xff] %vm604_vm0, %v585_v40  ;;  %v785_v50 = vunpack.c.l.bf16 %v829_v35  ;;  %v786_v51 = vunpack.c.h.bf16 %v829_v35  ;;  %v268_v52 = vadd.f32 %v876_v7, %v197_v44  ;;  %v199_v53 = vmul.f32 %v777_v45, %v862_v1  ;;  %v832_v38 = vld [vmem:[%s1336_s0 + $0xf0] sm:$0xff]  }
  0x65   :  { %651 = vst.msk [vmem:[%s1339_s3 + $0x170] sm:$0xff] %vm604_vm0, %v586_v41  ;;  %652 = vst.msk [vmem:[%s1339_s3 + $0x178] sm:$0xff] %vm604_vm0, %v587_v42  ;;  %v200_v54 = vmul.f32 %v778_v46, %v862_v1  ;;  %v201_v55 = vmul.f32 %v781_v47, %v862_v1  ;;  %v269_v56 = vadd.f32 %v876_v7, %v198_v48  ;;  %v789_v43 = vunpack.c.l.bf16 %v830_v28  ;;  %v834_v48 = vld [vmem:[%s1337_s1] ss:$0 sm:$0xff] }
  0x66   :  { %v202_v57 = vmul.f32 %v782_v49, %v862_v1  ;;  %v203_v58 = vmul.f32 %v785_v50, %v862_v1  ;;  %v204_v59 = vmul.f32 %v786_v51, %v862_v1  ;;  %v332_v60 = vadd.f32 3.0, %v268_v52 }
  0x67   :  { %v270_v61 = vadd.f32 %v876_v7, %v199_v53  ;;  %v271_v62 = vadd.f32 %v876_v7, %v200_v54  ;;  %v272_v63 = vadd.f32 %v876_v7, %v201_v55  ;;  %v333_v0 = vadd.f32 3.0, %v269_v56 }
  0x68   :  { %v273_v2 = vadd.f32 %v876_v7, %v202_v57  ;;  %v274_v3 = vadd.f32 %v876_v7, %v203_v58  ;;  %v275_v4 = vadd.f32 %v876_v7, %v204_v59  ;;  %v396_v5 = vmax.f32 %v332_v60, 0.0  ;;  %v835_v57 = vld [vmem:[%s1338_s2] ss:$0 sm:$0xff] }
  0x69   :  { %v334_v6 = vadd.f32 3.0, %v270_v61  ;;  %v335_v8 = vadd.f32 3.0, %v271_v62  ;;  %v336_v9 = vadd.f32 3.0, %v272_v63  ;;  %v397_v10 = vmax.f32 %v333_v0, 0.0 }
  0x6a   :  { %v337_v1 = vadd.f32 3.0, %v273_v2  ;;  %v338_v11 = vadd.f32 3.0, %v274_v3  ;;  %v339_v12 = vadd.f32 3.0, %v275_v4  ;;  %v460_v13 = vmin.f32 %v396_v5, 6.0 }
  0x6b   :  { %v398_v14 = vmax.f32 %v334_v6, 0.0  ;;  %v399_v15 = vmax.f32 %v335_v8, 0.0  ;;  %v400_v16 = vmax.f32 %v336_v9, 0.0  ;;  %v461_v17 = vmin.f32 %v397_v10, 6.0 }
  0x6c   :  { %v401_v18 = vmax.f32 %v337_v1, 0.0  ;;  %v402_v19 = vmax.f32 %v338_v11, 0.0  ;;  %v403_v20 = vmax.f32 %v339_v12, 0.0  ;;  %v524_v21 = vmul.f32 %v460_v13, %v268_v52 }
  0x6d   :  { %v462_v22 = vmin.f32 %v398_v14, 6.0  ;;  %v463_v23 = vmin.f32 %v399_v15, 6.0  ;;  %v464_v7 = vmin.f32 %v400_v16, 6.0  ;;  %v525_v24 = vmul.f32 %v461_v17, %v269_v56 }
  0x6e   :  { %v465_v25 = vmin.f32 %v401_v18, 6.0  ;;  %v466_v26 = vmin.f32 %v402_v19, 6.0  ;;  %v467_v27 = vmin.f32 %v403_v20, 6.0  ;;  %v588_v29 = vmul.f32 0.16666667, %v524_v21 }
  0x6f   :  { %v526_v30 = vmul.f32 %v462_v22, %v270_v61  ;;  %v527_v31 = vmul.f32 %v463_v23, %v271_v62  ;;  %v528_v32 = vmul.f32 %v464_v7, %v272_v63  ;;  %v589_v33 = vmul.f32 0.16666667, %v525_v24 }
  0x70   :  { %v529_v34 = vmul.f32 %v465_v25, %v273_v2  ;;  %v530_v35 = vmul.f32 %v466_v26, %v274_v3  ;;  %v531_v36 = vmul.f32 %v467_v27, %v275_v4  ;;  %653 = vst.msk [vmem:[%s1339_s3 + $0x180] sm:$0xff] %vm604_vm0, %v588_v29  ;;  %v790_v47 = vunpack.c.h.bf16 %v830_v28 }
  0x71   :  { %v590_v40 = vmul.f32 0.16666667, %v526_v30  ;;  %v591_v41 = vmul.f32 0.16666667, %v527_v31  ;;  %v592_v42 = vmul.f32 0.16666667, %v528_v32  ;;  %v205_v49 = vmul.f32 %v834_v48, %v789_v43 }
  0x72   :  { %654 = vst.msk [vmem:[%s1339_s3 + $0x188] sm:$0xff] %vm604_vm0, %v589_v33  ;;  %v593_v44 = vmul.f32 0.16666667, %v529_v34  ;;  %v594_v45 = vmul.f32 0.16666667, %v530_v35  ;;  %v793_v50 = vunpack.c.l.bf16 %v831_v37  ;;  %v794_v51 = vunpack.c.h.bf16 %v831_v37 }
  0x73   :  { %v595_v46 = vmul.f32 0.16666667, %v531_v36  ;;  %655 = vst.msk [vmem:[%s1339_s3 + $0x190] sm:$0xff] %vm604_vm0, %v590_v40  ;;  %656 = vst.msk [vmem:[%s1339_s3 + $0x198] sm:$0xff] %vm604_vm0, %v591_v41  ;;  %v797_v52 = vunpack.c.l.bf16 %v832_v38  ;;  %v206_v53 = vmul.f32 %v834_v48, %v790_v47  ;;  %v798_v54 = vunpack.c.h.bf16 %v832_v38 }
  0x74   :  { %657 = vst.msk [vmem:[%s1339_s3 + $0x1a0] sm:$0xff] %vm604_vm0, %v592_v42  ;;  %658 = vst.msk [vmem:[%s1339_s3 + $0x1a8] sm:$0xff] %vm604_vm0, %v593_v44  ;;  %v801_v55 = vunpack.c.l.bf16 %v833_v39  ;;  %v802_v56 = vunpack.c.h.bf16 %v833_v39  ;;  %v276_v58 = vadd.f32 %v835_v57, %v205_v49  ;;  %v207_v59 = vmul.f32 %v834_v48, %v793_v50 }
  0x75   :  { %659 = vst.msk [vmem:[%s1339_s3 + $0x1b0] sm:$0xff] %vm604_vm0, %v594_v45  ;;  %660 = vst.msk [vmem:[%s1339_s3 + $0x1b8] sm:$0xff] %vm604_vm0, %v595_v46  ;;  %v208_v60 = vmul.f32 %v834_v48, %v794_v51  ;;  %v209_v61 = vmul.f32 %v834_v48, %v797_v52  ;;  %v277_v62 = vadd.f32 %v835_v57, %v206_v53 }
  0x76   :  { %v210_v63 = vmul.f32 %v834_v48, %v798_v54  ;;  %v211_v0 = vmul.f32 %v834_v48, %v801_v55  ;;  %v212_v2 = vmul.f32 %v834_v48, %v802_v56  ;;  %v340_v3 = vadd.f32 3.0, %v276_v58 }
  0x77   :  { %v278_v4 = vadd.f32 %v835_v57, %v207_v59  ;;  %v279_v5 = vadd.f32 %v835_v57, %v208_v60  ;;  %v280_v6 = vadd.f32 %v835_v57, %v209_v61  ;;  %v341_v8 = vadd.f32 3.0, %v277_v62 }
  0x78   :  { %v281_v9 = vadd.f32 %v835_v57, %v210_v63  ;;  %v282_v10 = vadd.f32 %v835_v57, %v211_v0  ;;  %v283_v1 = vadd.f32 %v835_v57, %v212_v2  ;;  %v404_v11 = vmax.f32 %v340_v3, 0.0 }
  0x79   :  { %v342_v12 = vadd.f32 3.0, %v278_v4  ;;  %v343_v13 = vadd.f32 3.0, %v279_v5  ;;  %v344_v14 = vadd.f32 3.0, %v280_v6  ;;  %v405_v15 = vmax.f32 %v341_v8, 0.0 }
  0x7a   :  { %v345_v16 = vadd.f32 3.0, %v281_v9  ;;  %v346_v17 = vadd.f32 3.0, %v282_v10  ;;  %v347_v18 = vadd.f32 3.0, %v283_v1  ;;  %v468_v19 = vmin.f32 %v404_v11, 6.0 }
  0x7b   :  { %v406_v20 = vmax.f32 %v342_v12, 0.0  ;;  %v407_v21 = vmax.f32 %v343_v13, 0.0  ;;  %v408_v22 = vmax.f32 %v344_v14, 0.0  ;;  %v469_v23 = vmin.f32 %v405_v15, 6.0 }
  0x7c   :  { %v409_v7 = vmax.f32 %v345_v16, 0.0  ;;  %v410_v24 = vmax.f32 %v346_v17, 0.0  ;;  %v411_v25 = vmax.f32 %v347_v18, 0.0  ;;  %v532_v26 = vmul.f32 %v468_v19, %v276_v58 }
  0x7d   :  { %v470_v27 = vmin.f32 %v406_v20, 6.0  ;;  %v471_v28 = vmin.f32 %v407_v21, 6.0  ;;  %v472_v29 = vmin.f32 %v408_v22, 6.0  ;;  %v533_v30 = vmul.f32 %v469_v23, %v277_v62 }
  0x7e   :  { %v473_v31 = vmin.f32 %v409_v7, 6.0  ;;  %v474_v32 = vmin.f32 %v410_v24, 6.0  ;;  %v475_v33 = vmin.f32 %v411_v25, 6.0  ;;  %v596_v34 = vmul.f32 0.16666667, %v532_v26 }
  0x7f   :  { %v534_v35 = vmul.f32 %v470_v27, %v278_v4  ;;  %v535_v36 = vmul.f32 %v471_v28, %v279_v5  ;;  %v536_v37 = vmul.f32 %v472_v29, %v280_v6  ;;  %v597_v38 = vmul.f32 0.16666667, %v533_v30 }
  0x80   :  { %v537_v39 = vmul.f32 %v473_v31, %v281_v9  ;;  %v538_v40 = vmul.f32 %v474_v32, %v282_v10  ;;  %v539_v41 = vmul.f32 %v475_v33, %v283_v1  ;;  %661 = vst.msk [vmem:[%s1339_s3 + $0x1c0] sm:$0xff] %vm604_vm0, %v596_v34 }
  0x81   :  { %v598_v42 = vmul.f32 0.16666667, %v534_v35  ;;  %v599_v43 = vmul.f32 0.16666667, %v535_v36  ;;  %v600_v44 = vmul.f32 0.16666667, %v536_v37 }
  0x82   :  { %662 = vst.msk [vmem:[%s1339_s3 + $0x1c8] sm:$0xff] %vm604_vm0, %v597_v38  ;;  %v601_v45 = vmul.f32 0.16666667, %v537_v39  ;;  %v602_v46 = vmul.f32 0.16666667, %v538_v40 }
  0x83   :  { %v603_v47 = vmul.f32 0.16666667, %v539_v41  ;;  %663 = vst.msk [vmem:[%s1339_s3 + $0x1d0] sm:$0xff] %vm604_vm0, %v598_v42  ;;  %664 = vst.msk [vmem:[%s1339_s3 + $0x1d8] sm:$0xff] %vm604_vm0, %v599_v43 }
  0x84   :  { %665 = vst.msk [vmem:[%s1339_s3 + $0x1e0] sm:$0xff] %vm604_vm0, %v600_v44  ;;  %666 = vst.msk [vmem:[%s1339_s3 + $0x1e8] sm:$0xff] %vm604_vm0, %v601_v45 }
  0x85   :  { %667 = vst.msk [vmem:[%s1339_s3 + $0x1f0] sm:$0xff] %vm604_vm0, %v602_v46  ;;  %668 = vst.msk [vmem:[%s1339_s3 + $0x1f8] sm:$0xff] %vm604_vm0, %v603_v47 }

// kernel: conv_bn_hardswish.2
= control target key start
LH: loop header
LB: loop body
LE: loop exit
PB: predicated region body
PF: predicated region fallthrough
CT: control target
= control target key end

     0   :  { %s3570_s15 = smov 0   ;;  %s3572_s16 = smov 0   ;;  %s4805_s0 = inlined_call_operand.vmem [shape: bf16[2,18,18,4], index: 0, kind: input, shape index: {}]   ;;  %s4806_s1 = inlined_call_operand.vmem [shape: bf16[36,128], index: 1, kind: input, shape index: {}]   ;;  %s4807_s2 = inlined_call_operand.vmem [shape: bf16[2,256,8], index: 2, kind: output, shape index: {0}]   ;;  %s4808_s3 = inlined_call_operand.vmem [shape: f32[2,1,8], index: 3, kind: output, shape index: {1}]   ;;  %s4809_s4 = inlined_call_operand.vmem [shape: f32[2,1,8], index: 4, kind: output, shape index: {2}]  }
   0x1   :  { %s3574_s17 = smov 0  }
   0x2 LB: > { %s27_s18 = sadd.s32 1, %s3531_s16  ;;  %p2906_p0 = scmp.ge.s32.totalorder %s3535_s17, 1  ;;  %s3535_s17 = sphi %s3574_s17, %s15_s17   ;;  %s3531_s16 = sphi %s3572_s16, %s4811_s16   ;;  %s3527_s15 = sphi %s3570_s15, %s4810_s15  }
   0x3   : > { %p29_p1 = scmp.ge.s32.totalorder %s27_s18, 2  ;;  %p185_p2 = scmp.lt.s32.totalorder %s3535_s17, 3 }
   0x5   : > { %s4813_s18 = smov (%p29_p1, %s27_s18), 0  ;;  %p186_p3 = pnand %p2906_p0, %p185_p2 }
   0x6   : > { %p220_p4 = scmp.lt.s32.totalorder (!%p186_p3), %s3527_s15, 1  ;;  %s3537_s23 = smov (!%p186_p3), 12  }
   0x7   : > { %189 = sbr.rel (%p186_p3) target bundleno = 613 (0x265), region = 28  ;;  %s3538_s24 = smov (!%p186_p3), 20  }
   0x8   : > { %s3539_s25 = smov (!%p186_p3), 8   ;;  %s3540_s26 = smov (!%p186_p3), 4  }
   0x9   : > { %s3541_s27 = smov (!%p186_p3), 16   ;;  %s3542_s28 = smov (!%p186_p3), 24  }
   0xa   : > { %s3543_s29 = smov (!%p186_p3), 28   ;;  %s3544_s30 = smov (!%p186_p3), 32  }
   0xc   : > { %s4815_s15 = smov (!%p220_p4, %s3527_s15), 1  ;;  %vm848_vm0 = vcmask 1046528   ;;  %vm575_vm1 = vsmask.f32 7424  ;;  %vm2270_vm2 = vcmask 1041408   ;;  %vm1953_vm3 = vcmask 31744  }
   0xd   : > { %s3333_s19 = smul.u32 216, %s4815_s15  ;;  %vm1986_vm4 = vcmask 64512   ;;  %vm2019_vm5 = vcmask 97280   ;;  %vm2052_vm6 = vcmask 130048   ;;  %vm2085_vm7 = vcmask 162816   ;;  %s3235_s11 = sshll.u32 %s4815_s15, 7 }
   0xe   : > { %vm2118_vm8 = vcmask 195584   ;;  %vm2151_vm9 = vcmask 228352   ;;  %vm2184_vm10 = vcmask 261120   ;;  %vm2237_vm11 = vcmask 293888   ;;  %s4637_s14 = scalar_lea.vmem %s4807_s2, %s3235_s11  ;;  %s235_s21 = scalar_lea.vmem %s4808_s3, %s4815_s15 }
   0xf   : > { %s3594_s22 = scalar_lea.vmem %s4805_s0, %s3333_s19  ;;  %vm2563_vm12 = vcmask 60416   ;;  %vm2665_vm13 = vcmask 57344  }
  0x10   : > { %v2912_v0 = vld [vmem:[%s3594_s22 + $0x18] sm:$0xf]  ;;  %v2913_v1 = vld [vmem:[%s3594_s22 + $0x1c] sm:$0xf]  ;;  %v2910_v5 = vld [vmem:[%s3594_s22 + $0xc] sm:$0xf] }
  0x11   : > { %v2959_v2 = vld [vmem:[%s3594_s22 + $0x18] sm:$0xe]  ;;  %v3599_v3 = vcombine.low %v2912_v0, %v2913_v1  ;;  %v2911_v6 = vld [vmem:[%s3594_s22 + $0x10] sm:$0xf]  ;;  %v2958_v7 = vld [vmem:[%s3594_s22 + $0xc] sm:$0xe] }
  0x12   : > { %v3119_v4 = vcombine.low %v2959_v2, %v2913_v1  ;;  %v3604_v8 = vcombine.low %v2910_v5, %v2911_v6  ;;  %v3118_v9 = vcombine.low %v2958_v7, %v2911_v6  ;;  %v3607_v10 = vld [vmem:[%s3594_s22 + $0x14] ss:$0 sps:$4 sm:$0x11]   ;;  %v248_v12 = vld [vmem:[%s3594_s22 + $0x4] sm:$0xf] }
  0x13   : > { %1011 = vrot.lane.b32.xlu1 %v3599_v3, %s3537_s23  ;;  %v1104_v11 = vshll.u32 %v3599_v3, 16  ;;  %v1362_v15 = vrot.slane %v3607_v10, 1  ;;  %v295_v16 = vld [vmem:[%s3594_s22] sm:$0xe]  ;;  %v1102_v21 = vshrl.u32 %v3599_v3, 16  ;;  %v1097_v59 = vshll.u32 %v3607_v10, 16 }
  0x14   : > { %1009 = vrot.lane.b32.xlu0 %v3604_v8, %s3537_s23  ;;  %v1092_v13 = vshll.u32 %v3604_v8, 16  ;;  %v1361_v14 = vrot.slane %v3118_v9, 1  ;;  %v1364_v17 = vrot.slane %v3119_v4, 1  ;;  %v3371_v18 = vld [vmem:[%s3594_s22 + $0x8] ss:$0 sps:$4 sm:$0x11]   ;;  %v3070_v19 = vcombine.low %v295_v16, %v248_v12 }
  0x15   : > { %v247_v20 = vld [vmem:[%s3594_s22] sm:$0xf]  ;;  %v249_v24 = vld [vmem:[%s3594_s22 + $0xc] sm:$0xf]  ;;  %v250_v25 = vld [vmem:[%s3594_s22 + $0x10] sm:$0xf] }
  0x16   : > { %v1363_v22 = vsel %vm848_vm0, %v1361_v14, %v1362_v15  ;;  %v3622_v23 = vcombine.low %v247_v20, %v248_v12  ;;  %v849_v26 = vrot.slane %v3070_v19, 1  ;;  %v850_v27 = vrot.slane %v3371_v18, 1  ;;  %v296_v28 = vld [vmem:[%s3594_s22 + $0xc] sm:$0xe]  ;;  %v2976_v43 = vld [vmem:[%s3594_s22 + $0x24] sm:$0xf] }
  0x17   : > { %v3627_v29 = vcombine.low %v249_v24, %v250_v25  ;;  %v584_v30 = vshll.u32 %v3371_v18, 16  ;;  %v3375_v31 = vld [vmem:[%s3594_s22 + $0x14] ss:$0 sps:$4 sm:$0x11]   ;;  %v3071_v32 = vcombine.low %v296_v28, %v250_v25  ;;  %v1106_v35 = vrot.slane %v1104_v11, 1 }
  0x18   : > { %1409 = vrot.lane.b32.xlu0 %v1363_v22, %s3538_s24  ;;  %v577_v33 = vshrl.u32 %v3622_v23, 16  ;;  %v579_v34 = vshll.u32 %v3622_v23, 16  ;;  %v851_v36 = vsel %vm848_vm0, %v849_v26, %v850_v27  ;;  %v3377_v38 = vld [vmem:[%s3594_s22 + $0x20] ss:$0 sps:$4 sm:$0x11]   ;;  %v853_v40 = vrot.slane %v3375_v31, 1 }
  0x19   : > { %v586_v37 = vrot.slane %v584_v30, 1  ;;  %897 = vrot.lane.b32.xlu1 %v851_v36, %s3539_s25  ;;  %v852_v39 = vrot.slane %v3071_v32, 1  ;;  %v589_v42 = vshrl.u32 %v3627_v29, 16  ;;  %v1365_v44 = vrot.slane %v3377_v38, 1  ;;  %v3640_v48 = vld [vmem:[%s3594_s22 + $0x28] sm:$0xf] }
  0x1a   : > { %v581_v41 = vrot.slane %v579_v34, 1  ;;  %v591_v45 = vshll.u32 %v3627_v29, 16  ;;  %v596_v46 = vshll.u32 %v3375_v31, 16  ;;  %v1109_v47 = vshll.u32 %v3377_v38, 16  ;;  %v2974_v53 = vld [vmem:[%s3594_s22 + $0x18] sm:$0xf] }
  0x1b   : > { %v854_v49 = vsel %vm848_vm0, %v852_v39, %v853_v40  ;;  %v1090_v51 = vshrl.u32 %v3604_v8, 16  ;;  %v1094_v52 = vrot.slane %v1092_v13, 1  ;;  %v2975_v56 = vld [vmem:[%s3594_s22 + $0x1c] sm:$0xf]  ;;  %v1107_v58 = vor.u32 %v1106_v35, %v1102_v21  ;;  %v3022_v7 = vld [vmem:[%s3594_s22 + $0x18] sm:$0xe] }
  0x1c   : > { %v582_v50 = vor.u32 %v581_v41, %v577_v33  ;;  %v593_v54 = vrot.slane %v591_v45, 1  ;;  %v598_v55 = vrot.slane %v596_v46, 1  ;;  %v3135_v60 = vcombine.low %v2976_v43, %v3640_v48  ;;  %v3653_v1 = vld [vmem:[%s3594_s22 + $0x2c] ss:$0 sps:$4 sm:$0x11]  }
  0x1d   : > { %899 = vrot.lane.b32.xlu1 %v854_v49, %s3539_s25  ;;  %v1366_v61 = vsel %vm848_vm0, %v1364_v17, %v1365_v44  ;;  %v1111_v63 = vrot.slane %v1109_v47, 1  ;;  %v3134_v0 = vcombine.low %v2974_v53, %v2975_v56  ;;  %v1095_v2 = vor.u32 %v1094_v52, %v1090_v51  ;;  %v3383_v5 = vld [vmem:[%s3594_s22 + $0x20] ss:$0 sps:$4 sm:$0x11]   ;;  %v251_v10 = vld [vmem:[%s3594_s22 + $0x18] sm:$0xf] }
  0x1e   : > { %v587_v57 = vsel %vm575_vm1, %v582_v50, %v586_v37  ;;  %v594_v62 = vor.u32 %v593_v54, %v589_v42  ;;  %v1099_v3 = vrot.slane %v1097_v59, 1  ;;  %v1616_v4 = vshll.u32 %v3135_v60, 16  ;;  %v3662_v13 = vld [vmem:[%s3594_s22 + $0x1c] sm:$0xf]  ;;  %v253_v21 = vld [vmem:[%s3594_s22 + $0x24] sm:$0xf] }
  0x1f   : > { %768 = vrot.lane.b32.xlu0 %v587_v57, %s3540_s26  ;;  %v1604_v8 = vshll.u32 %v3134_v0, 16  ;;  %v1614_v9 = vshrl.u32 %v3135_v60, 16  ;;  %v1621_v12 = vshll.u32 %v3653_v1, 16  ;;  %v1112_v14 = vsel %vm575_vm1, %v1107_v58, %v1111_v63  ;;  %v3670_v17 = vld [vmem:[%s3594_s22 + $0x20] ss:$0 sps:$4 sm:$0x11]  }
  0x20   : > { %v599_v6 = vsel %vm575_vm1, %v594_v62, %v598_v55  ;;  %v1618_v11 = vrot.slane %v1616_v4, 1  ;;  %v1602_v15 = vshrl.u32 %v3134_v0, 16  ;;  %v3667_v16 = vcombine.low %v251_v10, %v3662_v13  ;;  %v254_v22 = vld [vmem:[%s3594_s22 + $0x28] sm:$0xf]  ;;  %v3023_v37 = vld [vmem:[%s3594_s22 + $0x24] sm:$0xe] }
  0x21   : > { %1411 = vrot.lane.b32.xlu1 %v1366_v61, %s3538_s24  ;;  %v1100_v18 = vsel %vm575_vm1, %v1095_v2, %v1099_v3  ;;  %v1606_v19 = vrot.slane %v1604_v8, 1  ;;  %v1609_v20 = vshll.u32 %v3383_v5, 16  ;;  %v3166_v24 = vcombine.low %v3022_v7, %v2975_v56  ;;  %v3387_v33 = vld [vmem:[%s3594_s22 + $0x2c] ss:$0 sps:$4 sm:$0x11]  }
  0x22   : > { %v603_v25 = vshll.u32 %v3667_v16, 16  ;;  %v1619_v26 = vor.u32 %v1618_v11, %v1614_v9  ;;  %v1623_v27 = vrot.slane %v1621_v12, 1  ;;  %v608_v28 = vshll.u32 %v3670_v17, 16  ;;  %v298_v42 = vld [vmem:[%s3594_s22 + $0x24] sm:$0xe] }
  0x23   : > { %770 = vrot.lane.b32.xlu0 %v599_v6, %s3540_s26  ;;  %v3678_v30 = vcombine.low %v253_v21, %v254_v22  ;;  %v601_v31 = vshrl.u32 %v3667_v16, 16  ;;  %v1607_v34 = vor.u32 %v1606_v19, %v1602_v15  ;;  %v1611_v35 = vrot.slane %v1609_v20, 1  ;;  %v297_v47 = vld [vmem:[%s3594_s22 + $0x18] sm:$0xe]  ;;  %v2916_v51 = vld [vmem:[%s3594_s22 + $0x30] sm:$0xf] }
  0x24   : > { %v605_v32 = vrot.slane %v603_v25, 1  ;;  %v1624_v38 = vsel %vm575_vm1, %v1619_v26, %v1623_v27  ;;  %v610_v39 = vrot.slane %v608_v28, 1  ;;  %v1873_v40 = vrot.slane %v3166_v24, 1  ;;  %v2917_v52 = vld [vmem:[%s3594_s22 + $0x34] sm:$0xf] }
  0x25   : > { %1283 = vrot.lane.b32.xlu1 %v1112_v14, %s3541_s27  ;;  %v615_v36 = vshll.u32 %v3678_v30, 16  ;;  %v1874_v41 = vrot.slane %v3383_v5, 1  ;;  %v613_v44 = vshrl.u32 %v3678_v30, 16  ;;  %v620_v46 = vshll.u32 %v3387_v33, 16  ;;  %v2914_v53 = vld [vmem:[%s3594_s22 + $0x24] sm:$0xf] }
  0x26   : > { %v606_v43 = vor.u32 %v605_v32, %v601_v31  ;;  %v3167_v49 = vcombine.low %v3023_v37, %v3640_v48  ;;  %v1612_v50 = vsel %vm575_vm1, %v1607_v34, %v1611_v35  ;;  %v2915_v54 = vld [vmem:[%s3594_s22 + $0x28] sm:$0xf]  ;;  %v3073_v56 = vcombine.low %v298_v42, %v254_v22  ;;  %v3395_v9 = vld [vmem:[%s3594_s22 + $0x2c] ss:$0 sps:$4 sm:$0x11]  }
  0x27   : > { %1281 = vrot.lane.b32.xlu0 %v1100_v18, %s3541_s27  ;;  %v617_v45 = vrot.slane %v615_v36, 1  ;;  %v1875_v55 = vsel %vm848_vm0, %v1873_v40, %v1874_v41  ;;  %v622_v59 = vrot.slane %v620_v46, 1  ;;  %v3089_v48 = vcombine.low %v2916_v51, %v2917_v52  ;;  %v2961_v10 = vld [vmem:[%s3594_s22 + $0x30] sm:$0xe]  ;;  %v2960_v11 = vld [vmem:[%s3594_s22 + $0x24] sm:$0xe] }
  0x28   : > { %v611_v57 = vsel %vm575_vm1, %v606_v43, %v610_v39  ;;  %v1877_v61 = vrot.slane %v3653_v1, 1  ;;  %v3072_v62 = vcombine.low %v297_v47, %v3662_v13  ;;  %v3088_v63 = vcombine.low %v2914_v53, %v2915_v54  ;;  %v2980_v19 = vld [vmem:[%s3594_s22 + $0x3c] sm:$0xf]  ;;  %v3720_v20 = vld [vmem:[%s3594_s22 + $0x40] sm:$0xf] }
  0x29   : > { %1523 = vrot.lane.b32.xlu1 %v3135_v60, %s3542_s28  ;;  %v618_v58 = vor.u32 %v617_v45, %v613_v44  ;;  %v1876_v60 = vrot.slane %v3167_v49, 1  ;;  %v858_v3 = vrot.slane %v3073_v56, 1  ;;  %v859_v4 = vrot.slane %v3387_v33, 1  ;;  %v2978_v24 = vld [vmem:[%s3594_s22 + $0x30] sm:$0xf] }
  0x2a   : > { %v1128_v5 = vshll.u32 %v3089_v48, 16  ;;  %v855_v6 = vrot.slane %v3072_v62, 1  ;;  %v856_v7 = vrot.slane %v3670_v17, 1  ;;  %v1116_v8 = vshll.u32 %v3088_v63, 16  ;;  %v2979_v25 = vld [vmem:[%s3594_s22 + $0x34] sm:$0xf] }
  0x2b   : > { %1521 = vrot.lane.b32.xlu0 %v3134_v0, %s3542_s28  ;;  %v3705_v0 = vld [vmem:[%s3594_s22 + $0x38] ss:$0 sps:$4 sm:$0x11]   ;;  %v623_v2 = vsel %vm575_vm1, %v618_v58, %v622_v59  ;;  %v1878_v1 = vsel %vm848_vm0, %v1876_v60, %v1877_v61  ;;  %v1126_v12 = vshrl.u32 %v3089_v48, 16  ;;  %v860_v14 = vsel %vm848_vm0, %v858_v3, %v859_v4  ;;  %v255_v36 = vld [vmem:[%s3594_s22 + $0x30] sm:$0xf] }
  0x2c   : > { %v1133_v13 = vshll.u32 %v3705_v0, 16  ;;  %v1130_v15 = vrot.slane %v1128_v5, 1  ;;  %v1114_v18 = vshrl.u32 %v3088_v63, 16  ;;  %v857_v17 = vsel %vm848_vm0, %v855_v6, %v856_v7  ;;  %v3730_v37 = vld [vmem:[%s3594_s22 + $0x34] sm:$0xf] }
  0x2d   : > { %1795 = vrot.lane.b32.xlu1 %v1624_v38, %s3543_s29  ;;  %v1118_v21 = vrot.slane %v1116_v8, 1  ;;  %v1121_v22 = vshll.u32 %v3395_v9, 16  ;;  %v3121_v26 = vcombine.low %v2961_v10, %v2917_v52  ;;  %v3120_v27 = vcombine.low %v2960_v11, %v2915_v54  ;;  %v3735_v43 = vld [vmem:[%s3594_s22 + $0x44] ss:$0 sps:$4 sm:$0x11]  }
  0x2e   : > { %v3137_v28 = vcombine.low %v2980_v19, %v3720_v20  ;;  %v1131_v31 = vor.u32 %v1130_v15, %v1126_v12  ;;  %v1135_v32 = vrot.slane %v1133_v13, 1  ;;  %v3136_v33 = vcombine.low %v2978_v24, %v2979_v25  ;;  %v3401_v46 = vld [vmem:[%s3594_s22 + $0x38] ss:$0 sps:$4 sm:$0x11]   ;;  %v258_v51 = vld [vmem:[%s3594_s22 + $0x40] sm:$0xf] }
  0x2f   : > { %1793 = vrot.lane.b32.xlu0 %v1612_v50, %s3543_s29  ;;  %v1119_v34 = vor.u32 %v1118_v21, %v1114_v18  ;;  %v1123_v35 = vrot.slane %v1121_v22, 1  ;;  %v1370_v38 = vrot.slane %v3121_v26, 1  ;;  %v1371_v39 = vrot.slane %v3705_v0, 1  ;;  %v257_v50 = vld [vmem:[%s3594_s22 + $0x3c] sm:$0xf] }
  0x30   : > { %v1367_v40 = vrot.slane %v3120_v27, 1  ;;  %v1368_v41 = vrot.slane %v3395_v9, 1  ;;  %v1640_v42 = vshll.u32 %v3137_v28, 16  ;;  %v1136_v44 = vsel %vm575_vm1, %v1131_v31, %v1135_v32  ;;  %v3405_v6 = vld [vmem:[%s3594_s22 + $0x44] ss:$0 sps:$4 sm:$0x11]  }
  0x31   : > { %772 = vrot.lane.b32.xlu1 %v611_v57, %s3540_s26  ;;  %v1628_v45 = vshll.u32 %v3136_v33, 16  ;;  %v3741_v47 = vcombine.low %v255_v36, %v3730_v37  ;;  %v1124_v49 = vsel %vm575_vm1, %v1119_v34, %v1123_v35  ;;  %v1638_v52 = vshrl.u32 %v3137_v28, 16  ;;  %v3024_v57 = vld [vmem:[%s3594_s22 + $0x30] sm:$0xe]  ;;  %v300_v21 = vld [vmem:[%s3594_s22 + $0x3c] sm:$0xe] }
  0x32   : > { %v1642_v53 = vrot.slane %v1640_v42, 1  ;;  %v1645_v54 = vshll.u32 %v3735_v43, 16  ;;  %v1372_v56 = vsel %vm848_vm0, %v1370_v38, %v1371_v39  ;;  %v3755_v59 = vcombine.low %v257_v50, %v258_v51  ;;  %v2921_v24 = vld [vmem:[%s3594_s22 + $0x4c] sm:$0xf]  ;;  %v2918_v26 = vld [vmem:[%s3594_s22 + $0x3c] sm:$0xf] }
  0x33   : > { %1921 = vrot.lane.b32.xlu0 %v1875_v55, %s3544_s30  ;;  %v3749_v55 = vld [vmem:[%s3594_s22 + $0x38] ss:$0 sps:$4 sm:$0x11]   ;;  %v627_v58 = vshll.u32 %v3741_v47, 16  ;;  %v1626_v60 = vshrl.u32 %v3136_v33, 16  ;;  %v1630_v61 = vrot.slane %v1628_v45, 1  ;;  %v3168_v0 = vcombine.low %v3024_v57, %v2979_v25 }
  0x34   : > { %v1633_v62 = vshll.u32 %v3401_v46, 16  ;;  %v1647_v3 = vrot.slane %v1645_v54, 1  ;;  %v632_v4 = vshll.u32 %v3749_v55, 16  ;;  %v625_v5 = vshrl.u32 %v3741_v47, 16  ;;  %v299_v25 = vld [vmem:[%s3594_s22 + $0x30] sm:$0xe] }
  0x35   : > { %774 = vrot.lane.b32.xlu1 %v623_v2, %s3540_s26  ;;  %v1643_v2 = vor.u32 %v1642_v53, %v1638_v52  ;;  %v639_v7 = vshll.u32 %v3755_v59, 16  ;;  %v1631_v8 = vor.u32 %v1630_v61, %v1626_v60  ;;  %v1879_v13 = vrot.slane %v3168_v0, 1  ;;  %v2919_v27 = vld [vmem:[%s3594_s22 + $0x40] sm:$0xf]  ;;  %v2963_v53 = vld [vmem:[%s3594_s22 + $0x48] sm:$0xe] }
  0x36   : > { %v1635_v9 = vrot.slane %v1633_v62, 1  ;;  %v634_v12 = vrot.slane %v632_v4, 1  ;;  %v637_v18 = vshrl.u32 %v3755_v59, 16  ;;  %v3075_v31 = vcombine.low %v300_v21, %v258_v51  ;;  %v2984_v54 = vld [vmem:[%s3594_s22 + $0x54] sm:$0xf] }
  0x37   : > { %1923 = vrot.lane.b32.xlu0 %v1878_v1, %s3544_s30  ;;  %v629_v1 = vrot.slane %v627_v58, 1  ;;  %v1648_v11 = vsel %vm575_vm1, %v1643_v2, %v1647_v3  ;;  %v641_v19 = vrot.slane %v639_v7, 1  ;;  %v1883_v38 = vrot.slane %v3735_v43, 1  ;;  %v3799_v60 = vld [vmem:[%s3594_s22 + $0x58] sm:$0xf] }
  0x38   : > { %v1636_v22 = vsel %vm575_vm1, %v1631_v8, %v1635_v9  ;;  %v3074_v39 = vcombine.low %v299_v25, %v3730_v37  ;;  %v864_v42 = vrot.slane %v3075_v31, 1  ;;  %v862_v50 = vrot.slane %v3749_v55, 1  ;;  %v2962_v61 = vld [vmem:[%s3594_s22 + $0x3c] sm:$0xe]  ;;  %v2982_v0 = vld [vmem:[%s3594_s22 + $0x48] sm:$0xf] }
  0x39   : > { %903 = vrot.lane.b32.xlu1 %v860_v14, %s3539_s25  ;;  %v1880_v14 = vrot.slane %v3401_v46, 1  ;;  %v630_v15 = vor.u32 %v629_v1, %v625_v5  ;;  %v3805_v2 = vld [vmem:[%s3594_s22 + $0x4c] sm:$0xf]  ;;  %v3123_v3 = vcombine.low %v2963_v53, %v2921_v24  ;;  %v3139_v4 = vcombine.low %v2984_v54, %v3799_v60  ;;  %v261_v25 = vld [vmem:[%s3594_s22 + $0x54] sm:$0xf] }
  0x3a   : > { %v861_v37 = vrot.slane %v3074_v39, 1  ;;  %v3122_v5 = vcombine.low %v2962_v61, %v2919_v27  ;;  %v3138_v9 = vcombine.low %v2982_v0, %v3805_v2  ;;  %v302_v61 = vld [vmem:[%s3594_s22 + $0x54] sm:$0xe] }
  0x3b   : > { %901 = vrot.lane.b32.xlu0 %v857_v17, %s3539_s25  ;;  %v644_v17 = vshll.u32 %v3405_v6, 16  ;;  %v635_v32 = vsel %vm575_vm1, %v630_v15, %v634_v12  ;;  %v1881_v36 = vsel %vm848_vm0, %v1879_v13, %v1880_v14  ;;  %v1376_v12 = vrot.slane %v3123_v3, 1  ;;  %v3818_v15 = vld [vmem:[%s3594_s22 + $0x5c] ss:$0 sps:$4 sm:$0x11]  }
  0x3c   : > { %v863_v55 = vsel %vm848_vm0, %v861_v37, %v862_v50  ;;  %v1664_v14 = vshll.u32 %v3139_v4, 16  ;;  %v1669_v31 = vshll.u32 %v3818_v15, 16  ;;  %v1650_v39 = vshrl.u32 %v3138_v9, 16 }
  0x3d   : > { %1015 = vrot.lane.b32.xlu1 %v3089_v48, %s3537_s23  ;;  %v1369_v48 = vsel %vm848_vm0, %v1367_v40, %v1368_v41  ;;  %v646_v34 = vrot.slane %v644_v17, 1  ;;  %v3090_v40 = vcombine.low %v2918_v26, %v2919_v27  ;;  %v3784_v41 = vld [vmem:[%s3594_s22 + $0x50] ss:$0 sps:$4 sm:$0x11]   ;;  %v3831_v26 = vld [vmem:[%s3594_s22 + $0x58] sm:$0xf] }
  0x3e   : > { %v1157_v58 = vshll.u32 %v3784_v41, 16  ;;  %v1377_v13 = vrot.slane %v3784_v41, 1  ;;  %v3823_v17 = vld [vmem:[%s3594_s22 + $0x50] ss:$0 sps:$4 sm:$0x11]   ;;  %v1662_v27 = vshrl.u32 %v3139_v4, 16 }
  0x3f   : > { %1013 = vrot.lane.b32.xlu0 %v3088_v63, %s3537_s23  ;;  %v3025_v63 = vld [vmem:[%s3594_s22 + $0x3c] sm:$0xe]  ;;  %v1140_v51 = vshll.u32 %v3090_v40, 16  ;;  %v1138_v62 = vshrl.u32 %v3090_v40, 16  ;;  %v1657_v41 = vshll.u32 %v3823_v17, 16 }
  0x40   : > { %v3169_v10 = vcombine.low %v3025_v63, %v3720_v20  ;;  %v2920_v20 = vld [vmem:[%s3594_s22 + $0x48] sm:$0xf] }
  0x41   : > { %1287 = vrot.lane.b32.xlu1 %v1136_v44, %s3541_s27  ;;  %v3091_v35 = vcombine.low %v2920_v20, %v2921_v24  ;;  %v865_v44 = vrot.slane %v3405_v6, 1  ;;  %v1142_v63 = vrot.slane %v1140_v51, 1  ;;  %v1159_v6 = vrot.slane %v1157_v58, 1  ;;  %v3452_v58 = vld [vmem:[%s4806_s1] sm:$0xff]  }
  0x42   : > { %v1652_v24 = vshll.u32 %v3138_v9, 16 }
  0x43   : > { %1285 = vrot.lane.b32.xlu0 %v1124_v49, %s3541_s27  ;;  %v1152_v46 = vshll.u32 %v3091_v35, 16  ;;  %v3413_v49 = vld [vmem:[%s3594_s22 + $0x44] ss:$0 sps:$4 sm:$0x11]   ;;  %v866_v52 = vsel %vm848_vm0, %v864_v42, %v865_v44  ;;  %v1143_v8 = vor.u32 %v1142_v63, %v1138_v62  ;;  %v3026_v42 = vld [vmem:[%s3594_s22 + $0x48] sm:$0xe] }
  0x44   : > { %v1374_v20 = vrot.slane %v3413_v49, 1  ;;  %v3449_v44 = vld [vmem:[%s4806_s1 + $0x8] sm:$0xff]   ;;  %v3170_v53 = vcombine.low %v3026_v42, %v3805_v2  ;;  %v2924_v62 = vld [vmem:[%s3594_s22 + $0x60] sm:$0xf] }
  0x45   : > { %1415 = vrot.lane.b32.xlu1 %v1372_v56, %s3538_s24  ;;  %v1150_v56 = vshrl.u32 %v3091_v35, 16  ;;  %v1154_v57 = vrot.slane %v1152_v46, 1  ;;  %v1671_v46 = vrot.slane %v1669_v31, 1  ;;  %v3430_v31 = vld [vmem:[%s3594_s22 + $0x68] ss:$0 sps:$4 sm:$0x11]  }
  0x46   : > { %v1181_v42 = vshll.u32 %v3430_v31, 16 }
  0x47   : > { %1413 = vrot.lane.b32.xlu0 %v1369_v48, %s3538_s24  ;;  %v1145_v48 = vshll.u32 %v3413_v49, 16  ;;  %v1155_v1 = vor.u32 %v1154_v57, %v1150_v56  ;;  %v1659_v56 = vrot.slane %v1657_v41, 1  ;;  %v3027_v57 = vld [vmem:[%s3594_s22 + $0x54] sm:$0xe] }
  0x49   : > { %1527 = vrot.lane.b32.xlu1 %v3137_v28, %s3542_s28  ;;  %v1882_v28 = vrot.slane %v3169_v10, 1  ;;  %v1147_v7 = vrot.slane %v1145_v48, 1  ;;  %v259_v10 = vld [vmem:[%s3594_s22 + $0x48] sm:$0xf] }
  0x4b   : > { %1525 = vrot.lane.b32.xlu0 %v3136_v33, %s3542_s28  ;;  %v642_v33 = vor.u32 %v641_v19, %v637_v18  ;;  %v1884_v43 = vsel %vm848_vm0, %v1882_v28, %v1883_v38  ;;  %v1160_v18 = vsel %vm575_vm1, %v1155_v1, %v1159_v6  ;;  %v1373_v19 = vrot.slane %v3122_v5, 1  ;;  %v3874_v5 = vld [vmem:[%s3594_s22 + $0x64] sm:$0xf] }
  0x4c   : > { %v1666_v28 = vrot.slane %v1664_v14, 1  ;;  %v1885_v6 = vrot.slane %v3170_v53, 1 }
  0x4d   : > { %1799 = vrot.lane.b32.xlu1 %v1648_v11, %s3543_s29  ;;  %v647_v45 = vsel %vm575_vm1, %v642_v33, %v646_v34  ;;  %v3813_v11 = vld [vmem:[%s3594_s22 + $0x4c] sm:$0xf]  ;;  %v1378_v33 = vsel %vm848_vm0, %v1376_v12, %v1377_v13  ;;  %v1375_v38 = vsel %vm848_vm0, %v1373_v19, %v1374_v20  ;;  %v2923_v12 = vld [vmem:[%s3594_s22 + $0x58] sm:$0xf]  ;;  %v3093_v13 = vcombine.low %v2924_v62, %v3874_v5  ;;  %v3919_v62 = vld [vmem:[%s3594_s22 + $0x64] sm:$0xf] }
  0x4e   : > { %v3826_v21 = vcombine.low %v259_v10, %v3813_v11  ;;  %v2922_v10 = vld [vmem:[%s3594_s22 + $0x54] sm:$0xf]  ;;  %v1889_v20 = vrot.slane %v3818_v15, 1 }
  0x4f   : > { %1797 = vrot.lane.b32.xlu0 %v1636_v22, %s3543_s29  ;;  %v1148_v22 = vsel %vm575_vm1, %v1143_v8, %v1147_v7  ;;  %v1886_v7 = vrot.slane %v3823_v17, 1  ;;  %v301_v8 = vld [vmem:[%s3594_s22 + $0x48] sm:$0xe] }
  0x50   : > { %v651_v34 = vshll.u32 %v3826_v21, 16  ;;  %v649_v37 = vshrl.u32 %v3826_v21, 16  ;;  %v3076_v19 = vcombine.low %v301_v8, %v3813_v11 }
  0x51   : > { %776 = vrot.lane.b32.xlu1 %v635_v32, %s3540_s26  ;;  %v3836_v32 = vld [vmem:[%s3594_s22 + $0x50] ss:$0 sps:$4 sm:$0x11]   ;;  %v1887_v17 = vsel %vm848_vm0, %v1885_v6, %v1886_v7  ;;  %v3928_v7 = vld [vmem:[%s3594_s22 + $0x68] ss:$0 sps:$4 sm:$0x11]  }
  0x52   : > { %v656_v49 = vshll.u32 %v3836_v32, 16  ;;  %v653_v50 = vrot.slane %v651_v34, 1  ;;  %v867_v15 = vrot.slane %v3076_v19, 1 }
  0x53   : > { %1925 = vrot.lane.b32.xlu0 %v1881_v36, %s3544_s30  ;;  %v3444_v36 = vld [vmem:[%s4806_s1 + $0x10] ss:$0 sps:$4 sm:$0x33]  }
  0x54   : > { %3331 = vmatprep.subr.msk.bf16.mxu0 %vm2270_vm2, %v3444_v36  ;;  %3332 = vmatprep.subr.msk.bf16.mxu1 %vm2270_vm2, %v3444_v36  ;;  %v654_v63 = vor.u32 %v653_v50, %v649_v37  ;;  %v2986_v50 = vld [vmem:[%s3594_s22 + $0x60] sm:$0xf] }
  0x55   : > { %778 = vrot.lane.b32.xlu1 %v647_v45, %s3540_s26  ;;  %v1667_v45 = vor.u32 %v1666_v28, %v1662_v27 }
  0x57   : > { %1927 = vrot.lane.b32.xlu0 %v1884_v43, %s3544_s30  ;;  %v3856_v43 = vld [vmem:[%s3594_s22 + $0x5c] ss:$0 sps:$4 sm:$0x11]   ;;  %v1672_v48 = vsel %vm575_vm1, %v1667_v45, %v1671_v46  ;;  %v2988_v45 = vld [vmem:[%s3594_s22 + $0x6c] sm:$0xf] }
  0x58   : > { %v668_v3 = vshll.u32 %v3856_v43, 16  ;;  %v871_v28 = vrot.slane %v3856_v43, 1  ;;  %v3905_v46 = vld [vmem:[%s3594_s22 + $0x70] sm:$0xf] }
  0x59   : > { %907 = vrot.lane.b32.xlu1 %v866_v52, %s3539_s25  ;;  %v2272_v52 = vsel %vm2270_vm2, %v3444_v36, 0  ;;  %v3431_v36 = vld [vmem:[%s3594_s22 + $0x5c] ss:$0 sps:$4 sm:$0x11]  }
  0x5a   : > { %3288 = vmatpush3.bf16.msra.mxu0 %v2272_v52  ;;  %3328 = vmatpush3.bf16.msra.mxu1 %v2272_v52  ;;  %v1169_v37 = vshll.u32 %v3431_v36, 16 }
  0x5b   : > { %905 = vrot.lane.b32.xlu0 %v863_v55, %s3539_s25  ;;  %3289 = vmatprep.subr.bf16.mxu0 %v3449_v44  ;;  %v658_v55 = vrot.slane %v656_v49, 1 }
  0x5c   : > { %3326 = vmatprep.subr.bf16.mxu1 %v3449_v44 }
  0x5d   : > { %1019 = vrot.lane.b32.xlu1 %v3091_v35, %s3537_s23  ;;  %v3842_v35 = vcombine.low %v261_v25, %v3831_v26  ;;  %v868_v25 = vrot.slane %v3836_v32, 1  ;;  %v2965_v32 = vld [vmem:[%s3594_s22 + $0x60] sm:$0xe] }
  0x5e   : > { %3290 = vmatpush3.bf16.msra.mxu0 %v3449_v44  ;;  %3329 = vmatpush3.bf16.msra.mxu1 %v3449_v44  ;;  %v3125_v52 = vcombine.low %v2965_v32, %v3874_v5  ;;  %v3923_v5 = vld [vmem:[%s3594_s22 + $0x74] ss:$0 sps:$4 sm:$0x11]  }
  0x5f   : > { %1017 = vrot.lane.b32.xlu0 %v3090_v40, %s3537_s23  ;;  %v1654_v40 = vrot.slane %v1652_v24, 1  ;;  %v663_v51 = vshll.u32 %v3842_v35, 16  ;;  %v661_v0 = vshrl.u32 %v3842_v35, 16  ;;  %3291 = vmatprep.subr.bf16.mxu0 %v3452_v58  ;;  %v3092_v24 = vcombine.low %v2922_v10, %v2923_v12 }
  0x60   : > { %3327 = vmatprep.subr.bf16.mxu1 %v3452_v58  ;;  %v869_v49 = vsel %vm848_vm0, %v867_v15, %v868_v25 }
  0x61   : > { %1291 = vrot.lane.b32.xlu1 %v1160_v18, %s3541_s27  ;;  %v1655_v54 = vor.u32 %v1654_v40, %v1650_v39  ;;  %v665_v2 = vrot.slane %v663_v51, 1  ;;  %v670_v18 = vrot.slane %v668_v3, 1  ;;  %v1164_v34 = vshll.u32 %v3092_v24, 16  ;;  %v3910_v51 = vld [vmem:[%s3594_s22 + $0x64] sm:$0xf] }
  0x62   : > { %3292 = vmatpush3.bf16.msra.mxu0 %v3452_v58  ;;  %3330 = vmatpush3.bf16.msra.mxu1 %v3452_v58  ;;  %v1174_v39 = vshrl.u32 %v3093_v13, 16  ;;  %v1162_v44 = vshrl.u32 %v3092_v24, 16  ;;  %v3140_v58 = vcombine.low %v2986_v50, %v3910_v51 }
  0x63   : > { %1289 = vrot.lane.b32.xlu0 %v1148_v22, %s3541_s27  ;;  %v1660_v1 = vsel %vm575_vm1, %v1655_v54, %v1659_v56  ;;  %v666_v14 = vor.u32 %v665_v2, %v661_v0  ;;  %v1166_v43 = vrot.slane %v1164_v34, 1  ;;  %v3141_v54 = vcombine.low %v2988_v45, %v3905_v46  ;;  %v3959_v34 = vld [vmem:[%s3594_s22 + $0x74] ss:$0 sps:$4 sm:$0x11]  }
  0x64   : > { %v1383_v0 = vrot.slane %v3430_v31, 1  ;;  %v1676_v6 = vshll.u32 %v3140_v58, 16 }
  0x65   : > { %1419 = vrot.lane.b32.xlu1 %v1378_v33, %s3538_s24  ;;  %v671_v11 = vsel %vm575_vm1, %v666_v14, %v670_v18  ;;  %v1688_v3 = vshll.u32 %v3141_v54, 16  ;;  %v1693_v14 = vshll.u32 %v3923_v5, 16  ;;  %v3941_v18 = vld [vmem:[%s3594_s22 + $0x68] ss:$0 sps:$4 sm:$0x11]  }
  0x66   : > { %v1678_v25 = vrot.slane %v1676_v6, 1 }
  0x67   : > { %1417 = vrot.lane.b32.xlu0 %v1375_v38, %s3538_s24  ;;  %v2964_v38 = vld [vmem:[%s3594_s22 + $0x54] sm:$0xe]  ;;  %v1695_v31 = vrot.slane %v1693_v14, 1  ;;  %v877_v14 = vrot.slane %v3959_v34, 1 }
  0x68   : > { %v3124_v53 = vcombine.low %v2964_v38, %v2923_v12  ;;  %v265_v12 = vld [vmem:[%s3594_s22 + $0x6c] sm:$0xf] }
  0x69   : > { %1531 = vrot.lane.b32.xlu1 %v3139_v4, %s3542_s28  ;;  %v3171_v4 = vcombine.low %v3027_v57, %v3799_v60  ;;  %v659_v60 = vsel %vm575_vm1, %v654_v63, %v658_v55  ;;  %v1183_v57 = vrot.slane %v1181_v42, 1  ;;  %v1171_v55 = vrot.slane %v1169_v37, 1  ;;  %v3029_v42 = vld [vmem:[%s3594_s22 + $0x6c] sm:$0xe] }
  0x6a   : > { %v1382_v63 = vrot.slane %v3125_v52, 1  ;;  %v1379_v2 = vrot.slane %v3124_v53, 1  ;;  %v692_v52 = vshll.u32 %v3959_v34, 16  ;;  %v303_v53 = vld [vmem:[%s3594_s22 + $0x60] sm:$0xe] }
  0x6b   : > { %1529 = vrot.lane.b32.xlu0 %v3138_v9, %s3542_s28  ;;  %v3077_v9 = vcombine.low %v302_v61, %v3831_v26  ;;  %v1888_v22 = vrot.slane %v3171_v4, 1  ;;  %v1176_v26 = vshll.u32 %v3093_v13, 16  ;;  %v263_v61 = vld [vmem:[%s3594_s22 + $0x60] sm:$0xf] }
  0x6c   : > { %v3931_v8 = vcombine.low %v263_v61, %v3919_v62  ;;  %v1384_v19 = vsel %vm848_vm0, %v1382_v63, %v1383_v0  ;;  %v2928_v61 = vld [vmem:[%s3594_s22 + $0x78] sm:$0xf]  ;;  %v2926_v63 = vld [vmem:[%s3594_s22 + $0x6c] sm:$0xf]  ;;  %v3986_v0 = vld [vmem:[%s3594_s22 + $0x70] sm:$0xf] }
  0x6d   : > { %1803 = vrot.lane.b32.xlu1 %v1672_v48, %s3543_s29  ;;  %v870_v27 = vrot.slane %v3077_v9, 1  ;;  %v1890_v33 = vsel %vm848_vm0, %v1888_v22, %v1889_v20  ;;  %v1178_v40 = vrot.slane %v1176_v26, 1  ;;  %v1167_v48 = vor.u32 %v1166_v43, %v1162_v44  ;;  %v3936_v9 = vld [vmem:[%s3594_s22 + $0x70] sm:$0xf] }
  0x6e   : > { %v3947_v22 = vcombine.low %v265_v12, %v3936_v9  ;;  %v1681_v26 = vshll.u32 %v3928_v7, 16 }
  0x6f   : > { %1801 = vrot.lane.b32.xlu0 %v1660_v1, %s3543_s29  ;;  %v872_v41 = vsel %vm848_vm0, %v870_v27, %v871_v28  ;;  %v1179_v56 = vor.u32 %v1178_v40, %v1174_v39  ;;  %v1380_v1 = vrot.slane %v3431_v36, 1  ;;  %v1172_v10 = vsel %vm575_vm1, %v1167_v48, %v1171_v55 }
  0x70   : > { %v673_v36 = vshrl.u32 %v3931_v8, 16  ;;  %v687_v38 = vshll.u32 %v3947_v22, 16  ;;  %v685_v50 = vshrl.u32 %v3947_v22, 16  ;;  %v1892_v55 = vrot.slane %v3928_v7, 1 }
  0x71   : > { %780 = vrot.lane.b32.xlu1 %v659_v60, %s3540_s26  ;;  %v1184_v4 = vsel %vm575_vm1, %v1179_v56, %v1183_v57  ;;  %v1690_v60 = vrot.slane %v1688_v3, 1  ;;  %v1381_v20 = vsel %vm848_vm0, %v1379_v2, %v1380_v1  ;;  %v3078_v3 = vcombine.low %v303_v53, %v3919_v62  ;;  %v4040_v53 = vld [vmem:[%s3594_s22 + $0x7c] sm:$0xf] }
  0x72   : > { %v694_v1 = vrot.slane %v692_v52, 1  ;;  %v4001_v62 = vcombine.low %v2926_v63, %v3986_v0  ;;  %v2990_v52 = vld [vmem:[%s3594_s22 + $0x78] sm:$0xf] }
  0x73   : > { %1929 = vrot.lane.b32.xlu0 %v1887_v17, %s3544_s30  ;;  %v675_v17 = vshll.u32 %v3931_v8, 16 }
  0x75   : > { %782 = vrot.lane.b32.xlu1 %v671_v11, %s3540_s26  ;;  %v3028_v11 = vld [vmem:[%s3594_s22 + $0x60] sm:$0xe]  ;;  %v677_v32 = vrot.slane %v675_v17, 1  ;;  %v874_v17 = vrot.slane %v3941_v18, 1 }
  0x76   : > { %v3172_v39 = vcombine.low %v3028_v11, %v3910_v51  ;;  %v689_v51 = vrot.slane %v687_v38, 1  ;;  %v1188_v11 = vshll.u32 %v4001_v62, 16 }
  0x77   : > { %1931 = vrot.lane.b32.xlu0 %v1890_v33, %s3544_s30  ;;  %v680_v33 = vshll.u32 %v3941_v18, 16  ;;  %v678_v37 = vor.u32 %v677_v32, %v673_v36  ;;  %v2967_v18 = vld [vmem:[%s3594_s22 + $0x78] sm:$0xe] }
  0x78   : > { %v1891_v48 = vrot.slane %v3172_v39, 1  ;;  %v2992_v39 = vld [vmem:[%s3594_s22 + $0x84] sm:$0xf] }
  0x79   : > { %911 = vrot.lane.b32.xlu1 %v872_v41, %s3539_s25  ;;  %v1683_v41 = vrot.slane %v1681_v26, 1  ;;  %v682_v45 = vrot.slane %v680_v33, 1  ;;  %v2966_v33 = vld [vmem:[%s3594_s22 + $0x6c] sm:$0xe] }
  0x7b   : > { %909 = vrot.lane.b32.xlu0 %v869_v49, %s3539_s25  ;;  %v304_v49 = vld [vmem:[%s3594_s22 + $0x6c] sm:$0xe] }
  0x7c   : > { %v3079_v2 = vcombine.low %v304_v49, %v3936_v9  ;;  %v1895_v9 = vrot.slane %v3923_v5, 1 }
  0x7d   : > { %1023 = vrot.lane.b32.xlu1 %v3093_v13, %s3537_s23  ;;  %v1686_v13 = vshrl.u32 %v3141_v54, 16 }
  0x7f   : > { %1021 = vrot.lane.b32.xlu0 %v3092_v24, %s3537_s23  ;;  %v1674_v24 = vshrl.u32 %v3140_v58, 16  ;;  %v1691_v15 = vor.u32 %v1690_v60, %v1686_v13  ;;  %v876_v60 = vrot.slane %v3079_v2, 1  ;;  %v4055_v2 = vcombine.low %v2990_v52, %v4040_v53  ;;  %v3031_v52 = vld [vmem:[%s3594_s22 + $0x84] sm:$0xe] }
  0x81   : > { %1295 = vrot.lane.b32.xlu1 %v1184_v4, %s3541_s27  ;;  %v1679_v40 = vor.u32 %v1678_v25, %v1674_v24  ;;  %v1696_v44 = vsel %vm575_vm1, %v1691_v15, %v1695_v31  ;;  %v690_v4 = vor.u32 %v689_v51, %v685_v50  ;;  %v4010_v24 = vld [vmem:[%s3594_s22 + $0x80] ss:$0 sps:$4 sm:$0x11]   ;;  %v4017_v15 = vld [vmem:[%s3594_s22 + $0x74] ss:$0 sps:$4 sm:$0x11]   ;;  %v878_v36 = vsel %vm848_vm0, %v876_v60, %v877_v14 }
  0x82   : > { %v1205_v38 = vshll.u32 %v4010_v24, 16  ;;  %v1193_v49 = vshll.u32 %v4017_v15, 16  ;;  %v4072_v60 = vld [vmem:[%s3594_s22 + $0x80] ss:$0 sps:$4 sm:$0x11]  }
  0x83   : > { %1293 = vrot.lane.b32.xlu0 %v1172_v10, %s3541_s27  ;;  %v1684_v57 = vsel %vm575_vm1, %v1679_v40, %v1683_v41  ;;  %v1893_v10 = vsel %vm848_vm0, %v1891_v48, %v1892_v55  ;;  %v4028_v40 = vld [vmem:[%s3594_s22 + $0x88] sm:$0xf] }
  0x84   : > { %v1207_v55 = vrot.slane %v1205_v38, 1 }
  0x85   : > { %1423 = vrot.lane.b32.xlu1 %v1384_v19, %s3538_s24  ;;  %v3953_v27 = vpop.permute.xlu1 %1011  ;;  %v873_v19 = vrot.slane %v3078_v3, 1  ;;  %v267_v3 = vld [vmem:[%s3594_s22 + $0x78] sm:$0xf] }
  0x86   : > { %v3955_v28 = vpop.permute.xlu0 %1009 }
  0x87   : > { %1421 = vrot.lane.b32.xlu0 %v1381_v20, %s3538_s24  ;;  %v695_v20 = vsel %vm575_vm1, %v690_v4, %v694_v1  ;;  %v1389_v1 = vrot.slane %v4010_v24, 1  ;;  %v269_v24 = vld [vmem:[%s3594_s22 + $0x84] sm:$0xf] }
  0x89   : > { %1535 = vrot.lane.b32.xlu1 %v3141_v54, %s3542_s28  ;;  %v3173_v54 = vcombine.low %v3029_v42, %v3905_v46  ;;  %v683_v46 = vsel %vm575_vm1, %v678_v37, %v682_v45  ;;  %v875_v42 = vsel %vm848_vm0, %v873_v19, %v874_v17  ;;  %v1190_v45 = vrot.slane %v1188_v11, 1 }
  0x8a   : > { %v3970_v43 = vpop.permute.xlu0 %1409 }
  0x8b   : > { %1533 = vrot.lane.b32.xlu0 %v3140_v58, %s3542_s28  ;;  %v3976_v56 = vpop.permute.xlu1 %897  ;;  %v3982_v58 = vld [vmem:[%s3594_s22 + $0x7c] sm:$0xf]  ;;  %v1894_v12 = vrot.slane %v3173_v54, 1  ;;  %v3126_v54 = vcombine.low %v2966_v33, %v3986_v0  ;;  %v1195_v0 = vrot.slane %v1193_v49, 1 }
  0x8c   : > { %v3994_v6 = vcombine.low %v2928_v61, %v3982_v58  ;;  %v3127_v51 = vcombine.low %v2967_v18, %v3982_v58 }
  0x8d   : > { %1807 = vrot.lane.b32.xlu1 %v1696_v44, %s3543_s29  ;;  %v1896_v26 = vsel %vm848_vm0, %v1894_v12, %v1895_v9  ;;  %v1186_v44 = vshrl.u32 %v4001_v62, 16  ;;  %v1385_v12 = vrot.slane %v3126_v54, 1  ;;  %v1386_v9 = vrot.slane %v4017_v15, 1 }
  0x8e   : > { %v1200_v5 = vshll.u32 %v3994_v6, 16  ;;  %v1198_v34 = vshrl.u32 %v3994_v6, 16  ;;  %v1388_v4 = vrot.slane %v3127_v51, 1 }
  0x8f   : > { %1805 = vrot.lane.b32.xlu0 %v1684_v57, %s3543_s29  ;;  %v3996_v7 = vpop.permute.xlu1 %899  ;;  %v4045_v57 = vcombine.low %v2992_v39, %v4028_v40  ;;  %v1191_v63 = vor.u32 %v1190_v45, %v1186_v44  ;;  %v1387_v15 = vsel %vm848_vm0, %v1385_v12, %v1386_v9 }
  0x90   : > { %v1202_v32 = vrot.slane %v1200_v5, 1  ;;  %v1700_v5 = vshll.u32 %v4055_v2, 16  ;;  %v1390_v11 = vsel %vm848_vm0, %v1388_v4, %v1389_v1 }
  0x91   : > { %v769_v13 = vpop.permute.xlu0 %768  ;;  %784 = vrot.lane.b32.xlu1 %v683_v46, %s3540_s26  ;;  %v4059_v46 = vld [vmem:[%s3594_s22 + $0x7c] sm:$0xf] }
  0x92   : > { %v1955_v37 = vsel %vm1953_vm3, %v3622_v23, %v769_v13  ;;  %v1203_v23 = vor.u32 %v1202_v32, %v1198_v34  ;;  %v1712_v13 = vshll.u32 %v4045_v57, 16  ;;  %v4080_v19 = vcombine.low %v267_v3, %v4059_v46  ;;  %v4097_v34 = vld [vmem:[%s3594_s22 + $0x80] ss:$0 sps:$4 sm:$0x11]  }
  0x93   : > { %1933 = vrot.lane.b32.xlu0 %v1893_v10, %s3544_s30  ;;  %v4012_v25 = vpop.permute.xlu1 %1411  ;;  %v1988_v61 = vsel %vm1986_vm4, %v1955_v37, %v3976_v56  ;;  %v4063_v10 = vld [vmem:[%s3594_s22 + $0x8c] ss:$0 sps:$4 sm:$0x11]   ;;  %v1702_v45 = vrot.slane %v1700_v5, 1 }
  0x94   : > { %v2021_v14 = vsel %vm2019_vm5, %v1988_v61, %v3955_v28  ;;  %v4087_v28 = vld [vmem:[%s3594_s22 + $0x88] sm:$0xf]  ;;  %v1714_v18 = vrot.slane %v1712_v13, 1  ;;  %v1717_v33 = vshll.u32 %v4063_v10, 16  ;;  %v699_v32 = vshll.u32 %v4080_v19, 16 }
  0x95   : > { %v771_v31 = vpop.permute.xlu0 %770  ;;  %786 = vrot.lane.b32.xlu1 %v695_v20, %s3540_s26  ;;  %v1196_v20 = vsel %vm575_vm1, %v1191_v63, %v1195_v0  ;;  %v4105_v38 = vcombine.low %v269_v24, %v4087_v28  ;;  %v4125_v63 = vld [vmem:[%s3594_s22 + $0x8c] ss:$0 sps:$4 sm:$0x11]   ;;  %v3175_v13 = vcombine.low %v3031_v52, %v4028_v40  ;;  %v1898_v24 = vrot.slane %v4072_v60, 1  ;;  %v2969_v52 = vld [vmem:[%s3594_s22 + $0x90] sm:$0xe] }
  0x96   : > { %v1957_v48 = vsel %vm1953_vm3, %v3627_v29, %v771_v31  ;;  %v1710_v31 = vshrl.u32 %v4045_v57, 16  ;;  %v701_v61 = vrot.slane %v699_v32, 1  ;;  %v716_v40 = vshll.u32 %v4125_v63, 16 }
  0x97   : > { %1935 = vrot.lane.b32.xlu0 %v1896_v26, %s3544_s30  ;;  %v4030_v41 = vpop.permute.xlu1 %1283  ;;  %v1990_v56 = vsel %vm1986_vm4, %v1957_v48, %v3996_v7  ;;  %v1208_v7 = vsel %vm575_vm1, %v1203_v23, %v1207_v55  ;;  %v1719_v48 = vrot.slane %v1717_v33, 1  ;;  %v697_v55 = vshrl.u32 %v4080_v19, 16 }
  0x98   : > { %v1715_v54 = vor.u32 %v1714_v18, %v1710_v31  ;;  %v711_v0 = vshll.u32 %v4105_v38, 16  ;;  %v4156_v31 = vld [vmem:[%s3594_s22 + $0x88] sm:$0xf]  ;;  %v1900_v18 = vrot.slane %v3175_v13, 1 }
  0x99   : > { %v1282_v50 = vpop.permute.xlu0 %1281  ;;  %915 = vrot.lane.b32.xlu1 %v878_v36, %s3539_s25  ;;  %v1698_v36 = vshrl.u32 %v4055_v2, 16 }
  0x9b   : > { %913 = vrot.lane.b32.xlu0 %v875_v42, %s3539_s25  ;;  %v4052_v58 = vpop.permute.xlu1 %1523 }
  0x9d   : > { %v1522_v29 = vpop.permute.xlu0 %1521  ;;  %1027 = vrot.lane.b32.xlu1 %v3994_v6, %s3537_s23  ;;  %v2054_v6 = vsel %vm2052_vm6, %v2021_v14, %v1282_v50  ;;  %v3030_v50 = vld [vmem:[%s3594_s22 + $0x78] sm:$0xe] }
  0x9e   : > { %v3174_v4 = vcombine.low %v3030_v50, %v4040_v53  ;;  %v702_v53 = vor.u32 %v701_v61, %v697_v55  ;;  %v883_v50 = vrot.slane %v4125_v63, 1  ;;  %v3470_v61 = vld [vmem:[%s3594_s22 + $0x8c] ss:$0 sps:$4 sm:$0x11]  }
  0x9f   : > { %1025 = vrot.lane.b32.xlu0 %v4001_v62, %s3537_s23  ;;  %v1796_v17 = vpop.permute.xlu1 %1795  ;;  %v2023_v62 = vsel %vm2019_vm5, %v1990_v56, %v3953_v27  ;;  %v2087_v27 = vsel %vm2085_vm7, %v2054_v6, %v3970_v43  ;;  %v1705_v43 = vshll.u32 %v4072_v60, 16  ;;  %v713_v6 = vrot.slane %v711_v0, 1 }
  0xa0   : > { %v2056_v39 = vsel %vm2052_vm6, %v2023_v62, %v4030_v41  ;;  %v2120_v42 = vsel %vm2118_vm8, %v2087_v27, %v1522_v29  ;;  %v704_v41 = vshll.u32 %v4097_v34, 16  ;;  %v1897_v5 = vrot.slane %v3174_v4, 1  ;;  %v2932_v62 = vld [vmem:[%s3594_s22 + $0x90] sm:$0xf]  ;;  %v2996_v4 = vld [vmem:[%s3594_s22 + $0x9c] sm:$0xf] }
  0xa1   : > { %v1794_v26 = vpop.permute.xlu0 %1793  ;;  %1299 = vrot.lane.b32.xlu1 %v1208_v7, %s3541_s27  ;;  %v2089_v23 = vsel %vm2085_vm7, %v2056_v39, %v4012_v25  ;;  %v1703_v25 = vor.u32 %v1702_v45, %v1698_v36  ;;  %v1707_v1 = vrot.slane %v1705_v43, 1  ;;  %v709_v7 = vshrl.u32 %v4105_v38, 16 }
  0xa2   : > { %v2153_v49 = vsel %vm2151_vm9, %v2120_v42, %v1794_v26  ;;  %v2122_v3 = vsel %vm2118_vm8, %v2089_v23, %v4052_v58  ;;  %v1720_v58 = vsel %vm575_vm1, %v1715_v54, %v1719_v48  ;;  %v706_v14 = vrot.slane %v704_v41, 1  ;;  %v2933_v26 = vld [vmem:[%s3594_s22 + $0x94] sm:$0xf]  ;;  %v3469_v54 = vld [vmem:[%s3594_s22 + $0x98] ss:$0 sps:$4 sm:$0x11]  }
  0xa3   : > { %1297 = vrot.lane.b32.xlu0 %v1196_v20, %s3541_s27  ;;  %v4110_v44 = vpop.permute.xlu1 %772  ;;  %v2155_v56 = vsel %vm2151_vm9, %v2122_v3, %v1796_v17  ;;  %v306_v17 = vld [vmem:[%s3594_s22 + $0x84] sm:$0xe]  ;;  %v714_v36 = vor.u32 %v713_v6, %v709_v7  ;;  %v718_v60 = vrot.slane %v716_v40, 1  ;;  %v3097_v32 = vcombine.low %v2932_v62, %v2933_v26  ;;  %v2994_v40 = vld [vmem:[%s3594_s22 + $0x90] sm:$0xf] }
  0xa4   : > { %v3081_v33 = vcombine.low %v306_v17, %v4087_v28  ;;  %v707_v27 = vsel %vm575_vm1, %v702_v53, %v706_v14  ;;  %v1899_v42 = vsel %vm848_vm0, %v1897_v5, %v1898_v24  ;;  %v1901_v45 = vrot.slane %v4063_v10, 1  ;;  %v2968_v3 = vld [vmem:[%s3594_s22 + $0x84] sm:$0xe]  ;;  %v4195_v17 = vld [vmem:[%s3594_s22 + $0x94] sm:$0xf] }
  0xa5   : > { %v1922_v37 = vpop.permute.xlu0 %1921  ;;  %1427 = vrot.lane.b32.xlu1 %v1390_v11, %s3538_s24  ;;  %v305_v11 = vld [vmem:[%s3594_s22 + $0x78] sm:$0xe]  ;;  %v1224_v10 = vshll.u32 %v3097_v32, 16  ;;  %v880_v23 = vrot.slane %v4097_v34, 1  ;;  %v1217_v53 = vshll.u32 %v3470_v61, 16  ;;  %v3128_v6 = vcombine.low %v2968_v3, %v4156_v31 }
  0xa6   : > { %v2186_v51 = vsel %vm2184_vm10, %v2153_v49, %v1922_v37  ;;  %v3080_v43 = vcombine.low %v305_v11, %v4059_v46  ;;  %v882_v37 = vrot.slane %v3081_v33, 1  ;;  %v1902_v48 = vsel %vm848_vm0, %v1900_v18, %v1901_v45  ;;  %v271_v18 = vld [vmem:[%s3594_s22 + $0x90] sm:$0xf]  ;;  %v4209_v33 = vld [vmem:[%s3594_s22 + $0x94] sm:$0xf] }
  0xa7   : > { %1425 = vrot.lane.b32.xlu0 %v1387_v15, %s3538_s24  ;;  %3293 = vmatprep.mubr.msk.bf16.mxu0 %vm2237_vm11, %v2186_v51  ;;  %v4130_v29 = vpop.permute.xlu1 %774  ;;  %v2930_v15 = vld [vmem:[%s3594_s22 + $0x84] sm:$0xf]  ;;  %v719_v51 = vsel %vm575_vm1, %v714_v36, %v718_v60  ;;  %v1219_v11 = vrot.slane %v1217_v53, 1  ;;  %v1395_v36 = vrot.slane %v3469_v54, 1  ;;  %v1391_v60 = vrot.slane %v3128_v6, 1 }
  0xa8   : > { %v3096_v28 = vcombine.low %v2930_v15, %v4156_v31  ;;  %v879_v41 = vrot.slane %v3080_v43, 1  ;;  %v884_v63 = vsel %vm848_vm0, %v882_v37, %v883_v50  ;;  %v4205_v31 = vcombine.low %v2994_v40, %v4195_v17  ;;  %v4212_v45 = vld [vmem:[%s3594_s22 + $0xa4] ss:$0 sps:$4 sm:$0x11]  }
  0xa9   : > { %v1924_v12 = vpop.permute.xlu0 %1923  ;;  %1539 = vrot.lane.b32.xlu1 %v4045_v57, %s3542_s28  ;;  %v1708_v57 = vsel %vm575_vm1, %v1703_v25, %v1707_v1  ;;  %v3129_v25 = vcombine.low %v2969_v52, %v2933_v26  ;;  %v1222_v1 = vshrl.u32 %v3097_v32, 16  ;;  %v1959_v37 = vsel %vm1953_vm3, %v3667_v16, %v4110_v44  ;;  %v4233_v16 = vld [vmem:[%s3594_s22 + $0xa0] sm:$0xf] }
  0xaa   : > { %v2188_v9 = vsel %vm2184_vm10, %v2155_v56, %v1924_v12  ;;  %v1212_v55 = vshll.u32 %v3096_v28, 16  ;;  %v1226_v56 = vrot.slane %v1224_v10, 1  ;;  %v1229_v12 = vshll.u32 %v3469_v54, 16 }
  0xab   : > { %1537 = vrot.lane.b32.xlu0 %v4055_v2, %s3542_s28  ;;  %3294 = vmatmul.mubr.msk.bf16.vlgmr.msra.gmra.mxu0 %vm2237_vm11, %v2188_v9  ;;  %v4145_v20 = vpop.permute.xlu1 %903  ;;  %v4187_v9 = vld [vmem:[%s3594_s22 + $0xa0] sm:$0xf]  ;;  %v881_v13 = vsel %vm848_vm0, %v879_v41, %v880_v23  ;;  %v1394_v15 = vrot.slane %v3129_v25, 1  ;;  %v4225_v52 = vcombine.low %v271_v18, %v4209_v33  ;;  %v273_v41 = vld [vmem:[%s3594_s22 + $0x9c] sm:$0xf]  ;;  %v1722_v25 = vshrl.u32 %v4205_v31, 16 }
  0xac   : > { %v1214_v14 = vrot.slane %v1212_v55, 1  ;;  %v1227_v5 = vor.u32 %v1226_v56, %v1222_v1  ;;  %v1231_v24 = vrot.slane %v1229_v12, 1  ;;  %v4246_v1 = vld [vmem:[%s3594_s22 + $0x98] ss:$0 sps:$4 sm:$0x11]  }
  0xad   : > { %v4151_v2 = vpop.permute.xlu0 %901  ;;  %1811 = vrot.lane.b32.xlu1 %v1720_v58, %s3543_s29  ;;  %v1210_v58 = vshrl.u32 %v3096_v28, 16  ;;  %v1396_v23 = vsel %vm848_vm0, %v1394_v15, %v1395_v36  ;;  %v723_v12 = vshll.u32 %v4225_v52, 16  ;;  %v4278_v18 = vld [vmem:[%s3594_s22 + $0xa4] ss:$0 sps:$4 sm:$0x11]  }
  0xae   : > { %v1232_v50 = vsel %vm575_vm1, %v1227_v5, %v1231_v24  ;;  %v1992_v10 = vsel %vm1986_vm4, %v1959_v37, %v4151_v2  ;;  %v1741_v2 = vshll.u32 %v4212_v45, 16  ;;  %v3033_v37 = vld [vmem:[%s3594_s22 + $0x9c] sm:$0xe] }
  0xaf   : > { %1809 = vrot.lane.b32.xlu0 %v1708_v57, %s3543_s29  ;;  %v4162_v39 = vpop.permute.xlu1 %1015  ;;  %v4199_v57 = vcombine.low %v2996_v4, %v4187_v9  ;;  %v1215_v26 = vor.u32 %v1214_v14, %v1210_v58  ;;  %v725_v15 = vrot.slane %v723_v12, 1 }
  0xb0   : > { %v1743_v5 = vrot.slane %v1741_v2, 1  ;;  %v4304_v2 = vld [vmem:[%s3594_s22 + $0xac] sm:$0xf] }
  0xb1   : > { %v4168_v49 = vpop.permute.xlu0 %1013  ;;  %788 = vrot.lane.b32.xlu1 %v707_v27, %s3540_s26  ;;  %v1736_v43 = vshll.u32 %v4199_v57, 16  ;;  %v1220_v54 = vsel %vm575_vm1, %v1215_v26, %v1219_v11  ;;  %v1734_v3 = vshrl.u32 %v4199_v57, 16  ;;  %v728_v11 = vshll.u32 %v4246_v1, 16 }
  0xb2   : > { %v2025_v44 = vsel %vm2019_vm5, %v1992_v10, %v4168_v49  ;;  %v1961_v49 = vsel %vm1953_vm3, %v3678_v30, %v4130_v29 }
  0xb3   : > { %1937 = vrot.lane.b32.xlu0 %v1899_v42, %s3544_s30  ;;  %v4176_v46 = vpop.permute.xlu1 %1287  ;;  %v1392_v42 = vrot.slane %v3470_v61, 1  ;;  %v3032_v61 = vld [vmem:[%s3594_s22 + $0x90] sm:$0xe]  ;;  %v1738_v4 = vrot.slane %v1736_v43, 1 }
  0xb4   : > { %v3176_v40 = vcombine.low %v3032_v61, %v4195_v17  ;;  %v721_v17 = vshrl.u32 %v4225_v52, 16 }
  0xb5   : > { %v1286_v0 = vpop.permute.xlu0 %1285  ;;  %790 = vrot.lane.b32.xlu1 %v719_v51, %s3540_s26  ;;  %v4222_v51 = vld [vmem:[%s3594_s22 + $0x98] ss:$0 sps:$4 sm:$0x11]   ;;  %v1393_v55 = vsel %vm848_vm0, %v1391_v60, %v1392_v42  ;;  %v1739_v26 = vor.u32 %v1738_v4, %v1734_v3  ;;  %v2934_v3 = vld [vmem:[%s3594_s22 + $0x9c] sm:$0xf] }
  0xb6   : > { %v1729_v6 = vshll.u32 %v4222_v51, 16  ;;  %v4311_v4 = vld [vmem:[%s3594_s22 + $0xa0] sm:$0xf] }
  0xb7   : > { %1939 = vrot.lane.b32.xlu0 %v1902_v48, %s3544_s30  ;;  %v4189_v34 = vpop.permute.xlu1 %1415  ;;  %v1724_v48 = vshll.u32 %v4205_v31, 16 }
  0xb8   : > { %v1731_v42 = vrot.slane %v1729_v6, 1  ;;  %v1907_v6 = vrot.slane %v4212_v45, 1 }
  0xb9   : > { %v1414_v7 = vpop.permute.xlu0 %1413  ;;  %919 = vrot.lane.b32.xlu1 %v884_v63, %s3539_s25  ;;  %v2058_v63 = vsel %vm2052_vm6, %v2025_v44, %v1286_v0  ;;  %v4255_v0 = vcombine.low %v273_v41, %v4233_v16  ;;  %v1726_v53 = vrot.slane %v1724_v48, 1  ;;  %v1904_v48 = vrot.slane %v4222_v51, 1  ;;  %v2936_v51 = vld [vmem:[%s3594_s22 + $0xa8] sm:$0xf] }
  0xba   : > { %v2091_v56 = vsel %vm2085_vm7, %v2058_v63, %v1414_v7 }
  0xbb   : > { %917 = vrot.lane.b32.xlu0 %v881_v13, %s3539_s25  ;;  %v4202_v62 = vpop.permute.xlu1 %1527  ;;  %v1994_v13 = vsel %vm1986_vm4, %v1961_v49, %v4145_v20  ;;  %v1727_v60 = vor.u32 %v1726_v53, %v1722_v25  ;;  %v733_v41 = vshrl.u32 %v4255_v0, 16 }
  0xbc   : > { %v2027_v30 = vsel %vm2019_vm5, %v1994_v13, %v4162_v39  ;;  %v3099_v13 = vcombine.low %v2936_v51, %v4304_v2 }
  0xbd   : > { %v1526_v27 = vpop.permute.xlu0 %1525  ;;  %1031 = vrot.lane.b32.xlu1 %v3097_v32, %s3537_s23  ;;  %v2060_v20 = vsel %vm2052_vm6, %v2027_v30, %v4176_v46  ;;  %v735_v46 = vshll.u32 %v4255_v0, 16  ;;  %v1732_v61 = vsel %vm575_vm1, %v1727_v60, %v1731_v42 }
  0xbe   : > { %v2124_v58 = vsel %vm2118_vm8, %v2091_v56, %v1526_v27  ;;  %v2093_v39 = vsel %vm2085_vm7, %v2060_v20, %v4189_v34  ;;  %v4331_v20 = vld [vmem:[%s3594_s22 + $0xb0] ss:$0 sps:$4 sm:$0x11]   ;;  %v1248_v45 = vshll.u32 %v3099_v13, 16 }
  0xbf   : > { %1029 = vrot.lane.b32.xlu0 %v3096_v28, %s3537_s23  ;;  %v1800_v32 = vpop.permute.xlu1 %1799  ;;  %v2126_v27 = vsel %vm2118_vm8, %v2093_v39, %v4202_v62  ;;  %v730_v62 = vrot.slane %v728_v11, 1  ;;  %v737_v44 = vrot.slane %v735_v46, 1  ;;  %v886_v11 = vrot.slane %v4246_v1, 1  ;;  %v3486_v39 = vld [vmem:[%s3594_s22 + $0xa4] ss:$0 sps:$4 sm:$0x11]  }
  0xc0   : > { %v2159_v34 = vsel %vm2151_vm9, %v2126_v27, %v1800_v32  ;;  %v726_v32 = vor.u32 %v725_v15, %v721_v17  ;;  %v1246_v46 = vshrl.u32 %v3099_v13, 16  ;;  %v2971_v27 = vld [vmem:[%s3594_s22 + $0xa8] sm:$0xe]  ;;  %v1250_v42 = vrot.slane %v1248_v45, 1 }
  0xc1   : > { %v1798_v28 = vpop.permute.xlu0 %1797  ;;  %1303 = vrot.lane.b32.xlu1 %v1232_v50, %s3541_s27  ;;  %v1903_v50 = vrot.slane %v3176_v40, 1  ;;  %v738_v56 = vor.u32 %v737_v44, %v733_v41  ;;  %v2998_v44 = vld [vmem:[%s3594_s22 + $0xa8] sm:$0xf] }
  0xc2   : > { %v2157_v29 = vsel %vm2151_vm9, %v2124_v58, %v1798_v28  ;;  %v740_v28 = vshll.u32 %v4278_v18, 16 }
  0xc3   : > { %1301 = vrot.lane.b32.xlu0 %v1220_v54, %s3541_s27  ;;  %v4260_v14 = vpop.permute.xlu1 %776  ;;  %v1744_v54 = vsel %vm575_vm1, %v1739_v26, %v1743_v5  ;;  %v1905_v25 = vsel %vm848_vm0, %v1903_v50, %v1904_v48  ;;  %v889_v5 = vrot.slane %v4278_v18, 1  ;;  %v2970_v18 = vld [vmem:[%s3594_s22 + $0x9c] sm:$0xe] }
  0xc4   : > { %v742_v12 = vrot.slane %v740_v28, 1  ;;  %v3130_v41 = vcombine.low %v2970_v18, %v4311_v4  ;;  %v4355_v28 = vld [vmem:[%s3594_s22 + $0xac] sm:$0xf] }
  0xc5   : > { %v1926_v7 = vpop.permute.xlu0 %1925  ;;  %1431 = vrot.lane.b32.xlu1 %v1396_v23, %s3538_s24  ;;  %v3177_v23 = vcombine.low %v3033_v37, %v4187_v9  ;;  %v731_v9 = vsel %vm575_vm1, %v726_v32, %v730_v62  ;;  %v4346_v37 = vld [vmem:[%s3594_s22 + $0xb8] sm:$0xf]  ;;  %v1241_v62 = vshll.u32 %v3486_v39, 16  ;;  %v3131_v32 = vcombine.low %v2971_v27, %v4304_v2 }
  0xc6   : > { %v2190_v24 = vsel %vm2184_vm10, %v2157_v29, %v1926_v7  ;;  %v3098_v29 = vcombine.low %v2934_v3, %v4311_v4  ;;  %v743_v7 = vsel %vm575_vm1, %v738_v56, %v742_v12  ;;  %v1401_v3 = vrot.slane %v4331_v20, 1 }
  0xc7   : > { %1429 = vrot.lane.b32.xlu0 %v1393_v55, %s3538_s24  ;;  %3297 = vmatprep.mubr.msk.bf16.mxu0 %vm2237_vm11, %v2190_v24  ;;  %v4283_v36 = vpop.permute.xlu1 %778  ;;  %v1906_v53 = vrot.slane %v3177_v23, 1  ;;  %v1251_v23 = vor.u32 %v1250_v42, %v1246_v46  ;;  %v1243_v2 = vrot.slane %v1241_v62, 1  ;;  %v4366_v4 = vcombine.low %v2998_v44, %v4355_v28 }
  0xc8   : > { %v1236_v17 = vshll.u32 %v3098_v29, 16  ;;  %v1400_v56 = vrot.slane %v3131_v32, 1  ;;  %v1397_v12 = vrot.slane %v3130_v41, 1 }
  0xc9   : > { %v1928_v43 = vpop.permute.xlu0 %1927  ;;  %1543 = vrot.lane.b32.xlu1 %v4199_v57, %s3542_s28  ;;  %v308_v57 = vld [vmem:[%s3594_s22 + $0x9c] sm:$0xe]  ;;  %v1908_v24 = vsel %vm848_vm0, %v1906_v53, %v1907_v6  ;;  %v1398_v53 = vrot.slane %v3486_v39, 1  ;;  %v4373_v6 = vld [vmem:[%s3594_s22 + $0xbc] ss:$0 sps:$4 sm:$0x11]  }
  0xca   : > { %v2192_v10 = vsel %vm2184_vm10, %v2159_v34, %v1928_v43  ;;  %v3083_v49 = vcombine.low %v308_v57, %v4233_v16  ;;  %v1253_v34 = vshll.u32 %v4331_v20, 16  ;;  %v3000_v43 = vld [vmem:[%s3594_s22 + $0xb4] sm:$0xf]  ;;  %v1402_v39 = vsel %vm848_vm0, %v1400_v56, %v1401_v3  ;;  %v4434_v3 = vld [vmem:[%s3594_s22 + $0xbc] ss:$0 sps:$4 sm:$0x11]  }
  0xcb   : > { %1541 = vrot.lane.b32.xlu0 %v4205_v31, %s3542_s28  ;;  %3298 = vmatmul.mubr.msk.bf16.gmra.mxu0 %vm2237_vm11, %v2192_v10  ;;  %v4299_v55 = vpop.permute.xlu1 %907  ;;  %v307_v31 = vld [vmem:[%s3594_s22 + $0x90] sm:$0xe]  ;;  %v1234_v10 = vshrl.u32 %v3098_v29, 16  ;;  %v4359_v57 = vcombine.low %v3000_v43, %v4346_v37  ;;  %v1765_v46 = vshll.u32 %v4373_v6, 16  ;;  %v1746_v42 = vshrl.u32 %v4366_v4, 16 }
  0xcc   : > { %v3082_v30 = vcombine.low %v307_v31, %v4209_v33  ;;  %v888_v40 = vrot.slane %v3083_v49, 1  ;;  %v4370_v49 = vld [vmem:[%s3594_s22 + $0xac] sm:$0xf] }
  0xcd   : > { %v4306_v63 = vpop.permute.xlu0 %905  ;;  %1815 = vrot.lane.b32.xlu1 %v1744_v54, %s3543_s29  ;;  %v1238_v54 = vrot.slane %v1236_v17, 1  ;;  %v1399_v17 = vsel %vm848_vm0, %v1397_v12, %v1398_v53  ;;  %v1758_v18 = vshrl.u32 %v4359_v57, 16  ;;  %v1767_v44 = vrot.slane %v1765_v46, 1  ;;  %v2940_v46 = vld [vmem:[%s3594_s22 + $0xc0] sm:$0xf] }
  0xce   : > { %v885_v26 = vrot.slane %v3082_v30, 1  ;;  %v890_v60 = vsel %vm848_vm0, %v888_v40, %v889_v5  ;;  %v1760_v30 = vshll.u32 %v4359_v57, 16  ;;  %v4383_v5 = vld [vmem:[%s3594_s22 + $0xb0] ss:$0 sps:$4 sm:$0x11]  }
  0xcf   : > { %1813 = vrot.lane.b32.xlu0 %v1732_v61, %s3543_s29  ;;  %v4319_v58 = vpop.permute.xlu1 %1019  ;;  %v1255_v61 = vrot.slane %v1253_v34, 1  ;;  %v1239_v31 = vor.u32 %v1238_v54, %v1234_v10 }
  0xd0   : > { %v887_v50 = vsel %vm848_vm0, %v885_v26, %v886_v11  ;;  %v1748_v26 = vshll.u32 %v4366_v4, 16  ;;  %v277_v11 = vld [vmem:[%s3594_s22 + $0xb4] sm:$0xf] }
  0xd1   : > { %v4324_v16 = vpop.permute.xlu0 %1017  ;;  %792 = vrot.lane.b32.xlu1 %v731_v9, %s3540_s26  ;;  %v1256_v40 = vsel %vm575_vm1, %v1251_v23, %v1255_v61 }
  0xd2   : > { %v1750_v32 = vrot.slane %v1748_v26, 1  ;;  %v764_v26 = vshll.u32 %v4434_v3, 16 }
  0xd3   : > { %1941 = vrot.lane.b32.xlu0 %v1905_v25, %s3544_s30  ;;  %v4333_v33 = vpop.permute.xlu1 %1291  ;;  %v275_v25 = vld [vmem:[%s3594_s22 + $0xa8] sm:$0xf] }
  0xd4   : > { %v4386_v20 = vcombine.low %v275_v25, %v4370_v49 }
  0xd5   : > { %v1290_v15 = vpop.permute.xlu0 %1289  ;;  %794 = vrot.lane.b32.xlu1 %v743_v7, %s3540_s26  ;;  %v1963_v7 = vsel %vm1953_vm3, %v3741_v47, %v4260_v14  ;;  %v4394_v47 = vld [vmem:[%s3594_s22 + $0xb8] sm:$0xf] }
  0xd6   : > { %v1996_v45 = vsel %vm1986_vm4, %v1963_v7, %v4306_v63  ;;  %v4402_v63 = vld [vmem:[%s3594_s22 + $0xb0] ss:$0 sps:$4 sm:$0x11]   ;;  %v747_v43 = vshll.u32 %v4386_v20, 16  ;;  %v745_v25 = vshrl.u32 %v4386_v20, 16 }
  0xd7   : > { %1943 = vrot.lane.b32.xlu0 %v1908_v24, %s3544_s30  ;;  %v4348_v1 = vpop.permute.xlu1 %1419  ;;  %v1244_v24 = vsel %vm575_vm1, %v1239_v31, %v1243_v2  ;;  %v2029_v14 = vsel %vm2019_vm5, %v1996_v45, %v4324_v16  ;;  %v1965_v16 = vsel %vm1953_vm3, %v3755_v59, %v4283_v36  ;;  %v1753_v59 = vshll.u32 %v4383_v5, 16 }
  0xd8   : > { %v2062_v27 = vsel %vm2052_vm6, %v2029_v14, %v1290_v15  ;;  %v4416_v15 = vcombine.low %v277_v11, %v4394_v47  ;;  %v1998_v10 = vsel %vm1986_vm4, %v1965_v16, %v4299_v55  ;;  %v752_v23 = vshll.u32 %v4402_v63, 16 }
  0xd9   : > { %v1418_v48 = vpop.permute.xlu0 %1417  ;;  %923 = vrot.lane.b32.xlu1 %v890_v60, %s3539_s25  ;;  %v1762_v60 = vrot.slane %v1760_v30, 1  ;;  %v2031_v36 = vsel %vm2019_vm5, %v1998_v10, %v4319_v58  ;;  %v1755_v53 = vrot.slane %v1753_v59, 1  ;;  %v1913_v59 = vrot.slane %v4373_v6, 1 }
  0xda   : > { %v2095_v34 = vsel %vm2085_vm7, %v2062_v27, %v1418_v48  ;;  %v2064_v61 = vsel %vm2052_vm6, %v2031_v36, %v4333_v33  ;;  %v749_v33 = vrot.slane %v747_v43, 1  ;;  %v757_v14 = vshrl.u32 %v4416_v15, 16  ;;  %v4465_v27 = vld [vmem:[%s3594_s22 + $0xc4] sm:$0xf] }
  0xdb   : > { %921 = vrot.lane.b32.xlu0 %v887_v50, %s3539_s25  ;;  %v4362_v51 = vpop.permute.xlu1 %1531  ;;  %v3034_v50 = vld [vmem:[%s3594_s22 + $0xa8] sm:$0xe]  ;;  %v1763_v31 = vor.u32 %v1762_v60, %v1758_v18  ;;  %v2097_v58 = vsel %vm2085_vm7, %v2064_v61, %v4348_v1  ;;  %v754_v1 = vrot.slane %v752_v23, 1  ;;  %v2938_v60 = vld [vmem:[%s3594_s22 + $0xb4] sm:$0xf]  ;;  %v3101_v10 = vcombine.low %v2940_v46, %v4465_v27 }
  0xdc   : > { %v3178_v2 = vcombine.low %v3034_v50, %v4355_v28  ;;  %v2130_v56 = vsel %vm2118_vm8, %v2097_v58, %v4362_v51  ;;  %v1751_v28 = vor.u32 %v1750_v32, %v1746_v42  ;;  %v1910_v51 = vrot.slane %v4383_v5, 1  ;;  %v4472_v42 = vld [vmem:[%s3594_s22 + $0xb8] sm:$0xf]  ;;  %v3503_v61 = vld [vmem:[%s3594_s22 + $0xc8] ss:$0 sps:$4 sm:$0x11]  }
  0xdd   : > { %v1530_v9 = vpop.permute.xlu0 %1529  ;;  %1035 = vrot.lane.b32.xlu1 %v3099_v13, %s3537_s23  ;;  %v750_v11 = vor.u32 %v749_v33, %v745_v25  ;;  %v895_v23 = vrot.slane %v4434_v3, 1  ;;  %v3504_v58 = vld [vmem:[%s3594_s22 + $0xbc] ss:$0 sps:$4 sm:$0x11]   ;;  %v2972_v3 = vld [vmem:[%s3594_s22 + $0xb4] sm:$0xe] }
  0xde   : > { %v2128_v54 = vsel %vm2118_vm8, %v2095_v34, %v1530_v9  ;;  %v759_v9 = vshll.u32 %v4416_v15, 16  ;;  %v766_v34 = vrot.slane %v764_v26, 1 }
  0xdf   : > { %1033 = vrot.lane.b32.xlu0 %v3098_v29, %s3537_s23  ;;  %v1804_v13 = vpop.permute.xlu1 %1803 }
  0xe0   : > { %v2163_v30 = vsel %vm2151_vm9, %v2130_v56, %v1804_v13  ;;  %v1768_v13 = vsel %vm575_vm1, %v1763_v31, %v1767_v44 }
  0xe1   : > { %v1802_v29 = vpop.permute.xlu0 %1801  ;;  %1307 = vrot.lane.b32.xlu1 %v1256_v40, %s3541_s27  ;;  %v3035_v40 = vld [vmem:[%s3594_s22 + $0xb4] sm:$0xe] }
  0xe2   : > { %v2161_v48 = vsel %vm2151_vm9, %v2128_v54, %v1802_v29  ;;  %v761_v29 = vrot.slane %v759_v9, 1  ;;  %v3179_v5 = vcombine.low %v3035_v40, %v4346_v37  ;;  %v755_v37 = vsel %vm575_vm1, %v750_v11, %v754_v1  ;;  %v2973_v9 = vld [vmem:[%s3594_s22 + $0xc0] sm:$0xe]  ;;  %v4509_v11 = vld [vmem:[%s3594_s22 + $0xc4] sm:$0xf] }
  0xe3   : > { %1305 = vrot.lane.b32.xlu0 %v1244_v24, %s3541_s27  ;;  %v4421_v62 = vpop.permute.xlu1 %780  ;;  %v1909_v24 = vrot.slane %v3178_v2, 1  ;;  %v892_v2 = vrot.slane %v4402_v63, 1 }
  0xe4   : > { %v762_v43 = vor.u32 %v761_v29, %v757_v14  ;;  %v1912_v32 = vrot.slane %v3179_v5, 1  ;;  %v3133_v14 = vcombine.low %v2973_v9, %v4465_v27  ;;  %v3132_v29 = vcombine.low %v2972_v3, %v4472_v42 }
  0xe5   : > { %v1930_v41 = vpop.permute.xlu0 %1929  ;;  %1435 = vrot.lane.b32.xlu1 %v1402_v39, %s3538_s24  ;;  %v1756_v39 = vsel %vm575_vm1, %v1751_v28, %v1755_v53  ;;  %v1911_v16 = vsel %vm848_vm0, %v1909_v24, %v1910_v51  ;;  %v1270_v28 = vshrl.u32 %v3101_v10, 16  ;;  %v1265_v24 = vshll.u32 %v3504_v58, 16  ;;  %v4505_v51 = vld [vmem:[%s3594_s22 + $0xd0] sm:$0xf] }
  0xe6   : > { %v2194_v55 = vsel %vm2184_vm10, %v2161_v48, %v1930_v41  ;;  %v3100_v48 = vcombine.low %v2938_v60, %v4472_v42  ;;  %v1406_v27 = vrot.slane %v3133_v14, 1  ;;  %v1403_v42 = vrot.slane %v3132_v29, 1 }
  0xe7   : > { %1433 = vrot.lane.b32.xlu0 %v1399_v17, %s3538_s24  ;;  %3301 = vmatprep.mubr.msk.bf16.mxu0 %vm2237_vm11, %v2194_v55  ;;  %v4444_v12 = vpop.permute.xlu1 %782  ;;  %v310_v17 = vld [vmem:[%s3594_s22 + $0xb4] sm:$0xe]  ;;  %v1272_v55 = vshll.u32 %v3101_v10, 16  ;;  %v1267_v60 = vrot.slane %v1265_v24, 1 }
  0xe8   : > { %v3085_v50 = vcombine.low %v310_v17, %v4394_v47  ;;  %v767_v47 = vsel %vm575_vm1, %v762_v43, %v766_v34  ;;  %v1260_v25 = vshll.u32 %v3100_v48, 16  ;;  %v1258_v40 = vshrl.u32 %v3100_v48, 16 }
  0xe9   : > { %v1932_v7 = vpop.permute.xlu0 %1931  ;;  %1547 = vrot.lane.b32.xlu1 %v4359_v57, %s3542_s28  ;;  %v1274_v53 = vrot.slane %v1272_v55, 1  ;;  %v1407_v43 = vrot.slane %v3503_v61, 1 }
  0xea   : > { %v2196_v45 = vsel %vm2184_vm10, %v2163_v30, %v1932_v7  ;;  %v894_v44 = vrot.slane %v3085_v50, 1  ;;  %v1277_v30 = vshll.u32 %v3503_v61, 16  ;;  %v3004_v7 = vld [vmem:[%s3594_s22 + $0xcc] sm:$0xf]  ;;  %v1404_v50 = vrot.slane %v3504_v58, 1 }
  0xeb   : > { %1545 = vrot.lane.b32.xlu0 %v4366_v4, %s3542_s28  ;;  %3302 = vmatmul.mubr.msk.bf16.gmra.mxu0 %vm2237_vm11, %v2196_v45  ;;  %v4458_v57 = vpop.permute.xlu1 %911  ;;  %v309_v4 = vld [vmem:[%s3594_s22 + $0xa8] sm:$0xe]  ;;  %v1262_v45 = vrot.slane %v1260_v25, 1  ;;  %v3149_v17 = vcombine.low %v3004_v7, %v4505_v51  ;;  %v3036_v7 = vld [vmem:[%s3594_s22 + $0xc0] sm:$0xe] }
  0xec   : > { %v3084_v36 = vcombine.low %v309_v4, %v4370_v49  ;;  %v1914_v49 = vsel %vm848_vm0, %v1912_v32, %v1913_v59  ;;  %v896_v56 = vsel %vm848_vm0, %v894_v44, %v895_v23  ;;  %v1279_v5 = vrot.slane %v1277_v30, 1 }
  0xed   : > { %v4467_v18 = vpop.permute.xlu0 %909  ;;  %1819 = vrot.lane.b32.xlu1 %v1768_v13, %s3543_s29  ;;  %v3002_v13 = vld [vmem:[%s3594_s22 + $0xc0] sm:$0xf]  ;;  %v1263_v4 = vor.u32 %v1262_v45, %v1258_v40  ;;  %v1967_v32 = vsel %vm1953_vm3, %v3826_v21, %v4421_v62  ;;  %v1408_v62 = vsel %vm848_vm0, %v1406_v27, %v1407_v43  ;;  %v3180_v29 = vcombine.low %v3036_v7, %v4509_v11 }
  0xee   : > { %v891_v31 = vrot.slane %v3084_v36, 1  ;;  %v1784_v36 = vshll.u32 %v3149_v17, 16 }
  0xef   : > { %1817 = vrot.lane.b32.xlu0 %v1756_v39, %s3543_s29  ;;  %v4480_v54 = vpop.permute.xlu1 %1023  ;;  %v1275_v39 = vor.u32 %v1274_v53, %v1270_v28  ;;  %v1268_v23 = vsel %vm575_vm1, %v1263_v4, %v1267_v60  ;;  %v3037_v53 = vld [vmem:[%s3594_s22 + $0xcc] sm:$0xe] }
  0xf0   : > { %v893_v63 = vsel %vm848_vm0, %v891_v31, %v892_v2  ;;  %v1782_v31 = vshrl.u32 %v3149_v17, 16  ;;  %v1969_v2 = vsel %vm1953_vm3, %v3842_v35, %v4444_v12  ;;  %v1786_v58 = vrot.slane %v1784_v36, 1 }
  0xf1   : > { %v1022_v41 = vpop.permute.xlu0 %1021  ;;  %796 = vrot.lane.b32.xlu1 %v755_v37, %s3540_s26  ;;  %v4518_v37 = vld [vmem:[%s3594_s22 + $0xd4] ss:$0 sps:$4 sm:$0x11]   ;;  %v1280_v59 = vsel %vm575_vm1, %v1275_v39, %v1279_v5  ;;  %v3181_v24 = vcombine.low %v3037_v53, %v4505_v51 }
  0xf2   : > { %v1787_v45 = vor.u32 %v1786_v58, %v1782_v31 }
  0xf3   : > { %1945 = vrot.lane.b32.xlu0 %v1911_v16, %s3544_s30  ;;  %v4490_v6 = vpop.permute.xlu1 %1295  ;;  %v3148_v16 = vcombine.low %v3002_v13, %v4509_v11  ;;  %v1918_v4 = vrot.slane %v3181_v24, 1  ;;  %v1915_v11 = vrot.slane %v3180_v29, 1 }
  0xf5   : > { %v1294_v33 = vpop.permute.xlu0 %1293  ;;  %798 = vrot.lane.b32.xlu1 %v767_v47, %s3540_s26  ;;  %v2000_v47 = vsel %vm1986_vm4, %v1967_v32, %v4467_v18  ;;  %v1772_v55 = vshll.u32 %v3148_v16, 16  ;;  %v1789_v18 = vshll.u32 %v4518_v37, 16  ;;  %v1770_v25 = vshrl.u32 %v3148_v16, 16 }
  0xf6   : > { %v2033_v61 = vsel %vm2019_vm5, %v2000_v47, %v1022_v41 }
  0xf7   : > { %1947 = vrot.lane.b32.xlu0 %v1914_v49, %s3544_s30  ;;  %v4501_v1 = vpop.permute.xlu1 %1423  ;;  %v2066_v21 = vsel %vm2052_vm6, %v2033_v61, %v1294_v33  ;;  %v2002_v33 = vsel %vm1986_vm4, %v1969_v2, %v4458_v57 }
  0xf8   : > { %v2035_v30 = vsel %vm2019_vm5, %v2002_v33, %v4480_v54  ;;  %v1791_v54 = vrot.slane %v1789_v18, 1 }
  0xf9   : > { %v1422_v26 = vpop.permute.xlu0 %1421  ;;  %927 = vrot.lane.b32.xlu1 %v896_v56, %s3539_s25  ;;  %v1774_v56 = vrot.slane %v1772_v55, 1 }
  0xfa   : > { %v2099_v41 = vsel %vm2085_vm7, %v2066_v21, %v1422_v26  ;;  %v1792_v51 = vsel %vm575_vm1, %v1787_v45, %v1791_v54 }
  0xfb   : > { %925 = vrot.lane.b32.xlu0 %v893_v63, %s3539_s25  ;;  %v1536_v46 = vpop.permute.xlu1 %1535  ;;  %v2068_v63 = vsel %vm2052_vm6, %v2035_v30, %v4490_v6  ;;  %v1775_v14 = vor.u32 %v1774_v56, %v1770_v25 }
  0xfc   : > { %v2101_v57 = vsel %vm2085_vm7, %v2068_v63, %v4501_v1 }
  0xfd   : > { %v1534_v34 = vpop.permute.xlu0 %1533  ;;  %1039 = vrot.lane.b32.xlu1 %v3101_v10, %s3537_s23  ;;  %v3510_v10 = vld [vmem:[%s3594_s22 + $0xc8] ss:$0 sps:$4 sm:$0x11]   ;;  %v2134_v26 = vsel %vm2118_vm8, %v2101_v57, %v1536_v46  ;;  %v1919_v46 = vrot.slane %v4518_v37, 1 }
  0xfe   : > { %v2132_v9 = vsel %vm2118_vm8, %v2099_v41, %v1534_v34  ;;  %v1777_v28 = vshll.u32 %v3510_v10, 16  ;;  %v1916_v27 = vrot.slane %v3510_v10, 1 }
  0xff   : > { %1037 = vrot.lane.b32.xlu0 %v3100_v48, %s3537_s23  ;;  %v1808_v44 = vpop.permute.xlu1 %1807  ;;  %v1405_v48 = vsel %vm848_vm0, %v1403_v42, %v1404_v50 }
 0x100   : > { %v1779_v6 = vrot.slane %v1777_v28, 1  ;;  %v2167_v39 = vsel %vm2151_vm9, %v2134_v26, %v1808_v44  ;;  %v1917_v42 = vsel %vm848_vm0, %v1915_v11, %v1916_v27 }
 0x101   : > { %v1806_v49 = vpop.permute.xlu0 %1805  ;;  %1311 = vrot.lane.b32.xlu1 %v1280_v59, %s3541_s27 }
 0x102   : > { %v2165_v35 = vsel %vm2151_vm9, %v2132_v9, %v1806_v49  ;;  %v1780_v34 = vsel %vm575_vm1, %v1775_v14, %v1779_v6 }
 0x103   : > { %1309 = vrot.lane.b32.xlu0 %v1268_v23, %s3541_s27  ;;  %v785_v3 = vpop.permute.xlu1 %784 }
 0x104   : > { %v1971_v23 = vsel %vm1953_vm3, %v3931_v8, %v785_v3 }
 0x105   : > { %v1934_v12 = vpop.permute.xlu0 %1933  ;;  %1439 = vrot.lane.b32.xlu1 %v1408_v62, %s3538_s24 }
 0x106   : > { %v2198_v40 = vsel %vm2184_vm10, %v2165_v35, %v1934_v12 }
 0x107   : > { %1437 = vrot.lane.b32.xlu0 %v1405_v48, %s3538_s24  ;;  %3305 = vmatprep.mubr.msk.bf16.mxu0 %vm2237_vm11, %v2198_v40  ;;  %v787_v13 = vpop.permute.xlu1 %786  ;;  %s240_s24 = scalar_lea.vmem %s4809_s4, %s4815_s15 }
 0x108   : > { %v1973_v21 = vsel %vm1953_vm3, %v3947_v22, %v787_v13 }
 0x109   : > { %v1936_v5 = vpop.permute.xlu0 %1935  ;;  %1551 = vrot.lane.b32.xlu1 %v3149_v17, %s3542_s28  ;;  %v1920_v17 = vsel %vm848_vm0, %v1918_v4, %v1919_v46 }
 0x10a   : > { %v2200_v1 = vsel %vm2184_vm10, %v2167_v39, %v1936_v5 }
 0x10b   : > { %1549 = vrot.lane.b32.xlu0 %v3148_v16, %s3542_s28  ;;  %3306 = vmatmul.mubr.msk.bf16.gmra.mxu0 %vm2237_vm11, %v2200_v1  ;;  %v916_v60 = vpop.permute.xlu1 %915 }
 0x10c   : > { %v2006_v48 = vsel %vm1986_vm4, %v1973_v21, %v916_v60 }
 0x10d   : > { %v914_v43 = vpop.permute.xlu0 %913  ;;  %1823 = vrot.lane.b32.xlu1 %v1792_v51, %s3543_s29 }
 0x10e   : > { %v2004_v10 = vsel %vm1986_vm4, %v1971_v23, %v914_v43 }
 0x10f   : > { %1821 = vrot.lane.b32.xlu0 %v1780_v34, %s3543_s29  ;;  %v1028_v16 = vpop.permute.xlu1 %1027 }
 0x110   : > { %v2039_v8 = vsel %vm2019_vm5, %v2006_v48, %v1028_v16 }
 0x111   : > { %v1026_v50 = vpop.permute.xlu0 %1025  ;;  %1951 = vrot.lane.b32.xlu1 %v1920_v17, %s3544_s30 }
 0x112   : > { %v2037_v61 = vsel %vm2019_vm5, %v2004_v10, %v1026_v50 }
 0x113   : > { %1949 = vrot.lane.b32.xlu0 %v1917_v42, %s3544_s30  ;;  %v1300_v37 = vpop.permute.xlu1 %1299 }
 0x114   : > { %v2072_v25 = vsel %vm2052_vm6, %v2039_v8, %v1300_v37 }
 0x115   : > { %v1298_v32 = vpop.permute.xlu0 %1297 }
 0x116   : > { %v2070_v31 = vsel %vm2052_vm6, %v2037_v61, %v1298_v32 }
 0x117   : > { %v1428_v59 = vpop.permute.xlu1 %1427 }
 0x118   : > { %v2105_v9 = vsel %vm2085_vm7, %v2072_v25, %v1428_v59 }
 0x119   : > { %v1426_v36 = vpop.permute.xlu0 %1425 }
 0x11a   : > { %v2103_v62 = vsel %vm2085_vm7, %v2070_v31, %v1426_v36 }
 0x11b   : > { %v1540_v47 = vpop.permute.xlu1 %1539 }
 0x11c   : > { %v2138_v22 = vsel %vm2118_vm8, %v2105_v9, %v1540_v47 }
 0x11d   : > { %v1538_v44 = vpop.permute.xlu0 %1537 }
 0x11e   : > { %v2136_v18 = vsel %vm2118_vm8, %v2103_v62, %v1538_v44 }
 0x11f   : > { %v1812_v55 = vpop.permute.xlu1 %1811 }
 0x120   : > { %v2171_v56 = vsel %vm2151_vm9, %v2138_v22, %v1812_v55 }
 0x121   : > { %v1810_v49 = vpop.permute.xlu0 %1809 }
 0x122   : > { %v2169_v41 = vsel %vm2151_vm9, %v2136_v18, %v1810_v49 }
 0x123   : > { %v789_v2 = vpop.permute.xlu1 %788 }
 0x124   : > { %v1975_v26 = vsel %vm1953_vm3, %v4080_v19, %v789_v2 }
 0x125   : > { %v1938_v58 = vpop.permute.xlu0 %1937 }
 0x126   : > { %v2202_v33 = vsel %vm2184_vm10, %v2169_v41, %v1938_v58 }
 0x127   : > { %3309 = vmatprep.mubr.msk.bf16.mxu1 %vm2237_vm11, %v2202_v33  ;;  %v791_v3 = vpop.permute.xlu1 %790 }
 0x128   : > { %v1977_v5 = vsel %vm1953_vm3, %v4105_v38, %v791_v3 }
 0x129   : > { %v1940_v28 = vpop.permute.xlu0 %1939 }
 0x12a   : > { %v2204_v53 = vsel %vm2184_vm10, %v2171_v56, %v1940_v28 }
 0x12b   : > { %3310 = vmatmul.mubr.msk.bf16.vlgmr.msra.gmra.mxu1 %vm2237_vm11, %v2204_v53  ;;  %v920_v30 = vpop.permute.xlu1 %919 }
 0x12c   : > { %v2010_v51 = vsel %vm1986_vm4, %v1977_v5, %v920_v30 }
 0x12d   : > { %v918_v35 = vpop.permute.xlu0 %917 }
 0x12e   : > { %v2008_v13 = vsel %vm1986_vm4, %v1975_v26, %v918_v35 }
 0x12f   : > { %v1032_v12 = vpop.permute.xlu1 %1031 }
 0x130   : > { %v2043_v19 = vsel %vm2019_vm5, %v2010_v51, %v1032_v12 }
 0x131   : > { %v1030_v7 = vpop.permute.xlu0 %1029 }
 0x132   : > { %v2041_v6 = vsel %vm2019_vm5, %v2008_v13, %v1030_v7 }
 0x133   : > { %v1304_v63 = vpop.permute.xlu1 %1303 }
 0x134   : > { %v2076_v11 = vsel %vm2052_vm6, %v2043_v19, %v1304_v63 }
 0x135   : > { %v1302_v40 = vpop.permute.xlu0 %1301 }
 0x136   : > { %v2074_v39 = vsel %vm2052_vm6, %v2041_v6, %v1302_v40 }
 0x137   : > { %v1432_v57 = vpop.permute.xlu1 %1431 }
 0x138   : > { %v2109_v43 = vsel %vm2085_vm7, %v2076_v11, %v1432_v57 }
 0x139   : > { %v1430_v45 = vpop.permute.xlu0 %1429 }
 0x13a   : > { %v2107_v1 = vsel %vm2085_vm7, %v2074_v39, %v1430_v45 }
 0x13b   : > { %v1544_v54 = vpop.permute.xlu1 %1543 }
 0x13c   : > { %v2142_v38 = vsel %vm2118_vm8, %v2109_v43, %v1544_v54 }
 0x13d   : > { %v1542_v24 = vpop.permute.xlu0 %1541 }
 0x13e   : > { %v2140_v4 = vsel %vm2118_vm8, %v2107_v1, %v1542_v24 }
 0x13f   : > { %v1816_v14 = vpop.permute.xlu1 %1815 }
 0x140   : > { %v2175_v16 = vsel %vm2151_vm9, %v2142_v38, %v1816_v14 }
 0x141   : > { %v1814_v29 = vpop.permute.xlu0 %1813 }
 0x142   : > { %v2173_v60 = vsel %vm2151_vm9, %v2140_v4, %v1814_v29 }
 0x143   : > { %v793_v46 = vpop.permute.xlu1 %792 }
 0x144   : > { %v1979_v49 = vsel %vm1953_vm3, %v4225_v52, %v793_v46 }
 0x145   : > { %v1942_v34 = vpop.permute.xlu0 %1941 }
 0x146   : > { %v2206_v27 = vsel %vm2184_vm10, %v2173_v60, %v1942_v34 }
 0x147   : > { %3313 = vmatprep.mubr.msk.bf16.mxu1 %vm2237_vm11, %v2206_v27  ;;  %v795_v17 = vpop.permute.xlu1 %794 }
 0x148   : > { %v1981_v2 = vsel %vm1953_vm3, %v4255_v0, %v795_v17 }
 0x149   : > { %v1944_v42 = vpop.permute.xlu0 %1943 }
 0x14a   : > { %v2208_v50 = vsel %vm2184_vm10, %v2175_v16, %v1944_v42 }
 0x14b   : > { %3314 = vmatmul.mubr.msk.bf16.gmra.mxu1 %vm2237_vm11, %v2208_v50  ;;  %v924_v37 = vpop.permute.xlu1 %923 }
 0x14c   : > { %v2014_v41 = vsel %vm1986_vm4, %v1981_v2, %v924_v37 }
 0x14d   : > { %v922_v32 = vpop.permute.xlu0 %921 }
 0x14e   : > { %v2012_v31 = vsel %vm1986_vm4, %v1979_v49, %v922_v32 }
 0x14f   : > { %v1036_v59 = vpop.permute.xlu1 %1035 }
 0x150   : > { %v2047_v52 = vsel %vm2019_vm5, %v2014_v41, %v1036_v59 }
 0x151   : > { %v1034_v36 = vpop.permute.xlu0 %1033 }
 0x152   : > { %v2045_v62 = vsel %vm2019_vm5, %v2012_v31, %v1034_v36 }
 0x153   : > { %v1308_v47 = vpop.permute.xlu1 %1307 }
 0x154   : > { %v2080_v22 = vsel %vm2052_vm6, %v2047_v52, %v1308_v47 }
 0x155   : > { %v1306_v44 = vpop.permute.xlu0 %1305 }
 0x156   : > { %v2078_v18 = vsel %vm2052_vm6, %v2045_v62, %v1306_v44 }
 0x157   : > { %v1436_v23 = vpop.permute.xlu1 %1435 }
 0x158   : > { %v2113_v56 = vsel %vm2085_vm7, %v2080_v22, %v1436_v23 }
 0x159   : > { %v1434_v10 = vpop.permute.xlu0 %1433 }
 0x15a   : > { %v2111_v8 = vsel %vm2085_vm7, %v2078_v18, %v1434_v10 }
 0x15b   : > { %v1548_v55 = vpop.permute.xlu1 %1547 }
 0x15c   : > { %v2146_v0 = vsel %vm2118_vm8, %v2113_v56, %v1548_v55 }
 0x15d   : > { %v1546_v61 = vpop.permute.xlu0 %1545 }
 0x15e   : > { %v2144_v58 = vsel %vm2118_vm8, %v2111_v8, %v1546_v61 }
 0x15f   : > { %v1820_v21 = vpop.permute.xlu1 %1819 }
 0x160   : > { %v2179_v53 = vsel %vm2151_vm9, %v2146_v0, %v1820_v21 }
 0x161   : > { %v1818_v48 = vpop.permute.xlu0 %1817 }
 0x162   : > { %v2177_v33 = vsel %vm2151_vm9, %v2144_v58, %v1818_v48 }
 0x163   : > { %v797_v25 = vpop.permute.xlu1 %796 }
 0x164   : > { %v1983_v10 = vsel %vm1953_vm3, %v4386_v20, %v797_v25 }
 0x165   : > { %v1946_v9 = vpop.permute.xlu0 %1945 }
 0x166   : > { %v2210_v3 = vsel %vm2184_vm10, %v2177_v33, %v1946_v9 }
 0x167   : > { %3317 = vmatprep.mubr.msk.bf16.mxu1 %vm2237_vm11, %v2210_v3  ;;  %v799_v28 = vpop.permute.xlu1 %798 }
 0x168   : > { %v1985_v23 = vsel %vm1953_vm3, %v4416_v15, %v799_v28 }
 0x169   : > { %v1948_v30 = vpop.permute.xlu0 %1947 }
 0x16a   : > { %v2212_v35 = vsel %vm2184_vm10, %v2179_v53, %v1948_v30 }
 0x16b   : > { %v3295_v12 = vpop.f32.mrf.mxu0  ;;  %3318 = vmatmul.mubr.msk.bf16.gmra.mxu1 %vm2237_vm11, %v2212_v35  ;;  %v928_v63 = vpop.permute.xlu1 %927 }
 0x16c   : > { %v3238_v7 = vpack.c.bf16 %v3295_v12, %v3295_v12  ;;  %v2669_v14 = vmul.f32 %v3295_v12, %v3295_v12  ;;  %v2599_v46 = vsel %vm1986_vm4, %v3295_v12, 0.0  ;;  %v2018_v55 = vsel %vm1986_vm4, %v1985_v23, %v928_v63 }
 0x16d   : > { %v2308_v40 = vpop.f32.mrf.mxu0  ;;  %v926_v57 = vpop.permute.xlu0 %925 }
 0x16e   : > { %2566 = vst.msk [vmem:[%s4637_s14 + $0x8] sm:$0xf] %vm2563_vm12, %v3238_v7  ;;  %v3236_v45 = vpack.c.bf16 %v2308_v40, %v2308_v40  ;;  %v2667_v24 = vmul.f32 %v2308_v40, %v2308_v40  ;;  %v2596_v39 = vsel %vm1986_vm4, %v2308_v40, 0.0  ;;  %v2702_v17 = vsel %vm1986_vm4, %v2669_v14, 0.0 }
 0x16f   : > { %v3296_v54 = vpop.f32.mrf.mxu0  ;;  %v1040_v13 = vpop.permute.xlu1 %1039  ;;  %v2016_v61 = vsel %vm1986_vm4, %v1983_v10, %v926_v57 }
 0x170   : > { %2564 = vst.msk [vmem:[%s4637_s14] sm:$0xf] %vm2563_vm12, %v3236_v45  ;;  %v3239_v26 = vpack.c.bf16 %v3296_v54, %v3296_v54  ;;  %v2699_v19 = vsel %vm1986_vm4, %v2667_v24, 0.0  ;;  %v2670_v60 = vmul.f32 %v3296_v54, %v3296_v54  ;;  %v2601_v16 = vsel %vm1986_vm4, %v3296_v54, 0.0 }
 0x171   : > { %v2311_v6 = vpop.f32.mrf.mxu0  ;;  %v1038_v29 = vpop.permute.xlu0 %1037  ;;  %v2051_v49 = vsel %vm2019_vm5, %v2018_v55, %v1040_v13 }
 0x172   : > { %2567 = vst.msk [vmem:[%s4637_s14 + $0xc] sm:$0xf] %vm2563_vm12, %v3239_v26  ;;  %v3237_v5 = vpack.c.bf16 %v2311_v6, %v2311_v6  ;;  %v2597_v1 = vsel %vm1986_vm4, %v2311_v6, 0.0  ;;  %v2668_v51 = vmul.f32 %v2311_v6, %v2311_v6  ;;  %v2704_v37 = vsel %vm1986_vm4, %v2670_v60, 0.0 }
 0x173   : > { %v2598_v4 = vadd.f32 %v2597_v1, %v2596_v39  ;;  %v1312_v11 = vpop.permute.xlu1 %1311  ;;  %v2049_v21 = vsel %vm2019_vm5, %v2016_v61, %v1038_v29 }
 0x174   : > { %2565 = vst.msk [vmem:[%s4637_s14 + $0x4] sm:$0xf] %vm2563_vm12, %v3237_v5  ;;  %v2700_v34 = vsel %vm1986_vm4, %v2668_v51, 0.0  ;;  %v2084_v62 = vsel %vm2052_vm6, %v2051_v49, %v1312_v11 }
 0x175   : > { %v2600_v27 = vadd.f32 %v2599_v46, %v2598_v4  ;;  %v2701_v43 = vadd.f32 %v2700_v34, %v2699_v19  ;;  %v1310_v38 = vpop.permute.xlu0 %1309 }
 0x176   : > { %v2082_v18 = vsel %vm2052_vm6, %v2049_v21, %v1310_v38 }
 0x177   : > { %v2703_v42 = vadd.f32 %v2702_v17, %v2701_v43  ;;  %v2602_v50 = vadd.f32 %v2601_v16, %v2600_v27  ;;  %v1440_v32 = vpop.permute.xlu1 %1439 }
 0x178   : > { %v2117_v15 = vsel %vm2085_vm7, %v2084_v62, %v1440_v32 }
 0x179   : > { %v1438_v59 = vpop.permute.xlu0 %1437  ;;  %v2705_v36 = vadd.f32 %v2704_v37, %v2703_v42 }
 0x17a   : > { %v2115_v2 = vsel %vm2085_vm7, %v2082_v18, %v1438_v59 }
 0x17b   : > { %v1552_v47 = vpop.permute.xlu1 %1551 }
 0x17c   : > { %v2150_v20 = vsel %vm2118_vm8, %v2117_v15, %v1552_v47 }
 0x17d   : > { %v1550_v44 = vpop.permute.xlu0 %1549 }
 0x17e   : > { %v2148_v8 = vsel %vm2118_vm8, %v2115_v2, %v1550_v44 }
 0x17f   : > { %v1824_v31 = vpop.permute.xlu1 %1823 }
 0x180   : > { %v2183_v41 = vsel %vm2151_vm9, %v2150_v20, %v1824_v31 }
 0x181   : > { %v1822_v48 = vpop.permute.xlu0 %1821 }
 0x182   : > { %v2181_v25 = vsel %vm2151_vm9, %v2148_v8, %v1822_v48 }
 0x183   : > { %v1952_v58 = vpop.permute.xlu1 %1951 }
 0x184   : > { %v2216_v52 = vsel %vm2184_vm10, %v2183_v41, %v1952_v58 }
 0x185   : > { %v1950_v33 = vpop.permute.xlu0 %1949 }
 0x186   : > { %v2214_v9 = vsel %vm2184_vm10, %v2181_v25, %v1950_v33 }
 0x187   : > { %3321 = vmatprep.mubr.msk.bf16.mxu1 %vm2237_vm11, %v2214_v9 }
 0x188   : > { %3322 = vmatmul.mubr.msk.bf16.gmra.mxu1 %vm2237_vm11, %v2216_v52 }
 0x18b   : > { %v3299_v22 = vpop.f32.mrf.mxu0 }
 0x18c   : > { %v3242_v3 = vpack.c.bf16 %v3299_v22, %v3299_v22  ;;  %v2673_v57 = vmul.f32 %v3299_v22, %v3299_v22  ;;  %v2607_v13 = vsel %vm1986_vm4, %v3299_v22, 0.0 }
 0x18d   : > { %v2324_v56 = vpop.f32.mrf.mxu0 }
 0x18e   : > { %2570 = vst.msk [vmem:[%s4637_s14 + $0x18] sm:$0xf] %vm2563_vm12, %v3242_v3  ;;  %v3240_v0 = vpack.c.bf16 %v2324_v56, %v2324_v56  ;;  %v2603_v28 = vsel %vm1986_vm4, %v2324_v56, 0.0  ;;  %v2671_v53 = vmul.f32 %v2324_v56, %v2324_v56  ;;  %v2710_v5 = vsel %vm1986_vm4, %v2673_v57, 0.0 }
 0x18f   : > { %v2604_v30 = vadd.f32 %v2603_v28, %v2602_v50  ;;  %v3300_v35 = vpop.f32.mrf.mxu0 }
 0x190   : > { %2568 = vst.msk [vmem:[%s4637_s14 + $0x10] sm:$0xf] %vm2563_vm12, %v3240_v0  ;;  %v2706_v12 = vsel %vm1986_vm4, %v2671_v53, 0.0  ;;  %v3243_v7 = vpack.c.bf16 %v3300_v35, %v3300_v35  ;;  %v2674_v14 = vmul.f32 %v3300_v35, %v3300_v35  ;;  %v2609_v1 = vsel %vm1986_vm4, %v3300_v35, 0.0 }
 0x191   : > { %v2707_v63 = vadd.f32 %v2706_v12, %v2705_v36  ;;  %v2327_v40 = vpop.f32.mrf.mxu0 }
 0x192   : > { %2571 = vst.msk [vmem:[%s4637_s14 + $0x1c] sm:$0xf] %vm2563_vm12, %v3243_v7  ;;  %v3241_v45 = vpack.c.bf16 %v2327_v40, %v2327_v40  ;;  %v2605_v54 = vsel %vm1986_vm4, %v2327_v40, 0.0  ;;  %v2672_v24 = vmul.f32 %v2327_v40, %v2327_v40  ;;  %v2712_v46 = vsel %vm1986_vm4, %v2674_v14, 0.0 }
 0x193   : > { %v2606_v26 = vadd.f32 %v2605_v54, %v2604_v30 }
 0x194   : > { %2569 = vst.msk [vmem:[%s4637_s14 + $0x14] sm:$0xf] %vm2563_vm12, %v3241_v45  ;;  %v2708_v6 = vsel %vm1986_vm4, %v2672_v24, 0.0 }
 0x195   : > { %v2608_v29 = vadd.f32 %v2607_v13, %v2606_v26  ;;  %v2709_v39 = vadd.f32 %v2708_v6, %v2707_v63 }
 0x197   : > { %v2711_v51 = vadd.f32 %v2710_v5, %v2709_v39  ;;  %v2610_v4 = vadd.f32 %v2609_v1, %v2608_v29 }
 0x199   : > { %v2713_v19 = vadd.f32 %v2712_v46, %v2711_v51 }
 0x1ab   : > { %v3303_v60 = vpop.f32.mrf.mxu0 }
 0x1ac   : > { %v3246_v34 = vpack.c.bf16 %v3303_v60, %v3303_v60  ;;  %v2677_v59 = vmul.f32 %v3303_v60, %v3303_v60  ;;  %v2615_v10 = vsel %vm1986_vm4, %v3303_v60, 0.0 }
 0x1ad   : > { %v2340_v11 = vpop.f32.mrf.mxu0 }
 0x1ae   : > { %2574 = vst.msk [vmem:[%s4637_s14 + $0x28] sm:$0xf] %vm2563_vm12, %v3246_v34  ;;  %v3244_v27 = vpack.c.bf16 %v2340_v11, %v2340_v11  ;;  %v2611_v43 = vsel %vm1986_vm4, %v2340_v11, 0.0  ;;  %v2675_v38 = vmul.f32 %v2340_v11, %v2340_v11  ;;  %v2718_v21 = vsel %vm1986_vm4, %v2677_v59, 0.0 }
 0x1af   : > { %v2612_v17 = vadd.f32 %v2611_v43, %v2610_v4  ;;  %v3304_v16 = vpop.f32.mrf.mxu0 }
 0x1b0   : > { %2572 = vst.msk [vmem:[%s4637_s14 + $0x20] sm:$0xf] %vm2563_vm12, %v3244_v27  ;;  %v2714_v42 = vsel %vm1986_vm4, %v2675_v38, 0.0  ;;  %v3247_v50 = vpack.c.bf16 %v3304_v16, %v3304_v16  ;;  %v2678_v55 = vmul.f32 %v3304_v16, %v3304_v16  ;;  %v2617_v62 = vsel %vm1986_vm4, %v3304_v16, 0.0 }
 0x1b1   : > { %v2715_v37 = vadd.f32 %v2714_v42, %v2713_v19  ;;  %v2343_v32 = vpop.f32.mrf.mxu0 }
 0x1b2   : > { %2575 = vst.msk [vmem:[%s4637_s14 + $0x2c] sm:$0xf] %vm2563_vm12, %v3247_v50  ;;  %v3245_v36 = vpack.c.bf16 %v2343_v32, %v2343_v32  ;;  %v2613_v47 = vsel %vm1986_vm4, %v2343_v32, 0.0  ;;  %v2676_v44 = vmul.f32 %v2343_v32, %v2343_v32  ;;  %v2720_v15 = vsel %vm1986_vm4, %v2678_v55, 0.0 }
 0x1b3   : > { %v2614_v23 = vadd.f32 %v2613_v47, %v2612_v17 }
 0x1b4   : > { %2573 = vst.msk [vmem:[%s4637_s14 + $0x24] sm:$0xf] %vm2563_vm12, %v3245_v36  ;;  %v2716_v61 = vsel %vm1986_vm4, %v2676_v44, 0.0 }
 0x1b5   : > { %v2616_v49 = vadd.f32 %v2615_v10, %v2614_v23  ;;  %v2717_v31 = vadd.f32 %v2716_v61, %v2715_v37 }
 0x1b7   : > { %v2719_v48 = vadd.f32 %v2718_v21, %v2717_v31  ;;  %v2618_v18 = vadd.f32 %v2617_v62, %v2616_v49 }
 0x1b9   : > { %v2721_v2 = vadd.f32 %v2720_v15, %v2719_v48 }
 0x1cb   : > { %v3307_v20 = vpop.f32.mrf.mxu0 }
 0x1cc   : > { %v3250_v8 = vpack.c.bf16 %v3307_v20, %v3307_v20  ;;  %v2681_v28 = vmul.f32 %v3307_v20, %v3307_v20  ;;  %v2623_v7 = vsel %vm1986_vm4, %v3307_v20, 0.0 }
 0x1cd   : > { %v2356_v41 = vpop.f32.mrf.mxu0 }
 0x1ce   : > { %2578 = vst.msk [vmem:[%s4637_s14 + $0x38] sm:$0xf] %vm2563_vm12, %v3250_v8  ;;  %v3248_v58 = vpack.c.bf16 %v2356_v41, %v2356_v41  ;;  %v2619_v25 = vsel %vm1986_vm4, %v2356_v41, 0.0  ;;  %v2679_v52 = vmul.f32 %v2356_v41, %v2356_v41  ;;  %v2726_v54 = vsel %vm1986_vm4, %v2681_v28, 0.0 }
 0x1cf   : > { %v2620_v33 = vadd.f32 %v2619_v25, %v2618_v18  ;;  %v3308_v9 = vpop.f32.mrf.mxu0 }
 0x1d0   : > { %2576 = vst.msk [vmem:[%s4637_s14 + $0x30] sm:$0xf] %vm2563_vm12, %v3248_v58  ;;  %v2722_v22 = vsel %vm1986_vm4, %v2679_v52, 0.0  ;;  %v3251_v3 = vpack.c.bf16 %v3308_v9, %v3308_v9  ;;  %v2682_v63 = vmul.f32 %v3308_v9, %v3308_v9  ;;  %v2625_v24 = vsel %vm1986_vm4, %v3308_v9, 0.0 }
 0x1d1   : > { %v2723_v56 = vadd.f32 %v2722_v22, %v2721_v2  ;;  %v2359_v0 = vpop.f32.mrf.mxu0 }
 0x1d2   : > { %2579 = vst.msk [vmem:[%s4637_s14 + $0x3c] sm:$0xf] %vm2563_vm12, %v3251_v3  ;;  %v3249_v53 = vpack.c.bf16 %v2359_v0, %v2359_v0  ;;  %v2621_v30 = vsel %vm1986_vm4, %v2359_v0, 0.0  ;;  %v2680_v35 = vmul.f32 %v2359_v0, %v2359_v0  ;;  %v2728_v14 = vsel %vm1986_vm4, %v2682_v63, 0.0 }
 0x1d3   : > { %v2622_v12 = vadd.f32 %v2621_v30, %v2620_v33 }
 0x1d4   : > { %2577 = vst.msk [vmem:[%s4637_s14 + $0x34] sm:$0xf] %vm2563_vm12, %v3249_v53  ;;  %v2724_v40 = vsel %vm1986_vm4, %v2680_v35, 0.0 }
 0x1d5   : > { %v2624_v57 = vadd.f32 %v2623_v7, %v2622_v12  ;;  %v2725_v45 = vadd.f32 %v2724_v40, %v2723_v56 }
 0x1d7   : > { %v2727_v26 = vadd.f32 %v2726_v54, %v2725_v45  ;;  %v2626_v13 = vadd.f32 %v2625_v24, %v2624_v57 }
 0x1d9   : > { %v2729_v6 = vadd.f32 %v2728_v14, %v2727_v26 }
 0x1eb   : > { %v3311_v29 = vpop.f32.mrf.mxu1 }
 0x1ec   : > { %v3254_v39 = vpack.c.bf16 %v3311_v29, %v3311_v29  ;;  %v2685_v43 = vmul.f32 %v3311_v29, %v3311_v29  ;;  %v2631_v50 = vsel %vm1986_vm4, %v3311_v29, 0.0 }
 0x1ed   : > { %v2372_v5 = vpop.f32.mrf.mxu1 }
 0x1ee   : > { %2582 = vst.msk [vmem:[%s4637_s14 + $0x48] sm:$0xf] %vm2563_vm12, %v3254_v39  ;;  %v3252_v1 = vpack.c.bf16 %v2372_v5, %v2372_v5  ;;  %v2627_v51 = vsel %vm1986_vm4, %v2372_v5, 0.0  ;;  %v2683_v4 = vmul.f32 %v2372_v5, %v2372_v5  ;;  %v2734_v47 = vsel %vm1986_vm4, %v2685_v43, 0.0 }
 0x1ef   : > { %v2628_v46 = vadd.f32 %v2627_v51, %v2626_v13  ;;  %v3312_v19 = vpop.f32.mrf.mxu1 }
 0x1f0   : > { %2580 = vst.msk [vmem:[%s4637_s14 + $0x40] sm:$0xf] %vm2563_vm12, %v3252_v1  ;;  %v2730_v60 = vsel %vm1986_vm4, %v2683_v4, 0.0  ;;  %v3255_v34 = vpack.c.bf16 %v3312_v19, %v3312_v19  ;;  %v2686_v37 = vmul.f32 %v3312_v19, %v3312_v19  ;;  %v2633_v44 = vsel %vm1986_vm4, %v3312_v19, 0.0 }
 0x1f1   : > { %v2731_v11 = vadd.f32 %v2730_v60, %v2729_v6  ;;  %v2375_v27 = vpop.f32.mrf.mxu1 }
 0x1f2   : > { %2583 = vst.msk [vmem:[%s4637_s14 + $0x4c] sm:$0xf] %vm2563_vm12, %v3255_v34  ;;  %v3253_v38 = vpack.c.bf16 %v2375_v27, %v2375_v27  ;;  %v2629_v17 = vsel %vm1986_vm4, %v2375_v27, 0.0  ;;  %v2684_v16 = vmul.f32 %v2375_v27, %v2375_v27  ;;  %v2736_v55 = vsel %vm1986_vm4, %v2686_v37, 0.0 }
 0x1f3   : > { %v2630_v42 = vadd.f32 %v2629_v17, %v2628_v46 }
 0x1f4   : > { %2581 = vst.msk [vmem:[%s4637_s14 + $0x44] sm:$0xf] %vm2563_vm12, %v3253_v38  ;;  %v2732_v32 = vsel %vm1986_vm4, %v2684_v16, 0.0 }
 0x1f5   : > { %v2632_v59 = vadd.f32 %v2631_v50, %v2630_v42  ;;  %v2733_v36 = vadd.f32 %v2732_v32, %v2731_v11 }
 0x1f7   : > { %v2735_v23 = vadd.f32 %v2734_v47, %v2733_v36  ;;  %v2634_v10 = vadd.f32 %v2633_v44, %v2632_v59 }
 0x1f9   : > { %v2737_v61 = vadd.f32 %v2736_v55, %v2735_v23 }
 0x20b   : > { %v3315_v49 = vpop.f32.mrf.mxu1 }
 0x20c   : > { %v3258_v31 = vpack.c.bf16 %v3315_v49, %v3315_v49  ;;  %v2689_v7 = vmul.f32 %v3315_v49, %v3315_v49  ;;  %v2639_v40 = vsel %vm1986_vm4, %v3315_v49, 0.0 }
 0x20d   : > { %v2388_v21 = vpop.f32.mrf.mxu1 }
 0x20e   : > { %2586 = vst.msk [vmem:[%s4637_s14 + $0x58] sm:$0xf] %vm2563_vm12, %v3258_v31  ;;  %v3256_v62 = vpack.c.bf16 %v2388_v21, %v2388_v21  ;;  %v2687_v33 = vmul.f32 %v2388_v21, %v2388_v21  ;;  %v2635_v3 = vsel %vm1986_vm4, %v2388_v21, 0.0  ;;  %v2742_v45 = vsel %vm1986_vm4, %v2689_v7, 0.0 }
 0x20f   : > { %v3316_v48 = vpop.f32.mrf.mxu1  ;;  %v2636_v53 = vadd.f32 %v2635_v3, %v2634_v10 }
 0x210   : > { %2584 = vst.msk [vmem:[%s4637_s14 + $0x50] sm:$0xf] %vm2563_vm12, %v3256_v62  ;;  %v3259_v18 = vpack.c.bf16 %v3316_v48, %v3316_v48  ;;  %v2738_v0 = vsel %vm1986_vm4, %v2687_v33, 0.0  ;;  %v2690_v54 = vmul.f32 %v3316_v48, %v3316_v48  ;;  %v2641_v13 = vsel %vm1986_vm4, %v3316_v48, 0.0 }
 0x211   : > { %v2391_v15 = vpop.f32.mrf.mxu1  ;;  %v2739_v35 = vadd.f32 %v2738_v0, %v2737_v61 }
 0x212   : > { %2587 = vst.msk [vmem:[%s4637_s14 + $0x5c] sm:$0xf] %vm2563_vm12, %v3259_v18  ;;  %v3257_v2 = vpack.c.bf16 %v2391_v15, %v2391_v15  ;;  %v2688_v56 = vmul.f32 %v2391_v15, %v2391_v15  ;;  %v2637_v28 = vsel %vm1986_vm4, %v2391_v15, 0.0  ;;  %v2744_v39 = vsel %vm1986_vm4, %v2690_v54, 0.0 }
 0x213   : > { %v2638_v12 = vadd.f32 %v2637_v28, %v2636_v53 }
 0x214   : > { %2585 = vst.msk [vmem:[%s4637_s14 + $0x54] sm:$0xf] %vm2563_vm12, %v3257_v2  ;;  %v2740_v30 = vsel %vm1986_vm4, %v2688_v56, 0.0 }
 0x215   : > { %v2741_v63 = vadd.f32 %v2740_v30, %v2739_v35  ;;  %v2640_v57 = vadd.f32 %v2639_v40, %v2638_v12 }
 0x217   : > { %v2743_v26 = vadd.f32 %v2742_v45, %v2741_v63  ;;  %v2642_v29 = vadd.f32 %v2641_v13, %v2640_v57 }
 0x219   : > { %v2745_v4 = vadd.f32 %v2744_v39, %v2743_v26 }
 0x22b   : > { %v3319_v20 = vpop.f32.mrf.mxu1 }
 0x22c   : > { %v3262_v8 = vpack.c.bf16 %v3319_v20, %v3319_v20  ;;  %v2693_v34 = vmul.f32 %v3319_v20, %v3319_v20  ;;  %v2647_v27 = vsel %vm1986_vm4, %v3319_v20, 0.0 }
 0x22d   : > { %v2404_v41 = vpop.f32.mrf.mxu1 }
 0x22e   : > { %2590 = vst.msk [vmem:[%s4637_s14 + $0x68] sm:$0xf] %vm2563_vm12, %v3262_v8  ;;  %v3260_v58 = vpack.c.bf16 %v2404_v41, %v2404_v41  ;;  %v2691_v24 = vmul.f32 %v2404_v41, %v2404_v41  ;;  %v2643_v14 = vsel %vm1986_vm4, %v2404_v41, 0.0  ;;  %v2750_v17 = vsel %vm1986_vm4, %v2693_v34, 0.0 }
 0x22f   : > { %v3320_v25 = vpop.f32.mrf.mxu1  ;;  %v2644_v51 = vadd.f32 %v2643_v14, %v2642_v29 }
 0x230   : > { %2588 = vst.msk [vmem:[%s4637_s14 + $0x60] sm:$0xf] %vm2563_vm12, %v3260_v58  ;;  %v3263_v52 = vpack.c.bf16 %v3320_v25, %v3320_v25  ;;  %v2746_v5 = vsel %vm1986_vm4, %v2691_v24, 0.0  ;;  %v2694_v16 = vmul.f32 %v3320_v25, %v3320_v25  ;;  %v2649_v32 = vsel %vm1986_vm4, %v3320_v25, 0.0 }
 0x231   : > { %v2407_v9 = vpop.f32.mrf.mxu1  ;;  %v2747_v19 = vadd.f32 %v2746_v5, %v2745_v4 }
 0x232   : > { %2591 = vst.msk [vmem:[%s4637_s14 + $0x6c] sm:$0xf] %vm2563_vm12, %v3263_v52  ;;  %v3261_v22 = vpack.c.bf16 %v2407_v9, %v2407_v9  ;;  %v2692_v6 = vmul.f32 %v2407_v9, %v2407_v9  ;;  %v2645_v1 = vsel %vm1986_vm4, %v2407_v9, 0.0  ;;  %v2752_v10 = vsel %vm1986_vm4, %v2694_v16, 0.0 }
 0x233   : > { %v2646_v60 = vadd.f32 %v2645_v1, %v2644_v51 }
 0x234   : > { %2589 = vst.msk [vmem:[%s4637_s14 + $0x64] sm:$0xf] %vm2563_vm12, %v3261_v22  ;;  %v2748_v46 = vsel %vm1986_vm4, %v2692_v6, 0.0 }
 0x235   : > { %v2749_v11 = vadd.f32 %v2748_v46, %v2747_v19  ;;  %v2648_v43 = vadd.f32 %v2647_v27, %v2646_v60 }
 0x237   : > { %v2751_v50 = vadd.f32 %v2750_v17, %v2749_v11  ;;  %v2650_v44 = vadd.f32 %v2649_v32, %v2648_v43 }
 0x239   : > { %v2753_v31 = vadd.f32 %v2752_v10, %v2751_v50 }
 0x248   : > { %v3323_v38 = vpop.f32.mrf.mxu1 }
 0x249   : > { %v3266_v42 = vpack.c.bf16 %v3323_v38, %v3323_v38  ;;  %v2697_v62 = vmul.f32 %v3323_v38, %v3323_v38  ;;  %v2655_v8 = vsel %vm1986_vm4, %v3323_v38, 0.0 }
 0x24a   : > { %v2420_v37 = vpop.f32.mrf.mxu1 }
 0x24b   : > { %2594 = vst.msk [vmem:[%s4637_s14 + $0x78] sm:$0xf] %vm2563_vm12, %v3266_v42  ;;  %v3264_v59 = vpack.c.bf16 %v2420_v37, %v2420_v37  ;;  %v2651_v36 = vsel %vm1986_vm4, %v2420_v37, 0.0  ;;  %v2695_v47 = vmul.f32 %v2420_v37, %v2420_v37  ;;  %v2758_v33 = vsel %vm1986_vm4, %v2697_v62, 0.0 }
 0x24c   : > { %v3324_v23 = vpop.f32.mrf.mxu1  ;;  %v2652_v49 = vadd.f32 %v2651_v36, %v2650_v44 }
 0x24d   : > { %2592 = vst.msk [vmem:[%s4637_s14 + $0x70] sm:$0xf] %vm2563_vm12, %v3264_v59  ;;  %v2754_v55 = vsel %vm1986_vm4, %v2695_v47, 0.0  ;;  %v3267_v61 = vpack.c.bf16 %v3324_v23, %v3324_v23  ;;  %v2698_v41 = vmul.f32 %v3324_v23, %v3324_v23  ;;  %v2657_v9 = vsel %vm1986_vm4, %v3324_v23, 0.0 }
 0x24e   : > { %v2423_v21 = vpop.f32.mrf.mxu1  ;;  %v2755_v2 = vadd.f32 %v2754_v55, %v2753_v31 }
 0x24f   : > { %2595 = vst.msk [vmem:[%s4637_s14 + $0x7c] sm:$0xf] %vm2563_vm12, %v3267_v61  ;;  %v3265_v48 = vpack.c.bf16 %v2423_v21, %v2423_v21  ;;  %v2653_v18 = vsel %vm1986_vm4, %v2423_v21, 0.0  ;;  %v2696_v15 = vmul.f32 %v2423_v21, %v2423_v21  ;;  %v2760_v56 = vsel %vm1986_vm4, %v2698_v41, 0.0 }
 0x250   : > { %v2654_v20 = vadd.f32 %v2653_v18, %v2652_v49 }
 0x251   : > { %2593 = vst.msk [vmem:[%s4637_s14 + $0x74] sm:$0xf] %vm2563_vm12, %v3265_v48  ;;  %v2756_v58 = vsel %vm1986_vm4, %v2696_v15, 0.0 }
 0x252   : > { %v2656_v25 = vadd.f32 %v2655_v8, %v2654_v20  ;;  %v2757_v52 = vadd.f32 %v2756_v58, %v2755_v2 }
 0x254   : > { %v2658_v22 = vadd.f32 %v2657_v9, %v2656_v25  ;;  %v2759_v3 = vadd.f32 %v2758_v33, %v2757_v52 }
 0x256   : > { %v2659_v0 = vrot.slane %v2658_v22, 4  ;;  %v2761_v28 = vadd.f32 %v2760_v56, %v2759_v3 }
 0x258   : > { %v2660_v53 = vadd.f32 %v2659_v0, %v2658_v22  ;;  %v2762_v30 = vrot.slane %v2761_v28, 4 }
 0x25a   : > { %v2661_v35 = vrot.slane %v2660_v53, 2  ;;  %v2763_v12 = vadd.f32 %v2762_v30, %v2761_v28 }
 0x25c   : > { %v2662_v7 = vadd.f32 %v2661_v35, %v2660_v53  ;;  %v2764_v63 = vrot.slane %v2763_v12, 2 }
 0x25e   : > { %v2663_v40 = vrot.slane %v2662_v7, 1  ;;  %v2765_v57 = vadd.f32 %v2764_v63, %v2763_v12 }
 0x260   : > { %v2664_v45 = vadd.f32 %v2663_v40, %v2662_v7  ;;  %v2766_v54 = vrot.slane %v2765_v57, 1 }
 0x262   : > { %2666 = vst.msk [vmem:[%s235_s21] sm:$0x1] %vm2665_vm13, %v2664_v45  ;;  %v2767_v24 = vadd.f32 %v2766_v54, %v2765_v57 }
 0x264   : > { %2768 = vst.msk [vmem:[%s240_s24] sm:$0x1] %vm2665_vm13, %v2767_v24 }
 0x265 PF: > { %s15_s17 = sadd.s32 1, %s3535_s17   ;;  %s4810_s15 = smov %s3531_s16 }
 0x266   : > { %p12_p5 = scmp.ge.s32.totalorder %s15_s17, 4   ;;  %s4811_s16 = smov %s4813_s18 }
 0x268   :  { %14 = sbr.rel (!%p12_p5) target bundleno = 2 (0x2), region = 85 }

</bundles_post_ra>
